<compile_context>
chip_gen: v7x
topology: tpu7x:2x2x1
jax: 0.10.0
libtpu: 0.0.40
codegen_flags: <defaults>
</compile_context>

<pallas_src>
import functools
import math

import jax
import jax.numpy as jnp
from jax.experimental import pallas as pl
from jax.experimental.pallas import tpu as pltpu


def _round_up(x, m):
    return (x + m - 1) // m * m


def _cdiv(a, b):
    return -(-a // b)


# ---------------------------------------------------------------------------
# Kernel 1: conv as one deep MXU matmul per grid step (diagonal-blocked KD
# reduction) + bias + MaskConv time mask + per-tile BN partial statistics.
# grid = (B, NDB, NT, NKg); b/db/t "parallel", g (reduction) "arbitrary".
# ---------------------------------------------------------------------------
def conv_mask_stats_kernel(dout, tout, bd, cout, nkg,
                           lens_ref, x_ref, w_ref, bias_ref,
                           y_ref, psum_ref, psq_ref, acc_ref):
    # All grid queries at the kernel top level (never inside pl.when bodies):
    # program_id inside a cond branch has no lowering on the interpret path.
    b = pl.program_id(0)
    db = pl.program_id(1)
    tb = pl.program_id(2)
    g = pl.program_id(3)
    seq_len = lens_ref[b]

    @pl.when(g == 0)
    def _():
        acc_ref[...] = jnp.zeros_like(acc_ref)

    # (BD*Cout, BD*CKg) @ (BD*CKg, TT) -> f32 (BD*Cout, TT) on the MXU.
    acc_ref[...] += jnp.dot(w_ref[g], x_ref[0, 0],
                            preferred_element_type=jnp.float32)

    @pl.when(g == nkg - 1)
    def _():
        tt = y_ref.shape[3]
        y = acc_ref[...].reshape(bd, cout, tt) + bias_ref[...]      # bias (Cout,1)
        tpos = tb * tt + jax.lax.broadcasted_iota(jnp.int32, (bd, cout, tt), 2)
        drow = db * bd + jax.lax.broadcasted_iota(jnp.int32, (bd, cout, tt), 0)
        # MaskConv: zero t >= lengths[b]; also zero time / frequency padding
        # so it cannot pollute the BN statistics.
        keep = (tpos < tout) & (tpos < seq_len) & (drow < dout)
        y = jnp.where(keep, y, 0.0)
        y_ref[0] = y.astype(y_ref.dtype)
        s1 = jnp.sum(y, axis=0)                                     # (Cout, TT)
        s2 = jnp.sum(y * y, axis=0)
        psum_ref[0] = jnp.sum(s1, axis=1, keepdims=True)            # (Cout, 1)
        psq_ref[0] = jnp.sum(s2, axis=1, keepdims=True)


# ---------------------------------------------------------------------------
# Kernel 2: BatchNorm (folded to scale/shift FMA) + Hardtanh(0,20) + mask.
# grid = (B, NDB, NT), purely elementwise, lane-dense blocks.
# ---------------------------------------------------------------------------
def bn_htanh_mask_kernel(lens_ref, y_ref, scale_ref, shift_ref, o_ref):
    b = pl.program_id(0)
    tb = pl.program_id(2)
    _, bd, cout, tt = o_ref.shape
    seq_len = lens_ref[b]
    z = y_ref[0].astype(jnp.float32) * scale_ref[...] + shift_ref[...]
    z = jnp.clip(z, 0.0, 20.0)                                      # Hardtanh(0, 20)
    tpos = tb * tt + jax.lax.broadcasted_iota(jnp.int32, (bd, cout, tt), 2)
    o_ref[0] = jnp.where(tpos < seq_len, z, 0.0).astype(o_ref.dtype)


# ---------------------------------------------------------------------------
# Diagonal-blocked weights: wd[g, j_out, co, (j, s, ci, kt)] =
#   W[co, ci, (g*BD + j - j_out)*sd + s, kt]    (0 where out of range),
# so that one (BD*Cout, BD*CKg) matmul per reduction step computes BD output
# frequency rows at once from one BD-row block of the activation table.
# ---------------------------------------------------------------------------
def _build_diag_weights(w, sd, KDg, BD, NKg):
    Cout, Cin, KD, KT = w.shape
    wp = jnp.pad(w, ((0, 0), (0, 0), (0, KDg * sd - KD), (0, 0)))
    wg = wp.reshape(Cout, Cin, KDg, sd, KT)
    g = jnp.arange(NKg)[:, None, None]
    jo = jnp.arange(BD)[None, :, None]
    j = jnp.arange(BD)[None, None, :]
    rel = g * BD + j - jo                               # (NKg, BD_out, BD_in)
    valid = (rel >= 0) & (rel < KDg)
    relc = jnp.clip(rel, 0, KDg - 1)
    wd = wg[:, :, relc]                                 # (Cout, Cin, NKg, BDo, BDi, sd, KT)
    wd = jnp.where(valid[None, None, :, :, :, None, None], wd, 0.0)
    wd = wd.transpose(2, 3, 0, 4, 5, 1, 6)              # (NKg, BDo, Cout, BDi, sd, Cin, KT)
    return wd.reshape(NKg, BD * Cout, BD * sd * Cin * KT).astype(jnp.bfloat16)


# ---------------------------------------------------------------------------
# One [Conv2d -> mask -> BatchNorm2d -> mask -> Hardtanh -> mask] stage.
# h: (B, D, Cin, T) activations (channels in dim 2, time on lanes).
# returns (B, Dout, Cout, Tout) in the same layout.
# ---------------------------------------------------------------------------
def conv_bn_htanh_stage(h, lengths, w, bias, stride, padding, out_dtype):
    B, D, Cin, T = h.shape
    Cout, Cin_w, KD, KT = w.shape
    assert Cin == Cin_w
    sd, st = stride
    pd, pt = padding

    Dout = (D + 2 * pd - KD) // sd + 1
    Tout = (T + 2 * pt - KT) // st + 1
    KDg = _cdiv(KD, sd)                          # frequency-kernel groups
    CKg = sd * Cin * KT                          # contraction rows per DG row

    # BD output frequency rows per step; per-step contraction depth BD*CKg
    # targets ~256 (v6e/v7x MXU depth; 2x128 on v5e).
    if CKg <= 256:
        BD = min(Dout, 16, max(4, 256 // CKg))
    else:
        BD = min(Dout, 4)
    NDB = _cdiv(Dout, BD)
    NKg = _cdiv(BD + KDg - 1, BD)                # diagonal reduction steps
    NDGB = NDB + NKg - 1                         # DG blocks in the table

    TT = min(1024 if BD * CKg <= 1024 else 512, max(128, _round_up(Tout, 128)))
    Ttpad = _round_up(Tout, TT)
    NT = Ttpad // TT

    # --- XLA-side activation table (time-unroll stopgap, built transpose-free).
    DRpad = NDGB * BD * sd                       # padded frequency rows
    Thp = (Ttpad - 1) * st + KT                  # padded input time length
    assert DRpad >= D + pd and Thp >= T + pt
    hp = jnp.pad(h.astype(jnp.bfloat16),
                 ((0, 0), (pd, DRpad - D - pd), (0, 0), (pt, Thp - T - pt)))
    taps = [hp[:, :, :, kt: kt + (Ttpad - 1) * st + 1: st] for kt in range(KT)]
    x1 = jnp.stack(taps, axis=3)                 # (B, DRpad, Cin, KT, Ttpad)
    ptab = x1.reshape(B, NDGB, BD * CKg, Ttpad)  # K rows ordered (j, s, ci, kt)

    wd = _build_diag_weights(w, sd, KDg, BD, NKg)      # (NKg, BD*Cout, BD*CKg)
    bvec = bias.reshape(Cout, 1).astype(jnp.float32)

    nblk = B * NDB * NT
    vmem_cap = 32 * 1024 * 1024                  # ~5-10 MiB actual use; v7x-safe

    y, psum, psq = pl.pallas_call(
        functools.partial(conv_mask_stats_kernel, Dout, Tout, BD, Cout, NKg),
        grid_spec=pltpu.PrefetchScalarGridSpec(
            num_scalar_prefetch=1,
            grid=(B, NDB, NT, NKg),
            in_specs=[
                pl.BlockSpec((1, 1, BD * CKg, TT),
                             lambda b, d, t, g, lens: (b, d + g, 0, t)),
                pl.BlockSpec((NKg, BD * Cout, BD * CKg),
                             lambda b, d, t, g, lens: (0, 0, 0)),
                pl.BlockSpec((Cout, 1),
                             lambda b, d, t, g, lens: (0, 0)),
            ],
            out_specs=(
                pl.BlockSpec((1, BD, Cout, TT),
                             lambda b, d, t, g, lens: (b, d, 0, t)),
                pl.BlockSpec((1, Cout, 1),
                             lambda b, d, t, g, lens: (b * NDB * NT + d * NT + t, 0, 0)),
                pl.BlockSpec((1, Cout, 1),
                             lambda b, d, t, g, lens: (b * NDB * NT + d * NT + t, 0, 0)),
            ),
            scratch_shapes=[pltpu.VMEM((BD * Cout, TT), jnp.float32)],
        ),
        out_shape=(
            jax.ShapeDtypeStruct((B, NDB * BD, Cout, Ttpad), jnp.bfloat16),
            jax.ShapeDtypeStruct((nblk, Cout, 1), jnp.float32),
            jax.ShapeDtypeStruct((nblk, Cout, 1), jnp.float32),
        ),
        compiler_params=pltpu.CompilerParams(
            dimension_semantics=("parallel", "parallel", "parallel", "arbitrary"),
            vmem_limit_bytes=vmem_cap),
    )(lengths, ptab, wd, bvec)

    # Finalise BatchNorm batch statistics (tiny XLA reduction).  Masked zeros
    # count in the denominator, matching PyTorch MaskConv -> BN ordering.
    count = float(B * Dout * Tout)
    mean = jnp.sum(psum, axis=0) / count                          # (Cout, 1)
    var = jnp.maximum(jnp.sum(psq, axis=0) / count - mean * mean, 0.0)
    scale = jax.lax.rsqrt(var + 1e-5)                             # gamma = 1
    shift = -mean * scale                                         # beta = 0

    z = pl.pallas_call(
        bn_htanh_mask_kernel,
        grid_spec=pltpu.PrefetchScalarGridSpec(
            num_scalar_prefetch=1,
            grid=(B, NDB, NT),
            in_specs=[
                pl.BlockSpec((1, BD, Cout, TT), lambda b, d, t, lens: (b, d, 0, t)),
                pl.BlockSpec((Cout, 1), lambda b, d, t, lens: (0, 0)),
                pl.BlockSpec((Cout, 1), lambda b, d, t, lens: (0, 0)),
            ],
            out_specs=pl.BlockSpec((1, BD, Cout, TT),
                                   lambda b, d, t, lens: (b, d, 0, t)),
        ),
        out_shape=jax.ShapeDtypeStruct((B, NDB * BD, Cout, Ttpad), out_dtype),
        compiler_params=pltpu.CompilerParams(
            dimension_semantics=("parallel", "parallel", "parallel"),
            vmem_limit_bytes=vmem_cap),
    )(lengths, y, scale, shift)

    return z[:, :Dout, :, :Tout]


# ---------------------------------------------------------------------------
# get_seq_lens: only the two Conv2d modules change the time length
# (kernel 11, pad 5, dilation 1, strides 2 then 1), as in the PyTorch spec.
# ---------------------------------------------------------------------------
def get_seq_lens(lengths):
    l = lengths
    for (kt, st, pt_, dt) in [(11, 2, 5, 1), (11, 1, 5, 1)]:
        l = (l + 2 * pt_ - dt * (kt - 1) - 1) // st + 1
    return l.astype(jnp.int32)


# ---------------------------------------------------------------------------
# CNN2 forward
# ---------------------------------------------------------------------------
@jax.jit
def cnn2_forward(x, lengths, w1, b1, w2, b2):
    # NCHW (B, 1, D, T)  ->  (B, D, C, T) working layout (time on lanes).
    h = x.transpose(0, 2, 1, 3)
    h = conv_bn_htanh_stage(h, lengths, w1, b1, stride=(2, 2), padding=(20, 5),
                            out_dtype=jnp.bfloat16)
    h = conv_bn_htanh_stage(h, lengths, w2, b2, stride=(2, 1), padding=(10, 5),
                            out_dtype=jnp.float32)
    out = h.transpose(0, 2, 1, 3)            # back to NCHW (B, 32, Dout, Tout)
    return out, get_seq_lens(lengths)


# ---------------------------------------------------------------------------
# Deterministic parameter init (PyTorch Conv2d default: U(-1/sqrt(fan_in), .))
# ---------------------------------------------------------------------------
def init_params(key):
    k1, k2, k3, k4 = jax.random.split(key, 4)
    fan1 = 1 * 41 * 11
    bd1 = 1.0 / math.sqrt(fan1)
    w1 = jax.random.uniform(k1, (32, 1, 41, 11), jnp.float32, -bd1, bd1)
    b1 = jax.random.uniform(k2, (32,), jnp.float32, -bd1, bd1)
    fan2 = 32 * 21 * 11
    bd2 = 1.0 / math.sqrt(fan2)
    w2 = jax.random.uniform(k3, (32, 32, 21, 11), jnp.float32, -bd2, bd2)
    b2 = jax.random.uniform(k4, (32,), jnp.float32, -bd2, bd2)
    return w1, b1, w2, b2


if __name__ == "__main__":
    key = jax.random.PRNGKey(0)
    kp, kx = jax.random.split(key)
    w1, b1, w2, b2 = init_params(kp)

    # Input is BxCxDxT with C=1 (spectrogram): small test shapes.
    B, D, T = 2, 16, 16
    x = jax.random.normal(kx, (B, 1, D, T), jnp.float32)
    lengths = jnp.array([7, 5], dtype=jnp.int32)  # < output T: masking exercised

    out, out_lens = cnn2_forward(x, lengths, w1, b1, w2, b2)
    jax.block_until_ready((out, out_lens))

    assert out.shape == (B, 32, 4, 8), out.shape
    assert out_lens.shape == (B,) and out_lens.dtype == jnp.int32
    print("KERNEL_OK")
</pallas_src>

<mosaic_0001>
module attributes {stable_mosaic.version = 11 : i64} {
  func.func @conv_mask_stats_kernel(%arg0: i32, %arg1: i32, %arg2: i32, %arg3: i32, %arg4: memref<2xi32, #tpu.memory_space<smem>>, %arg5: memref<1x1x176x128xbf16, #tpu.memory_space<vmem>>, %arg6: memref<4x256x176xbf16, #tpu.memory_space<vmem>>, %arg7: memref<32x1xf32, #tpu.memory_space<vmem>>, %arg8: memref<1x8x32x128xbf16, #tpu.memory_space<vmem>>, %arg9: memref<1x32x1xf32, #tpu.memory_space<vmem>>, %arg10: memref<1x32x1xf32, #tpu.memory_space<vmem>>, %arg11: memref<256x128xf32, #tpu.memory_space<vmem>>) attributes {dimension_semantics = [#tpu.dimension_semantics<parallel>, #tpu.dimension_semantics<parallel>, #tpu.dimension_semantics<parallel>, #tpu.dimension_semantics<arbitrary>], iteration_bounds = array<i64: 2, 1, 1, 4>, scalar_prefetch = 1 : i64, scratch_operands = 1 : i64, tpu.core_type = #tpu.core_type<tc>, window_params = [{transform_indices = @transform_0, window_bounds = array<i64: 1, 1, 176, 128>}, {pipeline_mode = #tpu.pipeline_mode<synchronous>, transform_indices = @transform_1, window_bounds = array<i64: 4, 256, 176>}, {pipeline_mode = #tpu.pipeline_mode<synchronous>, transform_indices = @transform_2, window_bounds = array<i64: 32, 1>}, {transform_indices = @transform_3, window_bounds = array<i64: 1, 8, 32, 128>}, {transform_indices = @transform_4, window_bounds = array<i64: 1, 32, 1>}, {transform_indices = @transform_5, window_bounds = array<i64: 1, 32, 1>}]} {
    %0 = arith.index_cast %arg0 : i32 to index
    %1 = memref.load %arg4[%0] : memref<2xi32, #tpu.memory_space<smem>>
    %c0_i32 = arith.constant 0 : i32
    %2 = arith.cmpi eq, %arg3, %c0_i32 : i32
    %3 = arith.extui %2 : i1 to i32
    %c0_i32_0 = arith.constant 0 : i32
    %4 = arith.cmpi ne, %3, %c0_i32_0 : i32
    scf.if %4 {
      %cst_11 = arith.constant 0.000000e+00 : f32
      %17 = vector.broadcast %cst_11 : f32 to vector<256x128xf32>
      %c0_12 = arith.constant 0 : index
      %c0_13 = arith.constant 0 : index
      %18 = vector.load %arg11[%c0_12, %c0_13] : memref<256x128xf32, #tpu.memory_space<vmem>>, vector<256x128xf32>
      tpu.vector_store %arg11[%c0_12, %c0_13], %17 {strides = array<i32>} : memref<256x128xf32, #tpu.memory_space<vmem>>, vector<256x128xf32>,
    } else {
    }
    %c0 = arith.constant 0 : index
    %c0_1 = arith.constant 0 : index
    %5 = vector.load %arg11[%c0, %c0_1] : memref<256x128xf32, #tpu.memory_space<vmem>>, vector<256x128xf32>
    %6 = arith.index_cast %arg3 : i32 to index
    %c0_2 = arith.constant 0 : index
    %c0_3 = arith.constant 0 : index
    %7 = vector.load %arg6[%6, %c0_2, %c0_3] : memref<4x256x176xbf16, #tpu.memory_space<vmem>>, vector<1x256x176xbf16>
    %8 = vector.shape_cast %7 : vector<1x256x176xbf16> to vector<256x176xbf16>
    %c0_4 = arith.constant 0 : index
    %c0_5 = arith.constant 0 : index
    %c0_6 = arith.constant 0 : index
    %c0_7 = arith.constant 0 : index
    %9 = vector.load %arg5[%c0_4, %c0_5, %c0_6, %c0_7] : memref<1x1x176x128xbf16, #tpu.memory_space<vmem>>, vector<1x1x176x128xbf16>
    %10 = vector.shape_cast %9 : vector<1x1x176x128xbf16> to vector<176x128xbf16>
    %cst = arith.constant dense<0.000000e+00> : vector<256x128xf32>
    %11 = tpu.matmul %8, %10, %cst {dimension_numbers = #tpu.dot_dimension_numbers<[1], [0], [0], [1], [0, 0, 1, 1], [], []>} : vector<256x176xbf16>, vector<176x128xbf16>, vector<256x128xf32> -> vector<256x128xf32>
    %12 = arith.addf %5, %11 : vector<256x128xf32>
    %c0_8 = arith.constant 0 : index
    %c0_9 = arith.constant 0 : index
    %13 = vector.load %arg11[%c0_8, %c0_9] : memref<256x128xf32, #tpu.memory_space<vmem>>, vector<256x128xf32>
    tpu.vector_store %arg11[%c0_8, %c0_9], %12 {strides = array<i32>} : memref<256x128xf32, #tpu.memory_space<vmem>>, vector<256x128xf32>,
    %c3_i32 = arith.constant 3 : i32
    %14 = arith.cmpi eq, %arg3, %c3_i32 : i32
    %15 = arith.extui %14 : i1 to i32
    %c0_i32_10 = arith.constant 0 : i32
    %16 = arith.cmpi ne, %15, %c0_i32_10 : i32
    scf.if %16 {
      %c0_11 = arith.constant 0 : index
      %c0_12 = arith.constant 0 : index
      %17 = vector.load %arg11[%c0_11, %c0_12] : memref<256x128xf32, #tpu.memory_space<vmem>>, vector<256x128xf32>
      %18 = vector.shape_cast %17 : vector<256x128xf32> to vector<8x32x128xf32>
      %c0_13 = arith.constant 0 : index
      %c0_14 = arith.constant 0 : index
      %19 = vector.load %arg7[%c0_13, %c0_14] : memref<32x1xf32, #tpu.memory_space<vmem>>, vector<32x1xf32>
      %20 = vector.shape_cast %19 : vector<32x1xf32> to vector<1x32x1xf32>
      %21 = vector.broadcast %20 : vector<1x32x1xf32> to vector<8x32x128xf32>
      %22 = arith.addf %18, %21 : vector<8x32x128xf32>
      %c128_i32 = arith.constant 128 : i32
      %23 = arith.muli %arg2, %c128_i32 : i32
      %24 = tpu.iota {dimensions = array<i32: 2>} : vector<8x32x128xi32>
      %25 = vector.broadcast %23 : i32 to vector<8x32x128xi32>
      %26 = arith.addi %25, %24 : vector<8x32x128xi32>
      %c8_i32 = arith.constant 8 : i32
      %27 = arith.muli %arg1, %c8_i32 : i32
      %28 = tpu.iota {dimensions = array<i32: 0>} : vector<8x32x128xi32>
      %29 = vector.broadcast %27 : i32 to vector<8x32x128xi32>
      %30 = arith.addi %29, %28 : vector<8x32x128xi32>
      %c8_i32_15 = arith.constant 8 : i32
      %31 = vector.broadcast %c8_i32_15 : i32 to vector<8x32x128xi32>
      %32 = arith.cmpi slt, %26, %31 : vector<8x32x128xi32>
      %33 = vector.broadcast %1 : i32 to vector<8x32x128xi32>
      %34 = arith.cmpi slt, %26, %33 : vector<8x32x128xi32>
      %35 = arith.andi %32, %34 : vector<8x32x128xi1>
      %c8_i32_16 = arith.constant 8 : i32
      %36 = vector.broadcast %c8_i32_16 : i32 to vector<8x32x128xi32>
      %37 = arith.cmpi slt, %30, %36 : vector<8x32x128xi32>
      %38 = arith.andi %35, %37 : vector<8x32x128xi1>
      %cst_17 = arith.constant 0.000000e+00 : f32
      %39 = vector.broadcast %cst_17 : f32 to vector<8x32x128xf32>
      %40 = arith.select %38, %22, %39 : vector<8x32x128xi1>, vector<8x32x128xf32>
      %41 = arith.truncf %40 : vector<8x32x128xf32> to vector<8x32x128xbf16>
      %c0_18 = arith.constant 0 : index
      %c0_19 = arith.constant 0 : index
      %c0_20 = arith.constant 0 : index
      %c0_21 = arith.constant 0 : index
      %42 = vector.load %arg8[%c0_18, %c0_19, %c0_20, %c0_21] : memref<1x8x32x128xbf16, #tpu.memory_space<vmem>>, vector<1x8x32x128xbf16>
      %43 = vector.shape_cast %42 : vector<1x8x32x128xbf16> to vector<8x32x128xbf16>
      %44 = vector.shape_cast %41 : vector<8x32x128xbf16> to vector<1x8x32x128xbf16>
      tpu.vector_store %arg8[%c0_18, %c0_19, %c0_20, %c0_21], %44 {strides = array<i32>} : memref<1x8x32x128xbf16, #tpu.memory_space<vmem>>, vector<1x8x32x128xbf16>,
      %cst_22 = arith.constant dense<0.000000e+00> : vector<32x128xf32>
      %45 = vector.multi_reduction <add>, %40, %cst_22 [0] : vector<8x32x128xf32> to vector<32x128xf32>
      %46 = arith.mulf %40, %40 : vector<8x32x128xf32>
      %cst_23 = arith.constant dense<0.000000e+00> : vector<32x128xf32>
      %47 = vector.multi_reduction <add>, %46, %cst_23 [0] : vector<8x32x128xf32> to vector<32x128xf32>
      %cst_24 = arith.constant dense<0.000000e+00> : vector<32xf32>
      %48 = vector.multi_reduction <add>, %45, %cst_24 [1] : vector<32x128xf32> to vector<32xf32>
      %49 = vector.shape_cast %48 : vector<32xf32> to vector<32x1xf32>
      %c0_25 = arith.constant 0 : index
      %c0_26 = arith.constant 0 : index
      %c0_27 = arith.constant 0 : index
      %50 = vector.load %arg9[%c0_25, %c0_26, %c0_27] : memref<1x32x1xf32, #tpu.memory_space<vmem>>, vector<1x32x1xf32>
      %51 = vector.shape_cast %50 : vector<1x32x1xf32> to vector<32x1xf32>
      %52 = vector.shape_cast %49 : vector<32x1xf32> to vector<1x32x1xf32>
      tpu.vector_store %arg9[%c0_25, %c0_26, %c0_27], %52 {strides = array<i32>} : memref<1x32x1xf32, #tpu.memory_space<vmem>>, vector<1x32x1xf32>,
      %cst_28 = arith.constant dense<0.000000e+00> : vector<32xf32>
      %53 = vector.multi_reduction <add>, %47, %cst_28 [1] : vector<32x128xf32> to vector<32xf32>
      %54 = vector.shape_cast %53 : vector<32xf32> to vector<32x1xf32>
      %c0_29 = arith.constant 0 : index
      %c0_30 = arith.constant 0 : index
      %c0_31 = arith.constant 0 : index
      %55 = vector.load %arg10[%c0_29, %c0_30, %c0_31] : memref<1x32x1xf32, #tpu.memory_space<vmem>>, vector<1x32x1xf32>
      %56 = vector.shape_cast %55 : vector<1x32x1xf32> to vector<32x1xf32>
      %57 = vector.shape_cast %54 : vector<32x1xf32> to vector<1x32x1xf32>
      tpu.vector_store %arg10[%c0_29, %c0_30, %c0_31], %57 {strides = array<i32>} : memref<1x32x1xf32, #tpu.memory_space<vmem>>, vector<1x32x1xf32>,
    } else {
    }
    return
  }
  func.func @transform_0(%arg0: i32, %arg1: i32, %arg2: i32, %arg3: i32, %arg4: memref<2xi32, #tpu.memory_space<smem>>) -> (i32, i32, i32, i32) {
    %0 = arith.addi %arg1, %arg3 : i32
    %c0_i32 = arith.constant 0 : i32
    %c0_i32_0 = arith.constant 0 : i32
    return %arg0, %0, %c0_i32, %arg2 : i32, i32, i32, i32
  }
  func.func @transform_1(%arg0: i32, %arg1: i32, %arg2: i32, %arg3: i32, %arg4: memref<2xi32, #tpu.memory_space<smem>>) -> (i32, i32, i32) {
    %c0_i32 = arith.constant 0 : i32
    %c0_i32_0 = arith.constant 0 : i32
    %c0_i32_1 = arith.constant 0 : i32
    %c0_i32_2 = arith.constant 0 : i32
    return %c0_i32, %c0_i32_0, %c0_i32_1 : i32, i32, i32
  }
  func.func @transform_2(%arg0: i32, %arg1: i32, %arg2: i32, %arg3: i32, %arg4: memref<2xi32, #tpu.memory_space<smem>>) -> (i32, i32) {
    %c0_i32 = arith.constant 0 : i32
    %c0_i32_0 = arith.constant 0 : i32
    %c0_i32_1 = arith.constant 0 : i32
    return %c0_i32, %c0_i32_0 : i32, i32
  }
  func.func @transform_3(%arg0: i32, %arg1: i32, %arg2: i32, %arg3: i32, %arg4: memref<2xi32, #tpu.memory_space<smem>>) -> (i32, i32, i32, i32) {
    %c0_i32 = arith.constant 0 : i32
    %c0_i32_0 = arith.constant 0 : i32
    return %arg0, %arg1, %c0_i32, %arg2 : i32, i32, i32, i32
  }
  func.func @transform_4(%arg0: i32, %arg1: i32, %arg2: i32, %arg3: i32, %arg4: memref<2xi32, #tpu.memory_space<smem>>) -> (i32, i32, i32) {
    %c1_i32 = arith.constant 1 : i32
    %0 = arith.muli %arg0, %c1_i32 : i32
    %c1_i32_0 = arith.constant 1 : i32
    %1 = arith.muli %0, %c1_i32_0 : i32
    %c1_i32_1 = arith.constant 1 : i32
    %2 = arith.muli %arg1, %c1_i32_1 : i32
    %3 = arith.addi %1, %2 : i32
    %4 = arith.addi %3, %arg2 : i32
    %c0_i32 = arith.constant 0 : i32
    %c0_i32_2 = arith.constant 0 : i32
    %c0_i32_3 = arith.constant 0 : i32
    return %4, %c0_i32, %c0_i32_2 : i32, i32, i32
  }
  func.func @transform_5(%arg0: i32, %arg1: i32, %arg2: i32, %arg3: i32, %arg4: memref<2xi32, #tpu.memory_space<smem>>) -> (i32, i32, i32) {
    %c1_i32 = arith.constant 1 : i32
    %0 = arith.muli %arg0, %c1_i32 : i32
    %c1_i32_0 = arith.constant 1 : i32
    %1 = arith.muli %0, %c1_i32_0 : i32
    %c1_i32_1 = arith.constant 1 : i32
    %2 = arith.muli %arg1, %c1_i32_1 : i32
    %3 = arith.addi %1, %2 : i32
    %4 = arith.addi %3, %arg2 : i32
    %c0_i32 = arith.constant 0 : i32
    %c0_i32_2 = arith.constant 0 : i32
    %c0_i32_3 = arith.constant 0 : i32
    return %4, %c0_i32, %c0_i32_2 : i32, i32, i32
  }
}

module attributes {stable_mosaic.version = 11 : i64} {
  func.func @bn_htanh_mask_kernel(%arg0: i32, %arg1: i32, %arg2: i32, %arg3: memref<2xi32, #tpu.memory_space<smem>>, %arg4: memref<1x8x32x128xbf16, #tpu.memory_space<vmem>>, %arg5: memref<32x1xf32, #tpu.memory_space<vmem>>, %arg6: memref<32x1xf32, #tpu.memory_space<vmem>>, %arg7: memref<1x8x32x128xbf16, #tpu.memory_space<vmem>>) attributes {dimension_semantics = [#tpu.dimension_semantics<parallel>, #tpu.dimension_semantics<parallel>, #tpu.dimension_semantics<parallel>], iteration_bounds = array<i64: 2, 1, 1>, scalar_prefetch = 1 : i64, scratch_operands = 0 : i64, tpu.core_type = #tpu.core_type<tc>, window_params = [{transform_indices = @transform_0, window_bounds = array<i64: 1, 8, 32, 128>}, {pipeline_mode = #tpu.pipeline_mode<synchronous>, transform_indices = @transform_1, window_bounds = array<i64: 32, 1>}, {pipeline_mode = #tpu.pipeline_mode<synchronous>, transform_indices = @transform_2, window_bounds = array<i64: 32, 1>}, {transform_indices = @transform_3, window_bounds = array<i64: 1, 8, 32, 128>}]} {
    %0 = arith.index_cast %arg0 : i32 to index
    %1 = memref.load %arg3[%0] : memref<2xi32, #tpu.memory_space<smem>>
    %c0 = arith.constant 0 : index
    %c0_0 = arith.constant 0 : index
    %c0_1 = arith.constant 0 : index
    %c0_2 = arith.constant 0 : index
    %2 = vector.load %arg4[%c0, %c0_0, %c0_1, %c0_2] : memref<1x8x32x128xbf16, #tpu.memory_space<vmem>>, vector<1x8x32x128xbf16>
    %3 = vector.shape_cast %2 : vector<1x8x32x128xbf16> to vector<8x32x128xbf16>
    %4 = arith.extf %3 : vector<8x32x128xbf16> to vector<8x32x128xf32>
    %c0_3 = arith.constant 0 : index
    %c0_4 = arith.constant 0 : index
    %5 = vector.load %arg5[%c0_3, %c0_4] : memref<32x1xf32, #tpu.memory_space<vmem>>, vector<32x1xf32>
    %6 = vector.shape_cast %5 : vector<32x1xf32> to vector<1x32x1xf32>
    %7 = vector.broadcast %6 : vector<1x32x1xf32> to vector<8x32x128xf32>
    %8 = arith.mulf %4, %7 : vector<8x32x128xf32>
    %c0_5 = arith.constant 0 : index
    %c0_6 = arith.constant 0 : index
    %9 = vector.load %arg6[%c0_5, %c0_6] : memref<32x1xf32, #tpu.memory_space<vmem>>, vector<32x1xf32>
    %10 = vector.shape_cast %9 : vector<32x1xf32> to vector<1x32x1xf32>
    %11 = vector.broadcast %10 : vector<1x32x1xf32> to vector<8x32x128xf32>
    %12 = arith.addf %8, %11 : vector<8x32x128xf32>
    %cst = arith.constant 0.000000e+00 : f32
    %cst_7 = arith.constant 2.000000e+01 : f32
    %13 = vector.broadcast %cst : f32 to vector<8x32x128xf32>
    %14 = arith.maximumf %13, %12 : vector<8x32x128xf32>
    %15 = vector.broadcast %cst_7 : f32 to vector<8x32x128xf32>
    %16 = arith.minimumf %15, %14 : vector<8x32x128xf32>
    %c128_i32 = arith.constant 128 : i32
    %17 = arith.muli %arg2, %c128_i32 : i32
    %18 = tpu.iota {dimensions = array<i32: 2>} : vector<8x32x128xi32>
    %19 = vector.broadcast %17 : i32 to vector<8x32x128xi32>
    %20 = arith.addi %19, %18 : vector<8x32x128xi32>
    %21 = vector.broadcast %1 : i32 to vector<8x32x128xi32>
    %22 = arith.cmpi slt, %20, %21 : vector<8x32x128xi32>
    %cst_8 = arith.constant 0.000000e+00 : f32
    %23 = vector.broadcast %cst_8 : f32 to vector<8x32x128xf32>
    %24 = arith.select %22, %16, %23 : vector<8x32x128xi1>, vector<8x32x128xf32>
    %25 = arith.truncf %24 : vector<8x32x128xf32> to vector<8x32x128xbf16>
    %c0_9 = arith.constant 0 : index
    %c0_10 = arith.constant 0 : index
    %c0_11 = arith.constant 0 : index
    %c0_12 = arith.constant 0 : index
    %26 = vector.load %arg7[%c0_9, %c0_10, %c0_11, %c0_12] : memref<1x8x32x128xbf16, #tpu.memory_space<vmem>>, vector<1x8x32x128xbf16>
    %27 = vector.shape_cast %26 : vector<1x8x32x128xbf16> to vector<8x32x128xbf16>
    %28 = vector.shape_cast %25 : vector<8x32x128xbf16> to vector<1x8x32x128xbf16>
    tpu.vector_store %arg7[%c0_9, %c0_10, %c0_11, %c0_12], %28 {strides = array<i32>} : memref<1x8x32x128xbf16, #tpu.memory_space<vmem>>, vector<1x8x32x128xbf16>,
    return
  }
  func.func @transform_0(%arg0: i32, %arg1: i32, %arg2: i32, %arg3: memref<2xi32, #tpu.memory_space<smem>>) -> (i32, i32, i32, i32) {
    %c0_i32 = arith.constant 0 : i32
    %c0_i32_0 = arith.constant 0 : i32
    return %arg0, %arg1, %c0_i32, %arg2 : i32, i32, i32, i32
  }
  func.func @transform_1(%arg0: i32, %arg1: i32, %arg2: i32, %arg3: memref<2xi32, #tpu.memory_space<smem>>) -> (i32, i32) {
    %c0_i32 = arith.constant 0 : i32
    %c0_i32_0 = arith.constant 0 : i32
    %c0_i32_1 = arith.constant 0 : i32
    return %c0_i32, %c0_i32_0 : i32, i32
  }
  func.func @transform_2(%arg0: i32, %arg1: i32, %arg2: i32, %arg3: memref<2xi32, #tpu.memory_space<smem>>) -> (i32, i32) {
    %c0_i32 = arith.constant 0 : i32
    %c0_i32_0 = arith.constant 0 : i32
    %c0_i32_1 = arith.constant 0 : i32
    return %c0_i32, %c0_i32_0 : i32, i32
  }
  func.func @transform_3(%arg0: i32, %arg1: i32, %arg2: i32, %arg3: memref<2xi32, #tpu.memory_space<smem>>) -> (i32, i32, i32, i32) {
    %c0_i32 = arith.constant 0 : i32
    %c0_i32_0 = arith.constant 0 : i32
    return %arg0, %arg1, %c0_i32, %arg2 : i32, i32, i32, i32
  }
}

module attributes {stable_mosaic.version = 11 : i64} {
  func.func @conv_mask_stats_kernel(%arg0: i32, %arg1: i32, %arg2: i32, %arg3: i32, %arg4: memref<2xi32, #tpu.memory_space<smem>>, %arg5: memref<1x1x2816x128xbf16, #tpu.memory_space<vmem>>, %arg6: memref<4x128x2816xbf16, #tpu.memory_space<vmem>>, %arg7: memref<32x1xf32, #tpu.memory_space<vmem>>, %arg8: memref<1x4x32x128xbf16, #tpu.memory_space<vmem>>, %arg9: memref<1x32x1xf32, #tpu.memory_space<vmem>>, %arg10: memref<1x32x1xf32, #tpu.memory_space<vmem>>, %arg11: memref<128x128xf32, #tpu.memory_space<vmem>>) attributes {dimension_semantics = [#tpu.dimension_semantics<parallel>, #tpu.dimension_semantics<parallel>, #tpu.dimension_semantics<parallel>, #tpu.dimension_semantics<arbitrary>], iteration_bounds = array<i64: 2, 1, 1, 4>, scalar_prefetch = 1 : i64, scratch_operands = 1 : i64, tpu.core_type = #tpu.core_type<tc>, window_params = [{transform_indices = @transform_0, window_bounds = array<i64: 1, 1, 2816, 128>}, {pipeline_mode = #tpu.pipeline_mode<synchronous>, transform_indices = @transform_1, window_bounds = array<i64: 4, 128, 2816>}, {pipeline_mode = #tpu.pipeline_mode<synchronous>, transform_indices = @transform_2, window_bounds = array<i64: 32, 1>}, {transform_indices = @transform_3, window_bounds = array<i64: 1, 4, 32, 128>}, {transform_indices = @transform_4, window_bounds = array<i64: 1, 32, 1>}, {transform_indices = @transform_5, window_bounds = array<i64: 1, 32, 1>}]} {
    %0 = arith.index_cast %arg0 : i32 to index
    %1 = memref.load %arg4[%0] : memref<2xi32, #tpu.memory_space<smem>>
    %c0_i32 = arith.constant 0 : i32
    %2 = arith.cmpi eq, %arg3, %c0_i32 : i32
    %3 = arith.extui %2 : i1 to i32
    %c0_i32_0 = arith.constant 0 : i32
    %4 = arith.cmpi ne, %3, %c0_i32_0 : i32
    scf.if %4 {
      %cst_11 = arith.constant 0.000000e+00 : f32
      %17 = vector.broadcast %cst_11 : f32 to vector<128x128xf32>
      %c0_12 = arith.constant 0 : index
      %c0_13 = arith.constant 0 : index
      %18 = vector.load %arg11[%c0_12, %c0_13] : memref<128x128xf32, #tpu.memory_space<vmem>>, vector<128x128xf32>
      tpu.vector_store %arg11[%c0_12, %c0_13], %17 {strides = array<i32>} : memref<128x128xf32, #tpu.memory_space<vmem>>, vector<128x128xf32>,
    } else {
    }
    %c0 = arith.constant 0 : index
    %c0_1 = arith.constant 0 : index
    %5 = vector.load %arg11[%c0, %c0_1] : memref<128x128xf32, #tpu.memory_space<vmem>>, vector<128x128xf32>
    %6 = arith.index_cast %arg3 : i32 to index
    %c0_2 = arith.constant 0 : index
    %c0_3 = arith.constant 0 : index
    %7 = vector.load %arg6[%6, %c0_2, %c0_3] : memref<4x128x2816xbf16, #tpu.memory_space<vmem>>, vector<1x128x2816xbf16>
    %8 = vector.shape_cast %7 : vector<1x128x2816xbf16> to vector<128x2816xbf16>
    %c0_4 = arith.constant 0 : index
    %c0_5 = arith.constant 0 : index
    %c0_6 = arith.constant 0 : index
    %c0_7 = arith.constant 0 : index
    %9 = vector.load %arg5[%c0_4, %c0_5, %c0_6, %c0_7] : memref<1x1x2816x128xbf16, #tpu.memory_space<vmem>>, vector<1x1x2816x128xbf16>
    %10 = vector.shape_cast %9 : vector<1x1x2816x128xbf16> to vector<2816x128xbf16>
    %cst = arith.constant dense<0.000000e+00> : vector<128x128xf32>
    %11 = tpu.matmul %8, %10, %cst {dimension_numbers = #tpu.dot_dimension_numbers<[1], [0], [0], [1], [0, 0, 1, 1], [], []>} : vector<128x2816xbf16>, vector<2816x128xbf16>, vector<128x128xf32> -> vector<128x128xf32>
    %12 = arith.addf %5, %11 : vector<128x128xf32>
    %c0_8 = arith.constant 0 : index
    %c0_9 = arith.constant 0 : index
    %13 = vector.load %arg11[%c0_8, %c0_9] : memref<128x128xf32, #tpu.memory_space<vmem>>, vector<128x128xf32>
    tpu.vector_store %arg11[%c0_8, %c0_9], %12 {strides = array<i32>} : memref<128x128xf32, #tpu.memory_space<vmem>>, vector<128x128xf32>,
    %c3_i32 = arith.constant 3 : i32
    %14 = arith.cmpi eq, %arg3, %c3_i32 : i32
    %15 = arith.extui %14 : i1 to i32
    %c0_i32_10 = arith.constant 0 : i32
    %16 = arith.cmpi ne, %15, %c0_i32_10 : i32
    scf.if %16 {
      %c0_11 = arith.constant 0 : index
      %c0_12 = arith.constant 0 : index
      %17 = vector.load %arg11[%c0_11, %c0_12] : memref<128x128xf32, #tpu.memory_space<vmem>>, vector<128x128xf32>
      %18 = vector.shape_cast %17 : vector<128x128xf32> to vector<4x32x128xf32>
      %c0_13 = arith.constant 0 : index
      %c0_14 = arith.constant 0 : index
      %19 = vector.load %arg7[%c0_13, %c0_14] : memref<32x1xf32, #tpu.memory_space<vmem>>, vector<32x1xf32>
      %20 = vector.shape_cast %19 : vector<32x1xf32> to vector<1x32x1xf32>
      %21 = vector.broadcast %20 : vector<1x32x1xf32> to vector<4x32x128xf32>
      %22 = arith.addf %18, %21 : vector<4x32x128xf32>
      %c128_i32 = arith.constant 128 : i32
      %23 = arith.muli %arg2, %c128_i32 : i32
      %24 = tpu.iota {dimensions = array<i32: 2>} : vector<4x32x128xi32>
      %25 = vector.broadcast %23 : i32 to vector<4x32x128xi32>
      %26 = arith.addi %25, %24 : vector<4x32x128xi32>
      %c4_i32 = arith.constant 4 : i32
      %27 = arith.muli %arg1, %c4_i32 : i32
      %28 = tpu.iota {dimensions = array<i32: 0>} : vector<4x32x128xi32>
      %29 = vector.broadcast %27 : i32 to vector<4x32x128xi32>
      %30 = arith.addi %29, %28 : vector<4x32x128xi32>
      %c8_i32 = arith.constant 8 : i32
      %31 = vector.broadcast %c8_i32 : i32 to vector<4x32x128xi32>
      %32 = arith.cmpi slt, %26, %31 : vector<4x32x128xi32>
      %33 = vector.broadcast %1 : i32 to vector<4x32x128xi32>
      %34 = arith.cmpi slt, %26, %33 : vector<4x32x128xi32>
      %35 = arith.andi %32, %34 : vector<4x32x128xi1>
      %c4_i32_15 = arith.constant 4 : i32
      %36 = vector.broadcast %c4_i32_15 : i32 to vector<4x32x128xi32>
      %37 = arith.cmpi slt, %30, %36 : vector<4x32x128xi32>
      %38 = arith.andi %35, %37 : vector<4x32x128xi1>
      %cst_16 = arith.constant 0.000000e+00 : f32
      %39 = vector.broadcast %cst_16 : f32 to vector<4x32x128xf32>
      %40 = arith.select %38, %22, %39 : vector<4x32x128xi1>, vector<4x32x128xf32>
      %41 = arith.truncf %40 : vector<4x32x128xf32> to vector<4x32x128xbf16>
      %c0_17 = arith.constant 0 : index
      %c0_18 = arith.constant 0 : index
      %c0_19 = arith.constant 0 : index
      %c0_20 = arith.constant 0 : index
      %42 = vector.load %arg8[%c0_17, %c0_18, %c0_19, %c0_20] : memref<1x4x32x128xbf16, #tpu.memory_space<vmem>>, vector<1x4x32x128xbf16>
      %43 = vector.shape_cast %42 : vector<1x4x32x128xbf16> to vector<4x32x128xbf16>
      %44 = vector.shape_cast %41 : vector<4x32x128xbf16> to vector<1x4x32x128xbf16>
      tpu.vector_store %arg8[%c0_17, %c0_18, %c0_19, %c0_20], %44 {strides = array<i32>} : memref<1x4x32x128xbf16, #tpu.memory_space<vmem>>, vector<1x4x32x128xbf16>,
      %cst_21 = arith.constant dense<0.000000e+00> : vector<32x128xf32>
      %45 = vector.multi_reduction <add>, %40, %cst_21 [0] : vector<4x32x128xf32> to vector<32x128xf32>
      %46 = arith.mulf %40, %40 : vector<4x32x128xf32>
      %cst_22 = arith.constant dense<0.000000e+00> : vector<32x128xf32>
      %47 = vector.multi_reduction <add>, %46, %cst_22 [0] : vector<4x32x128xf32> to vector<32x128xf32>
      %cst_23 = arith.constant dense<0.000000e+00> : vector<32xf32>
      %48 = vector.multi_reduction <add>, %45, %cst_23 [1] : vector<32x128xf32> to vector<32xf32>
      %49 = vector.shape_cast %48 : vector<32xf32> to vector<32x1xf32>
      %c0_24 = arith.constant 0 : index
      %c0_25 = arith.constant 0 : index
      %c0_26 = arith.constant 0 : index
      %50 = vector.load %arg9[%c0_24, %c0_25, %c0_26] : memref<1x32x1xf32, #tpu.memory_space<vmem>>, vector<1x32x1xf32>
      %51 = vector.shape_cast %50 : vector<1x32x1xf32> to vector<32x1xf32>
      %52 = vector.shape_cast %49 : vector<32x1xf32> to vector<1x32x1xf32>
      tpu.vector_store %arg9[%c0_24, %c0_25, %c0_26], %52 {strides = array<i32>} : memref<1x32x1xf32, #tpu.memory_space<vmem>>, vector<1x32x1xf32>,
      %cst_27 = arith.constant dense<0.000000e+00> : vector<32xf32>
      %53 = vector.multi_reduction <add>, %47, %cst_27 [1] : vector<32x128xf32> to vector<32xf32>
      %54 = vector.shape_cast %53 : vector<32xf32> to vector<32x1xf32>
      %c0_28 = arith.constant 0 : index
      %c0_29 = arith.constant 0 : index
      %c0_30 = arith.constant 0 : index
      %55 = vector.load %arg10[%c0_28, %c0_29, %c0_30] : memref<1x32x1xf32, #tpu.memory_space<vmem>>, vector<1x32x1xf32>
      %56 = vector.shape_cast %55 : vector<1x32x1xf32> to vector<32x1xf32>
      %57 = vector.shape_cast %54 : vector<32x1xf32> to vector<1x32x1xf32>
      tpu.vector_store %arg10[%c0_28, %c0_29, %c0_30], %57 {strides = array<i32>} : memref<1x32x1xf32, #tpu.memory_space<vmem>>, vector<1x32x1xf32>,
    } else {
    }
    return
  }
  func.func @transform_0(%arg0: i32, %arg1: i32, %arg2: i32, %arg3: i32, %arg4: memref<2xi32, #tpu.memory_space<smem>>) -> (i32, i32, i32, i32) {
    %0 = arith.addi %arg1, %arg3 : i32
    %c0_i32 = arith.constant 0 : i32
    %c0_i32_0 = arith.constant 0 : i32
    return %arg0, %0, %c0_i32, %arg2 : i32, i32, i32, i32
  }
  func.func @transform_1(%arg0: i32, %arg1: i32, %arg2: i32, %arg3: i32, %arg4: memref<2xi32, #tpu.memory_space<smem>>) -> (i32, i32, i32) {
    %c0_i32 = arith.constant 0 : i32
    %c0_i32_0 = arith.constant 0 : i32
    %c0_i32_1 = arith.constant 0 : i32
    %c0_i32_2 = arith.constant 0 : i32
    return %c0_i32, %c0_i32_0, %c0_i32_1 : i32, i32, i32
  }
  func.func @transform_2(%arg0: i32, %arg1: i32, %arg2: i32, %arg3: i32, %arg4: memref<2xi32, #tpu.memory_space<smem>>) -> (i32, i32) {
    %c0_i32 = arith.constant 0 : i32
    %c0_i32_0 = arith.constant 0 : i32
    %c0_i32_1 = arith.constant 0 : i32
    return %c0_i32, %c0_i32_0 : i32, i32
  }
  func.func @transform_3(%arg0: i32, %arg1: i32, %arg2: i32, %arg3: i32, %arg4: memref<2xi32, #tpu.memory_space<smem>>) -> (i32, i32, i32, i32) {
    %c0_i32 = arith.constant 0 : i32
    %c0_i32_0 = arith.constant 0 : i32
    return %arg0, %arg1, %c0_i32, %arg2 : i32, i32, i32, i32
  }
  func.func @transform_4(%arg0: i32, %arg1: i32, %arg2: i32, %arg3: i32, %arg4: memref<2xi32, #tpu.memory_space<smem>>) -> (i32, i32, i32) {
    %c1_i32 = arith.constant 1 : i32
    %0 = arith.muli %arg0, %c1_i32 : i32
    %c1_i32_0 = arith.constant 1 : i32
    %1 = arith.muli %0, %c1_i32_0 : i32
    %c1_i32_1 = arith.constant 1 : i32
    %2 = arith.muli %arg1, %c1_i32_1 : i32
    %3 = arith.addi %1, %2 : i32
    %4 = arith.addi %3, %arg2 : i32
    %c0_i32 = arith.constant 0 : i32
    %c0_i32_2 = arith.constant 0 : i32
    %c0_i32_3 = arith.constant 0 : i32
    return %4, %c0_i32, %c0_i32_2 : i32, i32, i32
  }
  func.func @transform_5(%arg0: i32, %arg1: i32, %arg2: i32, %arg3: i32, %arg4: memref<2xi32, #tpu.memory_space<smem>>) -> (i32, i32, i32) {
    %c1_i32 = arith.constant 1 : i32
    %0 = arith.muli %arg0, %c1_i32 : i32
    %c1_i32_0 = arith.constant 1 : i32
    %1 = arith.muli %0, %c1_i32_0 : i32
    %c1_i32_1 = arith.constant 1 : i32
    %2 = arith.muli %arg1, %c1_i32_1 : i32
    %3 = arith.addi %1, %2 : i32
    %4 = arith.addi %3, %arg2 : i32
    %c0_i32 = arith.constant 0 : i32
    %c0_i32_2 = arith.constant 0 : i32
    %c0_i32_3 = arith.constant 0 : i32
    return %4, %c0_i32, %c0_i32_2 : i32, i32, i32
  }
}

module attributes {stable_mosaic.version = 11 : i64} {
  func.func @bn_htanh_mask_kernel(%arg0: i32, %arg1: i32, %arg2: i32, %arg3: memref<2xi32, #tpu.memory_space<smem>>, %arg4: memref<1x4x32x128xbf16, #tpu.memory_space<vmem>>, %arg5: memref<32x1xf32, #tpu.memory_space<vmem>>, %arg6: memref<32x1xf32, #tpu.memory_space<vmem>>, %arg7: memref<1x4x32x128xf32, #tpu.memory_space<vmem>>) attributes {dimension_semantics = [#tpu.dimension_semantics<parallel>, #tpu.dimension_semantics<parallel>, #tpu.dimension_semantics<parallel>], iteration_bounds = array<i64: 2, 1, 1>, scalar_prefetch = 1 : i64, scratch_operands = 0 : i64, tpu.core_type = #tpu.core_type<tc>, window_params = [{transform_indices = @transform_0, window_bounds = array<i64: 1, 4, 32, 128>}, {pipeline_mode = #tpu.pipeline_mode<synchronous>, transform_indices = @transform_1, window_bounds = array<i64: 32, 1>}, {pipeline_mode = #tpu.pipeline_mode<synchronous>, transform_indices = @transform_2, window_bounds = array<i64: 32, 1>}, {transform_indices = @transform_3, window_bounds = array<i64: 1, 4, 32, 128>}]} {
    %0 = arith.index_cast %arg0 : i32 to index
    %1 = memref.load %arg3[%0] : memref<2xi32, #tpu.memory_space<smem>>
    %c0 = arith.constant 0 : index
    %c0_0 = arith.constant 0 : index
    %c0_1 = arith.constant 0 : index
    %c0_2 = arith.constant 0 : index
    %2 = vector.load %arg4[%c0, %c0_0, %c0_1, %c0_2] : memref<1x4x32x128xbf16, #tpu.memory_space<vmem>>, vector<1x4x32x128xbf16>
    %3 = vector.shape_cast %2 : vector<1x4x32x128xbf16> to vector<4x32x128xbf16>
    %4 = arith.extf %3 : vector<4x32x128xbf16> to vector<4x32x128xf32>
    %c0_3 = arith.constant 0 : index
    %c0_4 = arith.constant 0 : index
    %5 = vector.load %arg5[%c0_3, %c0_4] : memref<32x1xf32, #tpu.memory_space<vmem>>, vector<32x1xf32>
    %6 = vector.shape_cast %5 : vector<32x1xf32> to vector<1x32x1xf32>
    %7 = vector.broadcast %6 : vector<1x32x1xf32> to vector<4x32x128xf32>
    %8 = arith.mulf %4, %7 : vector<4x32x128xf32>
    %c0_5 = arith.constant 0 : index
    %c0_6 = arith.constant 0 : index
    %9 = vector.load %arg6[%c0_5, %c0_6] : memref<32x1xf32, #tpu.memory_space<vmem>>, vector<32x1xf32>
    %10 = vector.shape_cast %9 : vector<32x1xf32> to vector<1x32x1xf32>
    %11 = vector.broadcast %10 : vector<1x32x1xf32> to vector<4x32x128xf32>
    %12 = arith.addf %8, %11 : vector<4x32x128xf32>
    %cst = arith.constant 0.000000e+00 : f32
    %cst_7 = arith.constant 2.000000e+01 : f32
    %13 = vector.broadcast %cst : f32 to vector<4x32x128xf32>
    %14 = arith.maximumf %13, %12 : vector<4x32x128xf32>
    %15 = vector.broadcast %cst_7 : f32 to vector<4x32x128xf32>
    %16 = arith.minimumf %15, %14 : vector<4x32x128xf32>
    %c128_i32 = arith.constant 128 : i32
    %17 = arith.muli %arg2, %c128_i32 : i32
    %18 = tpu.iota {dimensions = array<i32: 2>} : vector<4x32x128xi32>
    %19 = vector.broadcast %17 : i32 to vector<4x32x128xi32>
    %20 = arith.addi %19, %18 : vector<4x32x128xi32>
    %21 = vector.broadcast %1 : i32 to vector<4x32x128xi32>
    %22 = arith.cmpi slt, %20, %21 : vector<4x32x128xi32>
    %cst_8 = arith.constant 0.000000e+00 : f32
    %23 = vector.broadcast %cst_8 : f32 to vector<4x32x128xf32>
    %24 = arith.select %22, %16, %23 : vector<4x32x128xi1>, vector<4x32x128xf32>
    %c0_9 = arith.constant 0 : index
    %c0_10 = arith.constant 0 : index
    %c0_11 = arith.constant 0 : index
    %c0_12 = arith.constant 0 : index
    %25 = vector.load %arg7[%c0_9, %c0_10, %c0_11, %c0_12] : memref<1x4x32x128xf32, #tpu.memory_space<vmem>>, vector<1x4x32x128xf32>
    %26 = vector.shape_cast %25 : vector<1x4x32x128xf32> to vector<4x32x128xf32>
    %27 = vector.shape_cast %24 : vector<4x32x128xf32> to vector<1x4x32x128xf32>
    tpu.vector_store %arg7[%c0_9, %c0_10, %c0_11, %c0_12], %27 {strides = array<i32>} : memref<1x4x32x128xf32, #tpu.memory_space<vmem>>, vector<1x4x32x128xf32>,
    return
  }
  func.func @transform_0(%arg0: i32, %arg1: i32, %arg2: i32, %arg3: memref<2xi32, #tpu.memory_space<smem>>) -> (i32, i32, i32, i32) {
    %c0_i32 = arith.constant 0 : i32
    %c0_i32_0 = arith.constant 0 : i32
    return %arg0, %arg1, %c0_i32, %arg2 : i32, i32, i32, i32
  }
  func.func @transform_1(%arg0: i32, %arg1: i32, %arg2: i32, %arg3: memref<2xi32, #tpu.memory_space<smem>>) -> (i32, i32) {
    %c0_i32 = arith.constant 0 : i32
    %c0_i32_0 = arith.constant 0 : i32
    %c0_i32_1 = arith.constant 0 : i32
    return %c0_i32, %c0_i32_0 : i32, i32
  }
  func.func @transform_2(%arg0: i32, %arg1: i32, %arg2: i32, %arg3: memref<2xi32, #tpu.memory_space<smem>>) -> (i32, i32) {
    %c0_i32 = arith.constant 0 : i32
    %c0_i32_0 = arith.constant 0 : i32
    %c0_i32_1 = arith.constant 0 : i32
    return %c0_i32, %c0_i32_0 : i32, i32
  }
  func.func @transform_3(%arg0: i32, %arg1: i32, %arg2: i32, %arg3: memref<2xi32, #tpu.memory_space<smem>>) -> (i32, i32, i32, i32) {
    %c0_i32 = arith.constant 0 : i32
    %c0_i32_0 = arith.constant 0 : i32
    return %arg0, %arg1, %c0_i32, %arg2 : i32, i32, i32, i32
  }
}

</mosaic_0001>

<bundles_post_ra>
// kernel: cnn2_forward.5
= control target key start
LH: loop header
LB: loop body
LE: loop exit
PB: predicated region body
PF: predicated region fallthrough
CT: control target
= control target key end

     0   :  { %s1427_s0 = inlined_call_operand.vmem [shape: s32[2], index: 0, kind: input, shape index: {}]   ;;  %s1428_s1 = inlined_call_operand.vmem [shape: bf16[2,8,32,128], index: 1, kind: input, shape index: {}]   ;;  %s1429_s2 = inlined_call_operand.vmem [shape: f32[32,1], index: 2, kind: input, shape index: {}]   ;;  %s1430_s3 = inlined_call_operand.vmem [shape: f32[32,1], index: 3, kind: input, shape index: {}]   ;;  %s1431_s4 = inlined_call_operand.vmem [shape: bf16[2,8,32,128], index: 4, kind: output, shape index: {}]  }
   0x1   :  { %s9_s17 = sshll.u32 %s1427_s0, 4  ;;  %s10_s17 = int_to_ptr.vmem [resolvable:$true] %s9_s17 }
   0x2   :  { %s1079_s18 = scalar_lea.vmem %s10_s17, 16  ;;  %p1084_p1 = scmp.lt.s32.totalorder %s10_s17, %s10_s17 }
   0x3   :  { %p1080_p0 = scmp.ne.s32.totalorder %s10_s17, %s1079_s18  ;;  %p1085_p2 = scmp.lt.s32.totalorder %s1079_s18, %s1079_s18 }
   0x5   :  { %p1086_p3 = por %p1085_p2, %p1084_p1 }
   0x7   :  { %p1087_p4 = pnand %p1086_p3, %p1080_p0 }
   0x9   :  { %1090 = shalt.err (!%p1087_p4)  }
   0xa   :  { %s1117_s19 = smov [#allocation3]  }
   0xb   :  { %12 = dma.vmem_to_smem %s10_s17, 16, %s1117_s19, [#allocation2] }
   0xc   :  { %1103 = dma.done.wait [#allocation2], 16 }
   0xd   :  { %1104 = vsyncadd [#allocation2], 4294967280 }
   0xe   :  { %14 = sfence }
   0xf   :  { %s1147_s20 = smov 0   ;;  %s1149_s21 = smov 0  }
  0x10   :  { %s1151_s22 = smov 0  }
  0x11 LB: > { %s39_s0 = sadd.s32 1, %s1111_s21  ;;  %p804_p5 = scmp.ge.s32.totalorder %s1115_s22, 1  ;;  %s1115_s22 = sphi %s1151_s22, %s20_s22   ;;  %s1111_s21 = sphi %s1149_s21, %s1435_s21   ;;  %s1107_s20 = sphi %s1147_s20, %s1434_s20  }
  0x12   : > { %p41_p6 = scmp.ge.s32.totalorder %s39_s0, 2  ;;  %p180_p7 = scmp.lt.s32.totalorder %s1115_s22, 3 }
  0x14   : > { %s1437_s0 = smov (%p41_p6, %s39_s0), 0  ;;  %p181_p8 = pnand %p804_p5, %p180_p7 }
  0x15   : > { %v315_v0 = vld [vmem:[%s1429_s2 + $0x10] sm:$0xff] (!%p181_p8)  ;;  %v313_v1 = vld [vmem:[%s1429_s2] sm:$0xff] (!%p181_p8)  ;;  %v1118_v2 = vmov (!%p181_p8), 0   ;;  %v316_v3 = vld [vmem:[%s1429_s2 + $0x18] sm:$0xff] (!%p181_p8)  ;;  %p221_p9 = scmp.lt.s32.totalorder (!%p181_p8), %s1107_s20, 1  ;;  %s1210_s18 = sld [smem:[#allocation3 + %s1107_s20]] (!%p181_p8)  ;;  %v490_v19 = vlaneseq (!%p181_p8) }
  0x16   : > { %184 = sbr.rel (%p181_p8) target bundleno = 199 (0xc7), region = 32  ;;  %1078 = vset.pattern.permute.xlu1 (!%p181_p8), %v1118_v2  ;;  %1077 = vset.pattern.permute.xlu0 (!%p181_p8), %v1118_v2  ;;  %v314_v4 = vld [vmem:[%s1429_s2 + $0x8] sm:$0xff] (!%p181_p8)  ;;  %v369_v6 = vld [vmem:[%s1430_s3] sm:$0xff] (!%p181_p8)  ;;  %v372_v7 = vld [vmem:[%s1430_s3 + $0x18] sm:$0xff] (!%p181_p8) }
  0x17   : > { %329 = vperm.xlu1 (!%p181_p8), %1078, %v315_v0   ;;  %319 = vperm.xlu0 (!%p181_p8), %1077, %v313_v1   ;;  %v370_v5 = vld [vmem:[%s1430_s3 + $0x8] sm:$0xff] (!%p181_p8)  ;;  %v371_v8 = vld [vmem:[%s1430_s3 + $0x10] sm:$0xff] (!%p181_p8)  ;;  %v491_v36 = vand.u32 (!%p181_p8), 127, %v490_v19 }
  0x1b   : > { %334 = vperm.xlu1 (!%p181_p8), %1078, %v316_v3   ;;  %324 = vperm.xlu0 (!%p181_p8), %1077, %v314_v4   ;;  %v494_v41 = vstv (!%p181_p8), %s1210_s18 }
  0x1c   : > { %vm1279_vm0 = vcmp.lt.s32.totalorder (!%p181_p8), %v491_v36, %v494_v41 }
  0x1d   : > { %s1193_s13 = scalar_select %p221_p9, %s1107_s20, 1 }
  0x1f   : > { %380 = vperm.xlu1 %1078, %v370_v5   ;;  %375 = vperm.xlu0 %1077, %v369_v6   ;;  %s843_s14 = sshll.u32 %s1193_s13, 7 }
  0x20   : > { %s1201_s17 = scalar_lea.vmem %s1428_s1, %s843_s14  ;;  %s1344_s23 = scalar_lea.vmem %s1431_s4, %s843_s14 }
  0x21   : > { %v1204_v9 = vld [vmem:[%s1201_s17] sm:$0xff]   ;;  %v1207_v10 = vld [vmem:[%s1201_s17 + $0x10] sm:$0xff]   ;;  %v1021_v32 = vld [vmem:[%s1201_s17 + $0x8] sm:$0xff]  }
  0x22   : > { %v1213_v11 = vld [vmem:[%s1201_s17 + $0x20] sm:$0xff]   ;;  %v1216_v12 = vld [vmem:[%s1201_s17 + $0x30] sm:$0xff]   ;;  %v879_v17 = vunpack.c.l.bf16 %v1204_v9  ;;  %v887_v18 = vunpack.c.l.bf16 %v1207_v10  ;;  %v880_v23 = vunpack.c.h.bf16 %v1204_v9  ;;  %v888_v27 = vunpack.c.h.bf16 %v1207_v10  ;;  %v1023_v33 = vld [vmem:[%s1201_s17 + $0x18] sm:$0xff]  }
  0x23   : > { %390 = vperm.xlu1 %1078, %v372_v7   ;;  %385 = vperm.xlu0 %1077, %v371_v8   ;;  %v1219_v13 = vld [vmem:[%s1201_s17 + $0x40] sm:$0xff]   ;;  %v1222_v14 = vld [vmem:[%s1201_s17 + $0x50] sm:$0xff]   ;;  %v895_v20 = vunpack.c.l.bf16 %v1213_v11  ;;  %v903_v21 = vunpack.c.l.bf16 %v1216_v12  ;;  %v896_v28 = vunpack.c.h.bf16 %v1213_v11  ;;  %v904_v29 = vunpack.c.h.bf16 %v1216_v12  ;;  %v1025_v38 = vld [vmem:[%s1201_s17 + $0x28] sm:$0xff]  }
  0x24   : > { %v1225_v15 = vld [vmem:[%s1201_s17 + $0x60] sm:$0xff]   ;;  %v1228_v16 = vld [vmem:[%s1201_s17 + $0x70] sm:$0xff]   ;;  %v911_v22 = vunpack.c.l.bf16 %v1219_v13  ;;  %v919_v24 = vunpack.c.l.bf16 %v1222_v14  ;;  %v912_v30 = vunpack.c.h.bf16 %v1219_v13  ;;  %v920_v31 = vunpack.c.h.bf16 %v1222_v14  ;;  %v1027_v39 = vld [vmem:[%s1201_s17 + $0x38] sm:$0xff]  }
  0x25   : > { %v927_v25 = vunpack.c.l.bf16 %v1225_v15  ;;  %v935_v26 = vunpack.c.l.bf16 %v1228_v16  ;;  %v928_v34 = vunpack.c.h.bf16 %v1225_v15  ;;  %v936_v35 = vunpack.c.h.bf16 %v1228_v16  ;;  %v1029_v40 = vld [vmem:[%s1201_s17 + $0x48] sm:$0xff]   ;;  %v1031_v45 = vld [vmem:[%s1201_s17 + $0x58] sm:$0xff]  }
  0x26   : > { %v884_v37 = vunpack.c.h.bf16 %v1021_v32  ;;  %v892_v42 = vunpack.c.h.bf16 %v1023_v33  ;;  %v900_v43 = vunpack.c.h.bf16 %v1025_v38  ;;  %v908_v44 = vunpack.c.h.bf16 %v1027_v39  ;;  %v1033_v46 = vld [vmem:[%s1201_s17 + $0x68] sm:$0xff]   ;;  %v1035_v47 = vld [vmem:[%s1201_s17 + $0x78] sm:$0xff]  }
  0x27   : > { %v916_v48 = vunpack.c.h.bf16 %v1029_v40  ;;  %v924_v49 = vunpack.c.h.bf16 %v1031_v45  ;;  %v932_v50 = vunpack.c.h.bf16 %v1033_v46  ;;  %v940_v51 = vunpack.c.h.bf16 %v1035_v47 }
  0x28   : > { %v883_v52 = vunpack.c.l.bf16 %v1021_v32  ;;  %v891_v53 = vunpack.c.l.bf16 %v1023_v33  ;;  %v899_v54 = vunpack.c.l.bf16 %v1025_v38  ;;  %v907_v55 = vunpack.c.l.bf16 %v1027_v39 }
  0x29   : > { %v915_v58 = vunpack.c.l.bf16 %v1029_v40  ;;  %v923_v59 = vunpack.c.l.bf16 %v1031_v45  ;;  %v931_v60 = vunpack.c.l.bf16 %v1033_v46  ;;  %v939_v61 = vunpack.c.l.bf16 %v1035_v47 }
  0x96   : > { %v330_v56 = vpop.permute.xlu1 %329  ;;  %v320_v57 = vpop.permute.xlu0 %319 }
  0x97   : > { %v1255_v62 = vmul.f32 %v879_v17, %v320_v57  ;;  %v1257_v63 = vmul.f32 %v887_v18, %v320_v57  ;;  %v1259_v0 = vmul.f32 %v895_v20, %v320_v57  ;;  %v1261_v1 = vmul.f32 %v903_v21, %v320_v57 }
  0x98   : > { %v1263_v2 = vmul.f32 %v911_v22, %v320_v57  ;;  %v1265_v3 = vmul.f32 %v919_v24, %v320_v57  ;;  %v1267_v4 = vmul.f32 %v927_v25, %v320_v57  ;;  %v1269_v5 = vmul.f32 %v935_v26, %v320_v57 }
  0x99   : > { %v1271_v6 = vmul.f32 %v883_v52, %v330_v56  ;;  %v1273_v7 = vmul.f32 %v891_v53, %v330_v56  ;;  %v1275_v8 = vmul.f32 %v899_v54, %v330_v56  ;;  %v1277_v9 = vmul.f32 %v907_v55, %v330_v56 }
  0x9a   : > { %v335_v10 = vpop.permute.xlu1 %334  ;;  %v325_v11 = vpop.permute.xlu0 %324  ;;  %v1283_v13 = vmul.f32 %v915_v58, %v330_v56  ;;  %v1285_v14 = vmul.f32 %v923_v59, %v330_v56  ;;  %v1287_v15 = vmul.f32 %v931_v60, %v330_v56  ;;  %v1289_v16 = vmul.f32 %v939_v61, %v330_v56 }
  0x9b   : > { %v338_v17 = vmul.f32 %v880_v23, %v325_v11  ;;  %v342_v18 = vmul.f32 %v888_v27, %v325_v11  ;;  %v346_v19 = vmul.f32 %v896_v28, %v325_v11  ;;  %v350_v20 = vmul.f32 %v904_v29, %v325_v11 }
  0x9c   : > { %v354_v21 = vmul.f32 %v912_v30, %v325_v11  ;;  %v358_v22 = vmul.f32 %v920_v31, %v325_v11  ;;  %v362_v24 = vmul.f32 %v928_v34, %v325_v11  ;;  %v366_v25 = vmul.f32 %v936_v35, %v325_v11 }
  0x9d   : > { %v1291_v26 = vmul.f32 %v884_v37, %v335_v10  ;;  %v1293_v32 = vmul.f32 %v892_v42, %v335_v10  ;;  %v1295_v33 = vmul.f32 %v900_v43, %v335_v10  ;;  %v1297_v36 = vmul.f32 %v908_v44, %v335_v10 }
  0x9e   : > { %v381_v38 = vpop.permute.xlu1 %380  ;;  %v1299_v39 = vmul.f32 %v916_v48, %v335_v10  ;;  %v1301_v40 = vmul.f32 %v924_v49, %v335_v10  ;;  %v1303_v23 = vmul.f32 %v932_v50, %v335_v10  ;;  %v1305_v27 = vmul.f32 %v940_v51, %v335_v10  ;;  %v376_v58 = vpop.permute.xlu0 %375 }
  0x9f   : > { %v394_v28 = vadd.f32 %v381_v38, %v338_v17  ;;  %v398_v29 = vadd.f32 %v381_v38, %v342_v18  ;;  %v402_v30 = vadd.f32 %v381_v38, %v346_v19  ;;  %v406_v31 = vadd.f32 %v381_v38, %v350_v20 }
  0xa0   : > { %v410_v34 = vadd.f32 %v381_v38, %v354_v21  ;;  %v414_v35 = vadd.f32 %v381_v38, %v358_v22  ;;  %v418_v37 = vadd.f32 %v381_v38, %v362_v24  ;;  %v422_v41 = vadd.f32 %v381_v38, %v366_v25 }
  0xa1   : > { %v426_v42 = vmax.f32 %v394_v28, 0.0  ;;  %v430_v43 = vmax.f32 %v398_v29, 0.0  ;;  %v434_v44 = vmax.f32 %v402_v30, 0.0  ;;  %v438_v45 = vmax.f32 %v406_v31, 0.0 }
  0xa2   : > { %v442_v46 = vmax.f32 %v410_v34, 0.0  ;;  %v446_v47 = vmax.f32 %v414_v35, 0.0  ;;  %v450_v48 = vmax.f32 %v418_v37, 0.0  ;;  %v454_v49 = vmax.f32 %v422_v41, 0.0 }
  0xa3   : > { %v458_v50 = vmin.f32 %v426_v42, 20.0  ;;  %v462_v52 = vmin.f32 %v430_v43, 20.0  ;;  %v466_v51 = vmin.f32 %v434_v44, 20.0  ;;  %v470_v53 = vmin.f32 %v438_v45, 20.0 }
  0xa4   : > { %v474_v54 = vmin.f32 %v442_v46, 20.0  ;;  %v478_v55 = vmin.f32 %v446_v47, 20.0  ;;  %v482_v56 = vmin.f32 %v450_v48, 20.0  ;;  %v486_v57 = vmin.f32 %v454_v49, 20.0 }
  0xa5   : > { %v497_v59 = vsel %vm1279_vm0, %v458_v50, 0.0  ;;  %v501_v60 = vsel %vm1279_vm0, %v462_v52, 0.0  ;;  %v505_v61 = vsel %vm1279_vm0, %v466_v51, 0.0  ;;  %v509_v10 = vsel %vm1279_vm0, %v470_v53, 0.0  ;;  %v391_v51 = vpop.permute.xlu1 %390 }
  0xa6   : > { %v513_v11 = vsel %vm1279_vm0, %v474_v54, 0.0  ;;  %v517_v17 = vsel %vm1279_vm0, %v478_v55, 0.0  ;;  %v521_v18 = vsel %vm1279_vm0, %v482_v56, 0.0  ;;  %v525_v19 = vsel %vm1279_vm0, %v486_v57, 0.0 }
  0xa7   : > { %v393_v20 = vadd.f32 %v376_v58, %v1255_v62  ;;  %v397_v21 = vadd.f32 %v376_v58, %v1257_v63  ;;  %v401_v22 = vadd.f32 %v376_v58, %v1259_v0  ;;  %v405_v24 = vadd.f32 %v376_v58, %v1261_v1 }
  0xa8   : > { %v409_v25 = vadd.f32 %v376_v58, %v1263_v2  ;;  %v413_v38 = vadd.f32 %v376_v58, %v1265_v3  ;;  %v417_v28 = vadd.f32 %v376_v58, %v1267_v4  ;;  %v421_v29 = vadd.f32 %v376_v58, %v1269_v5 }
  0xa9   : > { %v425_v30 = vmax.f32 %v393_v20, 0.0  ;;  %v429_v31 = vmax.f32 %v397_v21, 0.0  ;;  %v433_v34 = vmax.f32 %v401_v22, 0.0  ;;  %v437_v35 = vmax.f32 %v405_v24, 0.0 }
  0xaa   : > { %v441_v37 = vmax.f32 %v409_v25, 0.0  ;;  %v445_v62 = vmax.f32 %v413_v38, 0.0  ;;  %v449_v63 = vmax.f32 %v417_v28, 0.0  ;;  %v453_v41 = vmax.f32 %v421_v29, 0.0 }
  0xab   : > { %v457_v0 = vmin.f32 %v425_v30, 20.0  ;;  %v461_v42 = vmin.f32 %v429_v31, 20.0  ;;  %v465_v1 = vmin.f32 %v433_v34, 20.0  ;;  %v469_v43 = vmin.f32 %v437_v35, 20.0 }
  0xac   : > { %v473_v2 = vmin.f32 %v441_v37, 20.0  ;;  %v477_v44 = vmin.f32 %v445_v62, 20.0  ;;  %v481_v3 = vmin.f32 %v449_v63, 20.0  ;;  %v485_v45 = vmin.f32 %v453_v41, 20.0  ;;  %v386_v37 = vpop.permute.xlu0 %385 }
  0xad   : > { %v496_v4 = vsel %vm1279_vm0, %v457_v0, 0.0  ;;  %v500_v5 = vsel %vm1279_vm0, %v461_v42, 0.0  ;;  %v504_v46 = vsel %vm1279_vm0, %v465_v1, 0.0  ;;  %v508_v47 = vsel %vm1279_vm0, %v469_v43, 0.0 }
  0xae   : > { %v512_v48 = vsel %vm1279_vm0, %v473_v2, 0.0  ;;  %v516_v49 = vsel %vm1279_vm0, %v477_v44, 0.0  ;;  %v520_v50 = vsel %vm1279_vm0, %v481_v3, 0.0  ;;  %v524_v52 = vsel %vm1279_vm0, %v485_v45, 0.0 }
  0xaf   : > { %v944_v53 = vpack.c.bf16 %v497_v59, %v496_v4  ;;  %v954_v54 = vpack.c.bf16 %v501_v60, %v500_v5  ;;  %v964_v55 = vpack.c.bf16 %v505_v61, %v504_v46  ;;  %v974_v56 = vpack.c.bf16 %v509_v10, %v508_v47 }
  0xb0   : > { %v984_v57 = vpack.c.bf16 %v513_v11, %v512_v48  ;;  %v994_v58 = vpack.c.bf16 %v517_v17, %v516_v49  ;;  %v1004_v20 = vpack.c.bf16 %v521_v18, %v520_v50  ;;  %v1014_v21 = vpack.c.bf16 %v525_v19, %v524_v52 }
  0xb1   : > { %945 = vst [vmem:[%s1344_s23] sm:$0xff] %v944_v53   ;;  %1037 = vst [vmem:[%s1344_s23 + $0x10] sm:$0xff] %v954_v54   ;;  %v396_v22 = vadd.f32 %v391_v51, %v1291_v26  ;;  %v400_v24 = vadd.f32 %v391_v51, %v1293_v32  ;;  %v404_v59 = vadd.f32 %v391_v51, %v1295_v33 }
  0xb2   : > { %1039 = vst [vmem:[%s1344_s23 + $0x20] sm:$0xff] %v964_v55   ;;  %1041 = vst [vmem:[%s1344_s23 + $0x30] sm:$0xff] %v974_v56   ;;  %v408_v60 = vadd.f32 %v391_v51, %v1297_v36  ;;  %v412_v61 = vadd.f32 %v391_v51, %v1299_v39  ;;  %v416_v10 = vadd.f32 %v391_v51, %v1301_v40 }
  0xb3   : > { %1043 = vst [vmem:[%s1344_s23 + $0x40] sm:$0xff] %v984_v57   ;;  %1045 = vst [vmem:[%s1344_s23 + $0x50] sm:$0xff] %v994_v58   ;;  %v420_v11 = vadd.f32 %v391_v51, %v1303_v23  ;;  %v424_v17 = vadd.f32 %v391_v51, %v1305_v27  ;;  %v428_v18 = vmax.f32 %v396_v22, 0.0  ;;  %v432_v26 = vmax.f32 %v400_v24, 0.0 }
  0xb4   : > { %1047 = vst [vmem:[%s1344_s23 + $0x60] sm:$0xff] %v1004_v20   ;;  %1049 = vst [vmem:[%s1344_s23 + $0x70] sm:$0xff] %v1014_v21   ;;  %v436_v19 = vmax.f32 %v404_v59, 0.0  ;;  %v440_v32 = vmax.f32 %v408_v60, 0.0  ;;  %v444_v25 = vmax.f32 %v412_v61, 0.0  ;;  %v448_v33 = vmax.f32 %v416_v10, 0.0 }
  0xb5   : > { %v452_v38 = vmax.f32 %v420_v11, 0.0  ;;  %v456_v36 = vmax.f32 %v424_v17, 0.0  ;;  %v460_v28 = vmin.f32 %v428_v18, 20.0  ;;  %v464_v29 = vmin.f32 %v432_v26, 20.0 }
  0xb6   : > { %v468_v30 = vmin.f32 %v436_v19, 20.0  ;;  %v472_v31 = vmin.f32 %v440_v32, 20.0  ;;  %v476_v34 = vmin.f32 %v444_v25, 20.0  ;;  %v480_v39 = vmin.f32 %v448_v33, 20.0 }
  0xb7   : > { %v484_v35 = vmin.f32 %v452_v38, 20.0  ;;  %v488_v40 = vmin.f32 %v456_v36, 20.0  ;;  %v499_v23 = vsel %vm1279_vm0, %v460_v28, 0.0  ;;  %v503_v27 = vsel %vm1279_vm0, %v464_v29, 0.0 }
  0xb8   : > { %v507_v62 = vsel %vm1279_vm0, %v468_v30, 0.0  ;;  %v511_v63 = vsel %vm1279_vm0, %v472_v31, 0.0  ;;  %v515_v41 = vsel %vm1279_vm0, %v476_v34, 0.0  ;;  %v519_v0 = vsel %vm1279_vm0, %v480_v39, 0.0 }
  0xb9   : > { %v523_v42 = vsel %vm1279_vm0, %v484_v35, 0.0  ;;  %v527_v1 = vsel %vm1279_vm0, %v488_v40, 0.0  ;;  %v395_v43 = vadd.f32 %v386_v37, %v1271_v6  ;;  %v399_v2 = vadd.f32 %v386_v37, %v1273_v7 }
  0xba   : > { %v403_v44 = vadd.f32 %v386_v37, %v1275_v8  ;;  %v407_v3 = vadd.f32 %v386_v37, %v1277_v9  ;;  %v411_v45 = vadd.f32 %v386_v37, %v1283_v13  ;;  %v415_v4 = vadd.f32 %v386_v37, %v1285_v14 }
  0xbb   : > { %v419_v5 = vadd.f32 %v386_v37, %v1287_v15  ;;  %v423_v46 = vadd.f32 %v386_v37, %v1289_v16  ;;  %v427_v47 = vmax.f32 %v395_v43, 0.0  ;;  %v431_v48 = vmax.f32 %v399_v2, 0.0 }
  0xbc   : > { %v435_v49 = vmax.f32 %v403_v44, 0.0  ;;  %v439_v50 = vmax.f32 %v407_v3, 0.0  ;;  %v443_v52 = vmax.f32 %v411_v45, 0.0  ;;  %v447_v6 = vmax.f32 %v415_v4, 0.0 }
  0xbd   : > { %v451_v51 = vmax.f32 %v419_v5, 0.0  ;;  %v455_v7 = vmax.f32 %v423_v46, 0.0  ;;  %v459_v53 = vmin.f32 %v427_v47, 20.0  ;;  %v463_v8 = vmin.f32 %v431_v48, 20.0 }
  0xbe   : > { %v467_v54 = vmin.f32 %v435_v49, 20.0  ;;  %v471_v9 = vmin.f32 %v439_v50, 20.0  ;;  %v475_v55 = vmin.f32 %v443_v52, 20.0  ;;  %v479_v13 = vmin.f32 %v447_v6, 20.0 }
  0xbf   : > { %v483_v56 = vmin.f32 %v451_v51, 20.0  ;;  %v487_v14 = vmin.f32 %v455_v7, 20.0  ;;  %v498_v15 = vsel %vm1279_vm0, %v459_v53, 0.0  ;;  %v502_v16 = vsel %vm1279_vm0, %v463_v8, 0.0 }
  0xc0   : > { %v506_v57 = vsel %vm1279_vm0, %v467_v54, 0.0  ;;  %v510_v58 = vsel %vm1279_vm0, %v471_v9, 0.0  ;;  %v514_v20 = vsel %vm1279_vm0, %v475_v55, 0.0  ;;  %v518_v21 = vsel %vm1279_vm0, %v479_v13, 0.0 }
  0xc1   : > { %v522_v22 = vsel %vm1279_vm0, %v483_v56, 0.0  ;;  %v526_v24 = vsel %vm1279_vm0, %v487_v14, 0.0  ;;  %v949_v59 = vpack.c.bf16 %v499_v23, %v498_v15  ;;  %v959_v60 = vpack.c.bf16 %v503_v27, %v502_v16 }
  0xc2   : > { %v969_v61 = vpack.c.bf16 %v507_v62, %v506_v57  ;;  %v979_v10 = vpack.c.bf16 %v511_v63, %v510_v58  ;;  %v989_v11 = vpack.c.bf16 %v515_v41, %v514_v20  ;;  %v999_v17 = vpack.c.bf16 %v519_v0, %v518_v21 }
  0xc3   : > { %v1009_v18 = vpack.c.bf16 %v523_v42, %v522_v22  ;;  %v1019_v26 = vpack.c.bf16 %v527_v1, %v526_v24  ;;  %1036 = vst [vmem:[%s1344_s23 + $0x8] sm:$0xff] %v949_v59   ;;  %1038 = vst [vmem:[%s1344_s23 + $0x18] sm:$0xff] %v959_v60  }
  0xc4   : > { %1040 = vst [vmem:[%s1344_s23 + $0x28] sm:$0xff] %v969_v61   ;;  %1042 = vst [vmem:[%s1344_s23 + $0x38] sm:$0xff] %v979_v10  }
  0xc5   : > { %1044 = vst [vmem:[%s1344_s23 + $0x48] sm:$0xff] %v989_v11   ;;  %1046 = vst [vmem:[%s1344_s23 + $0x58] sm:$0xff] %v999_v17  }
  0xc6   : > { %1048 = vst [vmem:[%s1344_s23 + $0x68] sm:$0xff] %v1009_v18   ;;  %1050 = vst [vmem:[%s1344_s23 + $0x78] sm:$0xff] %v1019_v26  }
  0xc7 PF: > { %s20_s22 = sadd.s32 1, %s1115_s22   ;;  %s1434_s20 = smov %s1111_s21 }
  0xc8   : > { %p17_p10 = scmp.ge.s32.totalorder %s20_s22, 4   ;;  %s1435_s21 = smov %s1437_s0 }
  0xca   :  { %19 = sbr.rel (!%p17_p10) target bundleno = 17 (0x11), region = 62 }

// kernel: cnn2_forward.4
= control target key start
LH: loop header
LB: loop body
LE: loop exit
PB: predicated region body
PF: predicated region fallthrough
CT: control target
= control target key end

     0   :  { %s2480_s0 = inlined_call_operand.vmem [shape: s32[2], index: 0, kind: input, shape index: {}]   ;;  %s2481_s1 = inlined_call_operand.vmem [shape: bf16[2,4,176,128], index: 1, kind: input, shape index: {}]   ;;  %s2482_s2 = inlined_call_operand.vmem [shape: bf16[4,256,176], index: 2, kind: input, shape index: {}]   ;;  %s2483_s3 = inlined_call_operand.vmem [shape: f32[32,1], index: 3, kind: input, shape index: {}]   ;;  %s2484_s4 = inlined_call_operand.vmem [shape: bf16[2,8,32,128], index: 4, kind: output, shape index: {0}]   ;;  %s2485_s5 = inlined_call_operand.vmem [shape: f32[2,32,1], index: 5, kind: output, shape index: {1}]   ;;  %s2486_s6 = inlined_call_operand.vmem [shape: f32[2,32,1], index: 6, kind: output, shape index: {2}]  }
   0x1   :  { %s12_s23 = sshll.u32 %s2480_s0, 4  ;;  %s13_s23 = int_to_ptr.vmem [resolvable:$true] %s12_s23 }
   0x2   :  { %s1965_s24 = scalar_lea.vmem %s13_s23, 16  ;;  %p1970_p1 = scmp.lt.s32.totalorder %s13_s23, %s13_s23 }
   0x3   :  { %p1966_p0 = scmp.ne.s32.totalorder %s13_s23, %s1965_s24  ;;  %p1971_p2 = scmp.lt.s32.totalorder %s1965_s24, %s1965_s24 }
   0x5   :  { %p1972_p3 = por %p1971_p2, %p1970_p1 }
   0x7   :  { %p1973_p4 = pnand %p1972_p3, %p1966_p0 }
   0x9   :  { %1976 = shalt.err (!%p1973_p4)  }
   0xa   :  { %s2019_s25 = smov [#allocation4]  }
   0xb   :  { %15 = dma.vmem_to_smem %s13_s23, 16, %s2019_s25, [#allocation3] }
   0xc   :  { %1997 = dma.done.wait [#allocation3], 16 }
   0xd   :  { %1998 = vsyncadd [#allocation3], 4294967280 }
   0xe   :  { %17 = sfence }
   0xf   :  { %s2061_s26 = smov 0   ;;  %s2063_s27 = smov 0  }
  0x10   :  { %s2065_s28 = smov 0   ;;  %s2067_s0 = smov 0  }
  0x11   :  { %s2069_s29 = smov 0  }
  0x12 LB: > { %s38_s30 = sadd.s32 1, %s2009_s28  ;;  %s49_s7 = sadd.s32 1, %s2013_s0  ;;  %s2017_s29 = sphi %s2069_s29, %s23_s29   ;;  %s2013_s0 = sphi %s2067_s0, %s2494_s0   ;;  %s2009_s28 = sphi %s2065_s28, %s2493_s28   ;;  %s2005_s27 = sphi %s2063_s27, %s2492_s27   ;;  %s2001_s26 = sphi %s2061_s26, %s2491_s26  }
  0x13   : > { %p39_p5 = scmp.ge.s32.totalorder %s38_s30, 4  ;;  %p1600_p6 = scmp.ge.s32.totalorder %s2017_s29, 1 }
  0x14   : > { %p252_p7 = scmp.lt.s32.totalorder %s2017_s29, 9 }
  0x15   : > { %s2496_s30 = smov (%p39_p5, %s38_s30), 0  ;;  %s2498_s7 = smov (!%p39_p5, %s49_s7), %s2013_s0 }
  0x16   : > { %p253_p8 = pnand %p1600_p6, %p252_p7  ;;  %p51_p9 = scmp.ge.s32.totalorder %s2498_s7, 2 }
  0x17   : > { %p311_p10 = scmp.lt.s32.totalorder (!%p253_p8), %s2005_s27, 1  ;;  %p313_p11 = scmp.lt.s32.totalorder (!%p253_p8), %s2001_s26, 3 }
  0x18   : > { %s2500_s7 = smov (%p51_p9, %s2498_s7), 0  ;;  %256 = sbr.rel (%p253_p8) target bundleno = 663 (0x297), region = 32 }
  0x19   : > { %2487 = sst [smem:[#allocation6_spill]] %s2500_s7  ;;  %p1608_p12 = scmp.ne.s32.totalorder (!%p253_p8), %s2001_s26, 0 }
  0x1a   : > { %s2094_s8 = sld [smem:[#allocation4 + %s2005_s27]] (!%p253_p8) }
  0x1f   : > { %s2502_s27 = smov (!%p311_p10, %s2005_s27), 1  ;;  %v2020_v0 = vmov (!%p1608_p12), 0.0  }
  0x20   : > { %s314_s9 = scalar_select %p313_p11, %s2001_s26, 3 }
  0x21   : > { %s1859_s10 = smul.u32 88, %s2502_s27  ;;  %s1705_s11 = sshll.u32 %s2502_s27, 7  ;;  %362 = vst [vmem:[#allocation2] sm:$0xff] (!%p1608_p12), %v2020_v0  ;;  %363 = vst [vmem:[#allocation2 + $0x8] sm:$0xff] (!%p1608_p12), %v2020_v0 }
  0x22   : > { %s1858_s12 = smul.u32 22, %s314_s9  ;;  %s2100_s15 = scalar_lea.vmem %s2484_s4, %s1705_s11  ;;  %364 = vst [vmem:[#allocation2 + $0x10] sm:$0xff] (!%p1608_p12), %v2020_v0  ;;  %365 = vst [vmem:[#allocation2 + $0x18] sm:$0xff] (!%p1608_p12), %v2020_v0 }
  0x23   : > { %s1706_s16 = sshll.u32 %s2502_s27, 5  ;;  %361 = sbr.rel (%p1608_p12) target bundleno = 49 (0x31), region = 36  ;;  %366 = vst [vmem:[#allocation2 + $0x20] sm:$0xff] (!%p1608_p12), %v2020_v0  ;;  %367 = vst [vmem:[#allocation2 + $0x28] sm:$0xff] (!%p1608_p12), %v2020_v0 }
  0x24   : > { %s320_s17 = sadd.s32 %s1859_s10, %s1858_s12  ;;  %s2105_s20 = scalar_lea.vmem %s2485_s5, %s1706_s16  ;;  %368 = vst [vmem:[#allocation2 + $0x30] sm:$0xff] (!%p1608_p12), %v2020_v0  ;;  %369 = vst [vmem:[#allocation2 + $0x38] sm:$0xff] (!%p1608_p12), %v2020_v0 }
  0x25   : > { %s1601_s21 = sshll.u32 %s320_s17, 2  ;;  %s2110_s24 = scalar_lea.vmem %s2486_s6, %s1706_s16  ;;  %370 = vst [vmem:[#allocation2 + $0x40] sm:$0xff] (!%p1608_p12), %v2020_v0  ;;  %371 = vst [vmem:[#allocation2 + $0x48] sm:$0xff] (!%p1608_p12), %v2020_v0 }
  0x26   : > { %s2115_s7 = scalar_lea.vmem %s2481_s1, %s1601_s21  ;;  %372 = vst [vmem:[#allocation2 + $0x50] sm:$0xff] (!%p1608_p12), %v2020_v0  ;;  %373 = vst [vmem:[#allocation2 + $0x58] sm:$0xff] (!%p1608_p12), %v2020_v0 }
  0x27   : > { %374 = vst [vmem:[#allocation2 + $0x60] sm:$0xff] (!%p1608_p12), %v2020_v0  ;;  %375 = vst [vmem:[#allocation2 + $0x68] sm:$0xff] (!%p1608_p12), %v2020_v0 }
  0x28   : > { %376 = vst [vmem:[#allocation2 + $0x70] sm:$0xff] (!%p1608_p12), %v2020_v0  ;;  %377 = vst [vmem:[#allocation2 + $0x78] sm:$0xff] (!%p1608_p12), %v2020_v0 }
  0x29   : > { %378 = vst [vmem:[#allocation2 + $0x80] sm:$0xff] (!%p1608_p12), %v2020_v0  ;;  %379 = vst [vmem:[#allocation2 + $0x88] sm:$0xff] (!%p1608_p12), %v2020_v0 }
  0x2a   : > { %380 = vst [vmem:[#allocation2 + $0x90] sm:$0xff] %v2020_v0  ;;  %381 = vst [vmem:[#allocation2 + $0x98] sm:$0xff] %v2020_v0 }
  0x2b   : > { %382 = vst [vmem:[#allocation2 + $0xa0] sm:$0xff] %v2020_v0  ;;  %383 = vst [vmem:[#allocation2 + $0xa8] sm:$0xff] %v2020_v0 }
  0x2c   : > { %384 = vst [vmem:[#allocation2 + $0xb0] sm:$0xff] %v2020_v0  ;;  %385 = vst [vmem:[#allocation2 + $0xb8] sm:$0xff] %v2020_v0 }
  0x2d   : > { %386 = vst [vmem:[#allocation2 + $0xc0] sm:$0xff] %v2020_v0  ;;  %387 = vst [vmem:[#allocation2 + $0xc8] sm:$0xff] %v2020_v0 }
  0x2e   : > { %388 = vst [vmem:[#allocation2 + $0xd0] sm:$0xff] %v2020_v0  ;;  %389 = vst [vmem:[#allocation2 + $0xd8] sm:$0xff] %v2020_v0 }
  0x2f   : > { %390 = vst [vmem:[#allocation2 + $0xe0] sm:$0xff] %v2020_v0  ;;  %391 = vst [vmem:[#allocation2 + $0xe8] sm:$0xff] %v2020_v0 }
  0x30   : > { %392 = vst [vmem:[#allocation2 + $0xf0] sm:$0xff] %v2020_v0  ;;  %393 = vst [vmem:[#allocation2 + $0xf8] sm:$0xff] %v2020_v0 }
  0x31 PF: > { %v1904_v1 = vld [vmem:[%s2115_s7] sm:$0xff]   ;;  %v2021_v2 = vmov 0   ;;  %v1905_v3 = vld [vmem:[%s2115_s7 + $0x8] sm:$0xff]   ;;  %v1906_v4 = vld [vmem:[%s2115_s7 + $0x10] sm:$0xff]   ;;  %s1708_s27 = sshll.u32 %s2001_s26, 8  ;;  %vm693_vm0 = vcmask 392192  }
  0x32   : > { %742 = vmatprep.subr.bf16.mxu0 %v2021_v2  ;;  %1836 = vmatprep.subr.bf16.mxu1 %v2021_v2  ;;  %s2125_s12 = scalar_lea.vmem %s2482_s2, %s1708_s27  ;;  %v1907_v5 = vld [vmem:[%s2115_s7 + $0x18] sm:$0xff]   ;;  %v1908_v8 = vld [vmem:[%s2115_s7 + $0x20] sm:$0xff]   ;;  %v1909_v9 = vld [vmem:[%s2115_s7 + $0x28] sm:$0xff]   ;;  %p1670_p13 = scmp.ne.s32.totalorder %s2001_s26, 3 }
  0x33   : > { %743 = vmatpush1.bf16.msra.mxu0 %v1904_v1  ;;  %1847 = vmatpush1.bf16.msra.mxu1 %v1904_v1  ;;  %v1917_v6 = vld [vmem:[%s2125_s12 + $0x4] ss:$8 sps:$4 sm:$0xff]   ;;  %v1910_v10 = vld [vmem:[%s2115_s7 + $0x30] sm:$0xff]   ;;  %v1911_v11 = vld [vmem:[%s2115_s7 + $0x38] sm:$0xff]   ;;  %vm1381_vm4 = vcmask (!%p1670_p13), 7168  }
  0x34   : > { %744 = vmatprep.subr.bf16.mxu0 %v2021_v2  ;;  %1837 = vmatprep.subr.bf16.mxu1 %v2021_v2  ;;  %v1920_v7 = vld [vmem:[%s2125_s12 + $0x84] ss:$8 sps:$4 sm:$0xff]   ;;  %v1914_v14 = vld [vmem:[%s2115_s7 + $0x50] sm:$0xff]   ;;  %v1915_v15 = vld [vmem:[%s2125_s12] ss:$8 sps:$4 sm:$0xff]  }
  0x35   : > { %1654 = vmatprep.mubr.msk.bf16.mxu0 %vm693_vm0, %v1917_v6  ;;  %1662 = vmatprep.mubr.msk.bf16.mxu1 %vm693_vm0, %v1920_v7  ;;  %v1912_v12 = vld [vmem:[%s2115_s7 + $0x40] sm:$0xff]   ;;  %v1913_v13 = vld [vmem:[%s2115_s7 + $0x48] sm:$0xff]   ;;  %v1921_v17 = vld [vmem:[%s2125_s12 + $0x14] ss:$8 sps:$4 sm:$0xff]  }
  0x36   : > { %v1918_v16 = vld [vmem:[%s2125_s12 + $0x80] ss:$8 sps:$4 sm:$0xff]   ;;  %v1923_v18 = vld [vmem:[%s2125_s12 + $0x94] ss:$8 sps:$4 sm:$0xff]   ;;  %v1925_v19 = vld [vmem:[%s2125_s12 + $0x10] ss:$8 sps:$4 sm:$0xff]  }
  0x37   : > { %745 = vmatpush1.bf16.msra.mxu0 %v1905_v3  ;;  %1848 = vmatpush1.bf16.msra.mxu1 %v1905_v3  ;;  %v1926_v20 = vld [vmem:[%s2125_s12 + $0x90] ss:$8 sps:$4 sm:$0xff]   ;;  %v1927_v21 = vld [vmem:[%s2125_s12 + $0x24] ss:$8 sps:$4 sm:$0xff]   ;;  %v1931_v23 = vld [vmem:[%s2125_s12 + $0x20] ss:$8 sps:$4 sm:$0xff]  }
  0x38   : > { %746 = vmatprep.subr.bf16.mxu0 %v2021_v2  ;;  %1838 = vmatprep.subr.bf16.mxu1 %v2021_v2  ;;  %v1929_v22 = vld [vmem:[%s2125_s12 + $0xa4] ss:$8 sps:$4 sm:$0xff]   ;;  %v1932_v24 = vld [vmem:[%s2125_s12 + $0xa0] ss:$8 sps:$4 sm:$0xff]   ;;  %v1933_v25 = vld [vmem:[%s2125_s12 + $0x34] ss:$8 sps:$4 sm:$0xff]  }
  0x39   : > { %v1935_v26 = vld [vmem:[%s2125_s12 + $0xb4] ss:$8 sps:$4 sm:$0xff]   ;;  %v1937_v27 = vld [vmem:[%s2125_s12 + $0x30] ss:$8 sps:$4 sm:$0xff]   ;;  %v1939_v29 = vld [vmem:[%s2125_s12 + $0x44] ss:$8 sps:$4 sm:$0xff]  }
  0x3a   : > { %v1938_v28 = vld [vmem:[%s2125_s12 + $0xb0] ss:$8 sps:$4 sm:$0xff]   ;;  %v1941_v30 = vld [vmem:[%s2125_s12 + $0xc4] ss:$8 sps:$4 sm:$0xff]   ;;  %v1943_v31 = vld [vmem:[%s2125_s12 + $0x40] ss:$8 sps:$4 sm:$0xff]  }
  0x3b   : > { %747 = vmatpush1.bf16.msra.mxu0 %v1906_v4  ;;  %1849 = vmatpush1.bf16.msra.mxu1 %v1906_v4  ;;  %v1944_v32 = vld [vmem:[%s2125_s12 + $0xc0] ss:$8 sps:$4 sm:$0xff]   ;;  %v1945_v33 = vld [vmem:[%s2125_s12 + $0x54] ss:$8 sps:$4 sm:$0xff]   ;;  %v1949_v35 = vld [vmem:[%s2125_s12 + $0x50] ss:$8 sps:$4 sm:$0xff]  }
  0x3c   : > { %748 = vmatprep.subr.bf16.mxu0 %v2021_v2  ;;  %1839 = vmatprep.subr.bf16.mxu1 %v2021_v2  ;;  %v1947_v34 = vld [vmem:[%s2125_s12 + $0xd4] ss:$8 sps:$4 sm:$0xff]   ;;  %v1950_v36 = vld [vmem:[%s2125_s12 + $0xd0] ss:$8 sps:$4 sm:$0xff]   ;;  %v1951_v37 = vld [vmem:[%s2125_s12 + $0x64] ss:$8 sps:$4 sm:$0xff]  }
  0x3d   : > { %v1953_v38 = vld [vmem:[%s2125_s12 + $0xe4] ss:$8 sps:$4 sm:$0xff]   ;;  %v1955_v39 = vld [vmem:[%s2125_s12 + $0x60] ss:$8 sps:$4 sm:$0xff]   ;;  %v1957_v41 = vld [vmem:[%s2125_s12 + $0x74] ss:$8 sps:$4 sm:$0xff]  }
  0x3e   : > { %v1956_v40 = vld [vmem:[%s2125_s12 + $0xe0] ss:$8 sps:$4 sm:$0xff]   ;;  %v1959_v42 = vld [vmem:[%s2125_s12 + $0xf4] ss:$8 sps:$4 sm:$0xff]   ;;  %v1961_v43 = vld [vmem:[%s2125_s12 + $0x70] ss:$8 sps:$4 sm:$0xff]  }
  0x3f   : > { %749 = vmatpush1.bf16.msra.mxu0 %v1907_v5  ;;  %1850 = vmatpush1.bf16.msra.mxu1 %v1907_v5  ;;  %v1962_v44 = vld [vmem:[%s2125_s12 + $0xf0] ss:$8 sps:$4 sm:$0xff]   ;;  %v394_v45 = vld [vmem:[#allocation2] sm:$0xff]  ;;  %v395_v49 = vld [vmem:[#allocation2 + $0x8] sm:$0xff] }
  0x40   : > { %750 = vmatprep.subr.bf16.mxu0 %v2021_v2  ;;  %1840 = vmatprep.subr.bf16.mxu1 %v2021_v2  ;;  %v410_v46 = vld [vmem:[#allocation2 + $0x80] sm:$0xff]  ;;  %v411_v50 = vld [vmem:[#allocation2 + $0x88] sm:$0xff]  ;;  %v396_v61 = vld [vmem:[#allocation2 + $0x10] sm:$0xff] }
  0x41   : > { %v412_v62 = vld [vmem:[#allocation2 + $0x90] sm:$0xff]  ;;  %v397_v1 = vld [vmem:[#allocation2 + $0x18] sm:$0xff] }
  0x43   : > { %751 = vmatpush1.bf16.msra.mxu0 %v1908_v8  ;;  %1851 = vmatpush1.bf16.msra.mxu1 %v1908_v8 }
  0x44   : > { %752 = vmatprep.subr.bf16.mxu0 %v2021_v2  ;;  %1841 = vmatprep.subr.bf16.mxu1 %v2021_v2 }
  0x47   : > { %753 = vmatpush1.bf16.msra.mxu0 %v1909_v9  ;;  %1852 = vmatpush1.bf16.msra.mxu1 %v1909_v9 }
  0x48   : > { %754 = vmatprep.subr.bf16.mxu0 %v2021_v2  ;;  %1842 = vmatprep.subr.bf16.mxu1 %v2021_v2 }
  0x4b   : > { %755 = vmatpush1.bf16.msra.mxu0 %v1910_v10  ;;  %1853 = vmatpush1.bf16.msra.mxu1 %v1910_v10 }
  0x4c   : > { %756 = vmatprep.subr.bf16.mxu0 %v2021_v2  ;;  %1843 = vmatprep.subr.bf16.mxu1 %v2021_v2 }
  0x4f   : > { %757 = vmatpush1.bf16.msra.mxu0 %v1911_v11  ;;  %1854 = vmatpush1.bf16.msra.mxu1 %v1911_v11 }
  0x50   : > { %758 = vmatprep.subr.bf16.mxu0 %v2021_v2  ;;  %1844 = vmatprep.subr.bf16.mxu1 %v2021_v2 }
  0x53   : > { %759 = vmatpush1.bf16.msra.mxu0 %v1912_v12  ;;  %1855 = vmatpush1.bf16.msra.mxu1 %v1912_v12 }
  0x54   : > { %760 = vmatprep.subr.bf16.mxu0 %v2021_v2  ;;  %1845 = vmatprep.subr.bf16.mxu1 %v2021_v2 }
  0x57   : > { %761 = vmatpush1.bf16.msra.mxu0 %v1913_v13  ;;  %1856 = vmatpush1.bf16.msra.mxu1 %v1913_v13  ;;  %v398_v13 = vld [vmem:[#allocation2 + $0x20] sm:$0xff] }
  0x58   : > { %762 = vmatprep.subr.bf16.mxu0 %v2021_v2  ;;  %1846 = vmatprep.subr.bf16.mxu1 %v2021_v2  ;;  %v413_v2 = vld [vmem:[#allocation2 + $0x98] sm:$0xff] }
  0x5b   : > { %763 = vmatpush1.bf16.msra.mxu0 %v1914_v14  ;;  %1857 = vmatpush1.bf16.msra.mxu1 %v1914_v14  ;;  %v414_v14 = vld [vmem:[#allocation2 + $0xa0] sm:$0xff] }
  0x5e   : > { %775 = vmatmul.mubr.bf16.vlgmr.msra.gmra.mrb[0].mxu0 %v1915_v15  ;;  %839 = vmatmul.mubr.bf16.vlgmr.msra.gmra.mrb[0].mxu1 %v1918_v16 }
  0x5f   : > { %1655 = vmatprep.mubr.msk.bf16.mxu0 %vm693_vm0, %v1921_v17  ;;  %1663 = vmatprep.mubr.msk.bf16.mxu1 %vm693_vm0, %v1923_v18  ;;  %v399_v17 = vld [vmem:[#allocation2 + $0x28] sm:$0xff] }
  0x60   : > { %v415_v18 = vld [vmem:[#allocation2 + $0xa8] sm:$0xff] }
  0x66   : > { %783 = vmatmul.mubr.bf16.gmra.mrb[4].mxu0 %v1925_v19  ;;  %847 = vmatmul.mubr.bf16.gmra.mrb[4].mxu1 %v1926_v20 }
  0x67   : > { %1656 = vmatprep.mubr.msk.bf16.mxu0 %vm693_vm0, %v1927_v21  ;;  %1664 = vmatprep.mubr.msk.bf16.mxu1 %vm693_vm0, %v1929_v22 }
  0x6e   : > { %791 = vmatmul.mubr.bf16.gmra.mrb[8].mxu0 %v1931_v23  ;;  %855 = vmatmul.mubr.bf16.gmra.mrb[8].mxu1 %v1932_v24 }
  0x6f   : > { %1657 = vmatprep.mubr.msk.bf16.mxu0 %vm693_vm0, %v1933_v25  ;;  %1665 = vmatprep.mubr.msk.bf16.mxu1 %vm693_vm0, %v1935_v26 }
  0x76   : > { %799 = vmatmul.mubr.bf16.gmra.mrb[12].mxu0 %v1937_v27  ;;  %863 = vmatmul.mubr.bf16.gmra.mrb[12].mxu1 %v1938_v28 }
  0x77   : > { %1658 = vmatprep.mubr.msk.bf16.mxu0 %vm693_vm0, %v1939_v29  ;;  %1666 = vmatprep.mubr.msk.bf16.mxu1 %vm693_vm0, %v1941_v30  ;;  %v400_v29 = vld [vmem:[#allocation2 + $0x30] sm:$0xff] }
  0x78   : > { %v416_v30 = vld [vmem:[#allocation2 + $0xb0] sm:$0xff] }
  0x7e   : > { %807 = vmatmul.mubr.bf16.gmra.mrb[16].mxu0 %v1943_v31  ;;  %871 = vmatmul.mubr.bf16.gmra.mrb[16].mxu1 %v1944_v32 }
  0x7f   : > { %1659 = vmatprep.mubr.msk.bf16.mxu0 %vm693_vm0, %v1945_v33  ;;  %1667 = vmatprep.mubr.msk.bf16.mxu1 %vm693_vm0, %v1947_v34  ;;  %v401_v33 = vld [vmem:[#allocation2 + $0x38] sm:$0xff] }
  0x80   : > { %v417_v34 = vld [vmem:[#allocation2 + $0xb8] sm:$0xff] }
  0x86   : > { %815 = vmatmul.mubr.bf16.gmra.mrb[20].mxu0 %v1949_v35  ;;  %879 = vmatmul.mubr.bf16.gmra.mrb[20].mxu1 %v1950_v36 }
  0x87   : > { %1660 = vmatprep.mubr.msk.bf16.mxu0 %vm693_vm0, %v1951_v37  ;;  %1668 = vmatprep.mubr.msk.bf16.mxu1 %vm693_vm0, %v1953_v38 }
  0x8e   : > { %823 = vmatmul.mubr.bf16.gmra.mrb[24].mxu0 %v1955_v39  ;;  %887 = vmatmul.mubr.bf16.gmra.mrb[24].mxu1 %v1956_v40 }
  0x8f   : > { %1661 = vmatprep.mubr.msk.bf16.mxu0 %vm693_vm0, %v1957_v41  ;;  %1669 = vmatprep.mubr.msk.bf16.mxu1 %vm693_vm0, %v1959_v42 }
  0x96   : > { %831 = vmatmul.mubr.bf16.gmra.mrb[28].mxu0 %v1961_v43  ;;  %895 = vmatmul.mubr.bf16.gmra.mrb[28].mxu1 %v1962_v44 }
 0x131   : > { %v776_v47 = vpop.f32.mrb[0].mxu0  ;;  %v840_v48 = vpop.f32.mrb[0].mxu1 }
 0x132   : > { %v903_v51 = vadd.f32 %v776_v47, %v394_v45  ;;  %v919_v52 = vadd.f32 %v840_v48, %v410_v46  ;;  %v778_v53 = vpop.f32.mrb[1].mxu0  ;;  %v842_v54 = vpop.f32.mrb[1].mxu1  ;;  %v402_v45 = vld [vmem:[#allocation2 + $0x40] sm:$0xff] }
 0x133   : > { %v779_v55 = vpop.f32.mrb[2].mxu0  ;;  %v843_v56 = vpop.f32.mrb[2].mxu1  ;;  %v418_v46 = vld [vmem:[#allocation2 + $0xc0] sm:$0xff] }
 0x134   : > { %935 = vst [vmem:[#allocation2] sm:$0xff] %v903_v51  ;;  %951 = vst [vmem:[#allocation2 + $0x80] sm:$0xff] %v919_v52  ;;  %v904_v57 = vadd.f32 %v779_v55, %v395_v49  ;;  %v920_v58 = vadd.f32 %v843_v56, %v411_v50  ;;  %v781_v59 = vpop.f32.mrb[3].mxu0  ;;  %v845_v60 = vpop.f32.mrb[3].mxu1  ;;  %v403_v49 = vld [vmem:[#allocation2 + $0x48] sm:$0xff] }
 0x135   : > { %v419_v50 = vld [vmem:[#allocation2 + $0xc8] sm:$0xff] }
 0x136   : > { %936 = vst [vmem:[#allocation2 + $0x8] sm:$0xff] %v904_v57  ;;  %952 = vst [vmem:[#allocation2 + $0x88] sm:$0xff] %v920_v58 }
 0x139   : > { %v784_v63 = vpop.f32.mrb[4].mxu0  ;;  %v848_v0 = vpop.f32.mrb[4].mxu1 }
 0x13a   : > { %v905_v3 = vadd.f32 %v784_v63, %v396_v61  ;;  %v921_v4 = vadd.f32 %v848_v0, %v412_v62  ;;  %v786_v5 = vpop.f32.mrb[5].mxu0  ;;  %v850_v6 = vpop.f32.mrb[5].mxu1  ;;  %v404_v61 = vld [vmem:[#allocation2 + $0x50] sm:$0xff] }
 0x13b   : > { %v787_v7 = vpop.f32.mrb[6].mxu0  ;;  %v851_v8 = vpop.f32.mrb[6].mxu1  ;;  %v420_v62 = vld [vmem:[#allocation2 + $0xd0] sm:$0xff] }
 0x13c   : > { %937 = vst [vmem:[#allocation2 + $0x10] sm:$0xff] %v905_v3  ;;  %953 = vst [vmem:[#allocation2 + $0x90] sm:$0xff] %v921_v4  ;;  %v906_v9 = vadd.f32 %v787_v7, %v397_v1  ;;  %v922_v10 = vadd.f32 %v851_v8, %v413_v2  ;;  %v789_v11 = vpop.f32.mrb[7].mxu0  ;;  %v853_v12 = vpop.f32.mrb[7].mxu1  ;;  %v405_v1 = vld [vmem:[#allocation2 + $0x58] sm:$0xff] }
 0x13d   : > { %v421_v2 = vld [vmem:[#allocation2 + $0xd8] sm:$0xff] }
 0x13e   : > { %938 = vst [vmem:[#allocation2 + $0x18] sm:$0xff] %v906_v9  ;;  %954 = vst [vmem:[#allocation2 + $0x98] sm:$0xff] %v922_v10 }
 0x141   : > { %v792_v15 = vpop.f32.mrb[8].mxu0  ;;  %v856_v16 = vpop.f32.mrb[8].mxu1 }
 0x142   : > { %v907_v19 = vadd.f32 %v792_v15, %v398_v13  ;;  %v923_v20 = vadd.f32 %v856_v16, %v414_v14  ;;  %v794_v21 = vpop.f32.mrb[9].mxu0  ;;  %v858_v22 = vpop.f32.mrb[9].mxu1  ;;  %v406_v13 = vld [vmem:[#allocation2 + $0x60] sm:$0xff] }
 0x143   : > { %v795_v23 = vpop.f32.mrb[10].mxu0  ;;  %v859_v24 = vpop.f32.mrb[10].mxu1  ;;  %v422_v14 = vld [vmem:[#allocation2 + $0xe0] sm:$0xff] }
 0x144   : > { %939 = vst [vmem:[#allocation2 + $0x20] sm:$0xff] %v907_v19  ;;  %955 = vst [vmem:[#allocation2 + $0xa0] sm:$0xff] %v923_v20  ;;  %v908_v25 = vadd.f32 %v795_v23, %v399_v17  ;;  %v924_v26 = vadd.f32 %v859_v24, %v415_v18  ;;  %v797_v27 = vpop.f32.mrb[11].mxu0  ;;  %v861_v28 = vpop.f32.mrb[11].mxu1  ;;  %v407_v17 = vld [vmem:[#allocation2 + $0x68] sm:$0xff] }
 0x145   : > { %v423_v18 = vld [vmem:[#allocation2 + $0xe8] sm:$0xff] }
 0x146   : > { %940 = vst [vmem:[#allocation2 + $0x28] sm:$0xff] %v908_v25  ;;  %956 = vst [vmem:[#allocation2 + $0xa8] sm:$0xff] %v924_v26 }
 0x149   : > { %v800_v31 = vpop.f32.mrb[12].mxu0  ;;  %v864_v32 = vpop.f32.mrb[12].mxu1 }
 0x14a   : > { %v909_v35 = vadd.f32 %v800_v31, %v400_v29  ;;  %v925_v36 = vadd.f32 %v864_v32, %v416_v30  ;;  %v802_v37 = vpop.f32.mrb[13].mxu0  ;;  %v866_v38 = vpop.f32.mrb[13].mxu1  ;;  %v408_v29 = vld [vmem:[#allocation2 + $0x70] sm:$0xff] }
 0x14b   : > { %v803_v39 = vpop.f32.mrb[14].mxu0  ;;  %v867_v40 = vpop.f32.mrb[14].mxu1  ;;  %v424_v30 = vld [vmem:[#allocation2 + $0xf0] sm:$0xff] }
 0x14c   : > { %941 = vst [vmem:[#allocation2 + $0x30] sm:$0xff] %v909_v35  ;;  %957 = vst [vmem:[#allocation2 + $0xb0] sm:$0xff] %v925_v36  ;;  %v910_v41 = vadd.f32 %v803_v39, %v401_v33  ;;  %v926_v42 = vadd.f32 %v867_v40, %v417_v34  ;;  %v805_v43 = vpop.f32.mrb[15].mxu0  ;;  %v869_v44 = vpop.f32.mrb[15].mxu1  ;;  %v409_v33 = vld [vmem:[#allocation2 + $0x78] sm:$0xff] }
 0x14d   : > { %v425_v34 = vld [vmem:[#allocation2 + $0xf8] sm:$0xff] }
 0x14e   : > { %942 = vst [vmem:[#allocation2 + $0x38] sm:$0xff] %v910_v41  ;;  %958 = vst [vmem:[#allocation2 + $0xb8] sm:$0xff] %v926_v42 }
 0x151   : > { %v808_v47 = vpop.f32.mrb[16].mxu0  ;;  %v872_v48 = vpop.f32.mrb[16].mxu1 }
 0x152   : > { %v911_v51 = vadd.f32 %v808_v47, %v402_v45  ;;  %v927_v52 = vadd.f32 %v872_v48, %v418_v46  ;;  %v810_v53 = vpop.f32.mrb[17].mxu0  ;;  %v874_v54 = vpop.f32.mrb[17].mxu1  ;;  %v1005_v45 = vld [vmem:[%s2483_s3 + $0x10] sm:$0xff] (!%p1670_p13)  ;;  %v1003_v46 = vld [vmem:[%s2483_s3] sm:$0xff] (!%p1670_p13)  ;;  %v2022_v47 = vmov (!%p1670_p13), 0   ;;  %v1006_v48 = vld [vmem:[%s2483_s3 + $0x18] sm:$0xff] (!%p1670_p13) }
 0x153   : > { %v811_v55 = vpop.f32.mrb[18].mxu0  ;;  %v875_v56 = vpop.f32.mrb[18].mxu1  ;;  %1964 = vset.pattern.permute.xlu1 (!%p1670_p13), %v2022_v47  ;;  %1963 = vset.pattern.permute.xlu0 (!%p1670_p13), %v2022_v47  ;;  %v971_v53 = vld [vmem:[#allocation2] sm:$0xff] (!%p1670_p13) }
 0x154   : > { %943 = vst [vmem:[#allocation2 + $0x40] sm:$0xff] %v911_v51  ;;  %959 = vst [vmem:[#allocation2 + $0xc0] sm:$0xff] %v927_v52  ;;  %v912_v57 = vadd.f32 %v811_v55, %v403_v49  ;;  %v928_v58 = vadd.f32 %v875_v56, %v419_v50  ;;  %v813_v59 = vpop.f32.mrb[19].mxu0  ;;  %v877_v60 = vpop.f32.mrb[19].mxu1  ;;  %1019 = vperm.xlu1 (!%p1670_p13), %1964, %v1005_v45   ;;  %1009 = vperm.xlu0 (!%p1670_p13), %1963, %v1003_v46   ;;  %v1004_v49 = vld [vmem:[%s2483_s3 + $0x8] sm:$0xff] (!%p1670_p13)  ;;  %v1060_v50 = vlaneseq (!%p1670_p13)  ;;  %v1074_v52 = vstv (!%p1670_p13), %s2094_s8  ;;  %v975_v54 = vld [vmem:[#allocation2 + $0x20] sm:$0xff] (!%p1670_p13) }
 0x155   : > { %v973_v45 = vld [vmem:[#allocation2 + $0x10] sm:$0xff] (!%p1670_p13) }
 0x156   : > { %944 = vst [vmem:[#allocation2 + $0x48] sm:$0xff] %v912_v57  ;;  %960 = vst [vmem:[#allocation2 + $0xc8] sm:$0xff] %v928_v58  ;;  %v1061_v51 = vand.u32 (!%p1670_p13), 127, %v1060_v50  ;;  %v987_v57 = vld [vmem:[#allocation2 + $0x80] sm:$0xff] (!%p1670_p13)  ;;  %v977_v46 = vld [vmem:[#allocation2 + $0x30] sm:$0xff] (!%p1670_p13) }
 0x157   : > { %v991_v58 = vld [vmem:[#allocation2 + $0xa0] sm:$0xff] (!%p1670_p13) }
 0x158   : > { %1024 = vperm.xlu1 (!%p1670_p13), %1964, %v1006_v48   ;;  %1014 = vperm.xlu0 (!%p1670_p13), %1963, %v1004_v49   ;;  %vm1073_vm1 = vcmp.lt.s32.totalorder (!%p1670_p13), %v1061_v51, 8  ;;  %vm1075_vm2 = vcmp.lt.s32.totalorder (!%p1670_p13), %v1061_v51, %v1074_v52 }
 0x159   : > { %v816_v63 = vpop.f32.mrb[20].mxu0  ;;  %v880_v0 = vpop.f32.mrb[20].mxu1  ;;  %vm2197_vm3 = vmand (!%p1670_p13), %vm1073_vm1, %vm1075_vm2 }
 0x15a   : > { %v913_v3 = vadd.f32 %v816_v63, %v404_v61  ;;  %v929_v4 = vadd.f32 %v880_v0, %v420_v62  ;;  %v818_v5 = vpop.f32.mrb[21].mxu0  ;;  %v882_v6 = vpop.f32.mrb[21].mxu1 }
 0x15b   : > { %v819_v7 = vpop.f32.mrb[22].mxu0  ;;  %v883_v8 = vpop.f32.mrb[22].mxu1  ;;  %v979_v55 = vld [vmem:[#allocation2 + $0x40] sm:$0xff] (!%p1670_p13) }
 0x15c   : > { %945 = vst [vmem:[#allocation2 + $0x50] sm:$0xff] %v913_v3  ;;  %961 = vst [vmem:[#allocation2 + $0xd0] sm:$0xff] %v929_v4  ;;  %v914_v9 = vadd.f32 %v819_v7, %v405_v1  ;;  %v930_v10 = vadd.f32 %v883_v8, %v421_v2  ;;  %v821_v11 = vpop.f32.mrb[23].mxu0  ;;  %v885_v12 = vpop.f32.mrb[23].mxu1  ;;  %v995_v59 = vld [vmem:[#allocation2 + $0xc0] sm:$0xff] (!%p1670_p13)  ;;  %v972_v3 = vld [vmem:[#allocation2 + $0x8] sm:$0xff] (!%p1670_p13) }
 0x15d   : > { %v976_v4 = vld [vmem:[#allocation2 + $0x28] sm:$0xff] (!%p1670_p13) }
 0x15e   : > { %946 = vst [vmem:[#allocation2 + $0x58] sm:$0xff] %v914_v9  ;;  %962 = vst [vmem:[#allocation2 + $0xd8] sm:$0xff] %v930_v10  ;;  %v980_v9 = vld [vmem:[#allocation2 + $0x48] sm:$0xff] (!%p1670_p13) }
 0x15f   : > { %v988_v11 = vld [vmem:[#allocation2 + $0x88] sm:$0xff] (!%p1670_p13) }
 0x161   : > { %v824_v15 = vpop.f32.mrb[24].mxu0  ;;  %v888_v16 = vpop.f32.mrb[24].mxu1 }
 0x162   : > { %v915_v19 = vadd.f32 %v824_v15, %v406_v13  ;;  %v931_v20 = vadd.f32 %v888_v16, %v422_v14  ;;  %v826_v21 = vpop.f32.mrb[25].mxu0  ;;  %v890_v22 = vpop.f32.mrb[25].mxu1  ;;  %v992_v16 = vld [vmem:[#allocation2 + $0xa8] sm:$0xff] (!%p1670_p13) }
 0x163   : > { %v827_v23 = vpop.f32.mrb[26].mxu0  ;;  %v891_v24 = vpop.f32.mrb[26].mxu1  ;;  %v981_v47 = vld [vmem:[#allocation2 + $0x50] sm:$0xff] (!%p1670_p13) }
 0x164   : > { %947 = vst [vmem:[#allocation2 + $0x60] sm:$0xff] %v915_v19  ;;  %963 = vst [vmem:[#allocation2 + $0xe0] sm:$0xff] %v931_v20  ;;  %v916_v25 = vadd.f32 %v827_v23, %v407_v17  ;;  %v932_v26 = vadd.f32 %v891_v24, %v423_v18  ;;  %v829_v27 = vpop.f32.mrb[27].mxu0  ;;  %v893_v28 = vpop.f32.mrb[27].mxu1  ;;  %v996_v17 = vld [vmem:[#allocation2 + $0xc8] sm:$0xff] (!%p1670_p13) }
 0x166   : > { %948 = vst [vmem:[#allocation2 + $0x68] sm:$0xff] %v916_v25  ;;  %964 = vst [vmem:[#allocation2 + $0xe8] sm:$0xff] %v932_v26 }
 0x168   : > { %970 = sbr.rel (%p1670_p13) target bundleno = 663 (0x297), region = 40 }
 0x169   : > { %v832_v31 = vpop.f32.mrb[28].mxu0  ;;  %v896_v32 = vpop.f32.mrb[28].mxu1 }
 0x16a   : > { %v917_v35 = vadd.f32 %v832_v31, %v408_v29  ;;  %v933_v36 = vadd.f32 %v896_v32, %v424_v30  ;;  %v834_v37 = vpop.f32.mrb[29].mxu0  ;;  %v898_v38 = vpop.f32.mrb[29].mxu1 }
 0x16b   : > { %v835_v39 = vpop.f32.mrb[30].mxu0  ;;  %v899_v40 = vpop.f32.mrb[30].mxu1  ;;  %v983_v56 = vld [vmem:[#allocation2 + $0x60] sm:$0xff] (!%p1670_p13) }
 0x16c   : > { %949 = vst [vmem:[#allocation2 + $0x70] sm:$0xff] %v917_v35  ;;  %965 = vst [vmem:[#allocation2 + $0xf0] sm:$0xff] %v933_v36  ;;  %v918_v41 = vadd.f32 %v835_v39, %v409_v33  ;;  %v934_v42 = vadd.f32 %v899_v40, %v425_v34  ;;  %v837_v43 = vpop.f32.mrb[31].mxu0  ;;  %v901_v44 = vpop.f32.mrb[31].mxu1  ;;  %v999_v60 = vld [vmem:[#allocation2 + $0xe0] sm:$0xff] (!%p1670_p13) }
 0x16d   : > { %v984_v10 = vld [vmem:[#allocation2 + $0x68] sm:$0xff] (!%p1670_p13) }
 0x16e   : > { %950 = vst [vmem:[#allocation2 + $0x78] sm:$0xff] %v918_v41  ;;  %966 = vst [vmem:[#allocation2 + $0xf8] sm:$0xff] %v934_v42  ;;  %v1000_v23 = vld [vmem:[#allocation2 + $0xe8] sm:$0xff] (!%p1670_p13) }
 0x173   : > { %v985_v52 = vld [vmem:[#allocation2 + $0x70] sm:$0xff] }
 0x1d3   : > { %v1010_v61 = vpop.permute.xlu0 %1009  ;;  %v1020_v40 = vpop.permute.xlu1 %1019 }
 0x1d4   : > { %v1027_v63 = vadd.f32 %v1010_v61, %v971_v53  ;;  %v1031_v0 = vadd.f32 %v1010_v61, %v975_v54  ;;  %v1035_v1 = vadd.f32 %v1010_v61, %v979_v55  ;;  %v1039_v2 = vadd.f32 %v1010_v61, %v983_v56  ;;  %v989_v53 = vld [vmem:[#allocation2 + $0x90] sm:$0xff] }
 0x1d5   : > { %v1043_v5 = vadd.f32 %v1010_v61, %v987_v57  ;;  %v1047_v6 = vadd.f32 %v1010_v61, %v991_v58  ;;  %v1051_v7 = vadd.f32 %v1010_v61, %v995_v59  ;;  %v1055_v8 = vadd.f32 %v1010_v61, %v999_v60  ;;  %v993_v58 = vld [vmem:[#allocation2 + $0xb0] sm:$0xff] }
 0x1d6   : > { %v2203_v12 = vsel %vm2197_vm3, %v1027_v63, 0.0  ;;  %v2207_v13 = vsel %vm2197_vm3, %v1031_v0, 0.0  ;;  %v2211_v14 = vsel %vm2197_vm3, %v1035_v1, 0.0  ;;  %v2215_v15 = vsel %vm2197_vm3, %v1039_v2, 0.0  ;;  %v997_v59 = vld [vmem:[#allocation2 + $0xd0] sm:$0xff] }
 0x1d7   : > { %v1015_v18 = vpop.permute.xlu0 %1014  ;;  %v2219_v19 = vsel %vm2197_vm3, %v1043_v5, 0.0  ;;  %v2223_v20 = vsel %vm2197_vm3, %v1047_v6, 0.0  ;;  %v2227_v21 = vsel %vm2197_vm3, %v1051_v7, 0.0  ;;  %v2231_v22 = vsel %vm2197_vm3, %v1055_v8, 0.0  ;;  %v1001_v60 = vld [vmem:[#allocation2 + $0xf0] sm:$0xff] }
 0x1d8   : > { %v1285_v24 = vadd.f32 %v2207_v13, %v2203_v12  ;;  %v1028_v25 = vadd.f32 %v1015_v18, %v972_v3  ;;  %v1032_v26 = vadd.f32 %v1015_v18, %v976_v4  ;;  %v1036_v27 = vadd.f32 %v1015_v18, %v980_v9 }
 0x1d9   : > { %v1040_v28 = vadd.f32 %v1015_v18, %v984_v10  ;;  %v1044_v29 = vadd.f32 %v1015_v18, %v988_v11  ;;  %v1048_v30 = vadd.f32 %v1015_v18, %v992_v16  ;;  %v1052_v31 = vadd.f32 %v1015_v18, %v996_v17 }
 0x1da   : > { %v1286_v32 = vadd.f32 %v1285_v24, %v2211_v14  ;;  %v1056_v33 = vadd.f32 %v1015_v18, %v1000_v23  ;;  %v2238_v34 = vsel %vm2197_vm3, %v1028_v25, 0.0  ;;  %v2242_v35 = vsel %vm2197_vm3, %v1032_v26, 0.0  ;;  %v1025_v25 = vpop.permute.xlu1 %1024 }
 0x1db   : > { %v2246_v36 = vsel %vm2197_vm3, %v1036_v27, 0.0  ;;  %v2250_v37 = vsel %vm2197_vm3, %v1040_v28, 0.0  ;;  %v2254_v38 = vsel %vm2197_vm3, %v1044_v29, 0.0  ;;  %v2258_v39 = vsel %vm2197_vm3, %v1048_v30, 0.0  ;;  %v974_v30 = vld [vmem:[#allocation2 + $0x18] sm:$0xff] }
 0x1dc   : > { %v1287_v41 = vadd.f32 %v1286_v32, %v2215_v15  ;;  %v2263_v42 = vsel %vm2197_vm3, %v1052_v31, 0.0  ;;  %v2267_v43 = vsel %vm2197_vm3, %v1056_v33, 0.0  ;;  %v1754_v44 = vpack.c.bf16 %v2242_v35, %v2207_v13 }
 0x1dd   : > { %v1764_v48 = vpack.c.bf16 %v2246_v36, %v2211_v14  ;;  %v1774_v49 = vpack.c.bf16 %v2250_v37, %v2215_v15  ;;  %v1784_v50 = vpack.c.bf16 %v2254_v38, %v2219_v19  ;;  %v1794_v51 = vpack.c.bf16 %v2258_v39, %v2223_v20 }
 0x1de   : > { %v1288_v54 = vadd.f32 %v1287_v41, %v2219_v19  ;;  %1822 = vst [vmem:[%s2100_s15 + $0x10] sm:$0xff] %v1754_v44   ;;  %v1804_v55 = vpack.c.bf16 %v2263_v42, %v2227_v21  ;;  %v1814_v56 = vpack.c.bf16 %v2267_v43, %v2231_v22  ;;  %v1292_v57 = vadd.f32 %v2242_v35, %v2238_v34  ;;  %v978_v41 = vld [vmem:[#allocation2 + $0x38] sm:$0xff] }
 0x1df   : > { %1824 = vst [vmem:[%s2100_s15 + $0x20] sm:$0xff] %v1764_v48   ;;  %1826 = vst [vmem:[%s2100_s15 + $0x30] sm:$0xff] %v1774_v49   ;;  %v1744_v61 = vpack.c.bf16 %v2238_v34, %v2203_v12  ;;  %v1029_v63 = vadd.f32 %v1020_v40, %v973_v45  ;;  %v1033_v0 = vadd.f32 %v1020_v40, %v977_v46  ;;  %v982_v44 = vld [vmem:[#allocation2 + $0x58] sm:$0xff] }
 0x1e0   : > { %1828 = vst [vmem:[%s2100_s15 + $0x40] sm:$0xff] %v1784_v50   ;;  %1830 = vst [vmem:[%s2100_s15 + $0x50] sm:$0xff] %v1794_v51   ;;  %v1037_v1 = vadd.f32 %v1020_v40, %v981_v47  ;;  %v1289_v2 = vadd.f32 %v1288_v54, %v2223_v20  ;;  %v1293_v3 = vadd.f32 %v1292_v57, %v2246_v36  ;;  %v990_v49 = vld [vmem:[#allocation2 + $0x98] sm:$0xff] }
 0x1e1   : > { %1832 = vst [vmem:[%s2100_s15 + $0x60] sm:$0xff] %v1804_v55   ;;  %1834 = vst [vmem:[%s2100_s15 + $0x70] sm:$0xff] %v1814_v56   ;;  %v1041_v4 = vadd.f32 %v1020_v40, %v985_v52  ;;  %v1045_v5 = vadd.f32 %v1020_v40, %v989_v53  ;;  %v1049_v6 = vadd.f32 %v1020_v40, %v993_v58  ;;  %v2300_v9 = vsel %vm2197_vm3, %v1029_v63, 0.0  ;;  %v994_v50 = vld [vmem:[#allocation2 + $0xb8] sm:$0xff] }
 0x1e2   : > { %1745 = vst [vmem:[%s2100_s15] sm:$0xff] %v1744_v61   ;;  %v1053_v7 = vadd.f32 %v1020_v40, %v997_v59  ;;  %v1057_v8 = vadd.f32 %v1020_v40, %v1001_v60  ;;  %v1290_v10 = vadd.f32 %v1289_v2, %v2227_v21  ;;  %v1294_v11 = vadd.f32 %v1293_v3, %v2250_v37  ;;  %v998_v52 = vld [vmem:[#allocation2 + $0xd8] sm:$0xff] }
 0x1e3   : > { %v2306_v16 = vsel %vm2197_vm3, %v1033_v0, 0.0  ;;  %v2310_v17 = vsel %vm2197_vm3, %v1037_v1, 0.0  ;;  %v2314_v18 = vsel %vm2197_vm3, %v1041_v4, 0.0  ;;  %v2318_v23 = vsel %vm2197_vm3, %v1045_v5, 0.0  ;;  %v1002_v53 = vld [vmem:[#allocation2 + $0xf8] sm:$0xff] }
 0x1e4   : > { %v2322_v24 = vsel %vm2197_vm3, %v1049_v6, 0.0  ;;  %v1291_v26 = vadd.f32 %v1290_v10, %v2231_v22  ;;  %v1295_v27 = vadd.f32 %v1294_v11, %v2254_v38  ;;  %v2328_v28 = vsel %vm2197_vm3, %v1053_v7, 0.0 }
 0x1e5   : > { %v1299_v29 = vadd.f32 %v2306_v16, %v2300_v9  ;;  %v2334_v31 = vsel %vm2197_vm3, %v1057_v8, 0.0  ;;  %v1313_v32 = vmul.f32 %v2203_v12, %v2203_v12  ;;  %v1317_v33 = vmul.f32 %v2207_v13, %v2207_v13  ;;  %v986_v12 = vld [vmem:[#allocation2 + $0x78] sm:$0xff] }
 0x1e6   : > { %v1321_v40 = vmul.f32 %v2211_v14, %v2211_v14  ;;  %1373 = vadd.xlane.f32.xlu0 %v1291_v26  ;;  %v1296_v45 = vadd.f32 %v1295_v27, %v2258_v39  ;;  %v1325_v47 = vmul.f32 %v2215_v15, %v2215_v15  ;;  %v1329_v48 = vmul.f32 %v2219_v19, %v2219_v19 }
 0x1e7   : > { %v1300_v46 = vadd.f32 %v1299_v29, %v2310_v17  ;;  %v1333_v13 = vmul.f32 %v2223_v20, %v2223_v20  ;;  %v1337_v14 = vmul.f32 %v2227_v21, %v2227_v21  ;;  %v1345_v51 = vadd.f32 %v1317_v33, %v1313_v32 }
 0x1e8   : > { %v1030_v54 = vadd.f32 %v1025_v25, %v974_v30  ;;  %v1297_v55 = vadd.f32 %v1296_v45, %v2263_v42  ;;  %v1034_v56 = vadd.f32 %v1025_v25, %v978_v41  ;;  %v1038_v57 = vadd.f32 %v1025_v25, %v982_v44 }
 0x1e9   : > { %v1301_v15 = vadd.f32 %v1300_v46, %v2314_v18  ;;  %v1346_v19 = vadd.f32 %v1345_v51, %v1321_v40  ;;  %v1042_v58 = vadd.f32 %v1025_v25, %v986_v12  ;;  %v1046_v59 = vadd.f32 %v1025_v25, %v990_v49 }
 0x1ea   : > { %v1050_v60 = vadd.f32 %v1025_v25, %v994_v50  ;;  %v1298_v61 = vadd.f32 %v1297_v55, %v2267_v43  ;;  %v1054_v63 = vadd.f32 %v1025_v25, %v998_v52  ;;  %v1058_v21 = vadd.f32 %v1025_v25, %v1002_v53 }
 0x1eb   : > { %v1302_v20 = vadd.f32 %v1301_v15, %v2318_v23  ;;  %v1347_v0 = vadd.f32 %v1346_v19, %v1325_v47  ;;  %v1096_v1 = vsel %vm2197_vm3, %v1030_v54, 0.0  ;;  %v1100_v2 = vsel %vm2197_vm3, %v1034_v56, 0.0 }
 0x1ec   : > { %v1104_v3 = vsel %vm2197_vm3, %v1038_v57, 0.0  ;;  %1375 = vadd.xlane.f32.xlu1 %v1298_v61  ;;  %v1108_v5 = vsel %vm2197_vm3, %v1042_v58, 0.0  ;;  %v2367_v6 = vsel %vm2197_vm3, %v1046_v59, 0.0  ;;  %v2371_v7 = vsel %vm2197_vm3, %v1050_v60, 0.0 }
 0x1ed   : > { %v1303_v4 = vadd.f32 %v1302_v20, %v2322_v24  ;;  %v1348_v8 = vadd.f32 %v1347_v0, %v1329_v48  ;;  %v2375_v10 = vsel %vm2197_vm3, %v1054_v63, 0.0  ;;  %v2379_v11 = vsel %vm2197_vm3, %v1058_v21, 0.0 }
 0x1ee   : > { %v1749_v25 = vpack.c.bf16 %v1096_v1, %v2300_v9  ;;  %v1759_v27 = vpack.c.bf16 %v1100_v2, %v2306_v16  ;;  %v1769_v29 = vpack.c.bf16 %v1104_v3, %v2310_v17  ;;  %v1779_v30 = vpack.c.bf16 %v1108_v5, %v2314_v18 }
 0x1ef   : > { %v1304_v26 = vadd.f32 %v1303_v4, %v2328_v28  ;;  %v1349_v32 = vadd.f32 %v1348_v8, %v1333_v13  ;;  %v1789_v62 = vpack.c.bf16 %v2367_v6, %v2318_v23  ;;  %v1799_v33 = vpack.c.bf16 %v2371_v7, %v2322_v24 }
 0x1f0   : > { %1821 = vst [vmem:[%s2100_s15 + $0x8] sm:$0xff] %v1749_v25   ;;  %v1809_v40 = vpack.c.bf16 %v2375_v10, %v2328_v28  ;;  %1823 = vst [vmem:[%s2100_s15 + $0x18] sm:$0xff] %v1759_v27   ;;  %v1819_v44 = vpack.c.bf16 %v2379_v11, %v2334_v31  ;;  %v1306_v45 = vadd.f32 %v1100_v2, %v1096_v1 }
 0x1f1   : > { %v1305_v41 = vadd.f32 %v1304_v26, %v2334_v31  ;;  %1825 = vst [vmem:[%s2100_s15 + $0x28] sm:$0xff] %v1769_v29   ;;  %1827 = vst [vmem:[%s2100_s15 + $0x38] sm:$0xff] %v1779_v30   ;;  %v1315_v46 = vmul.f32 %v2300_v9, %v2300_v9  ;;  %v1341_v47 = vmul.f32 %v2231_v22, %v2231_v22 }
 0x1f2   : > { %v1350_v48 = vadd.f32 %v1349_v32, %v1337_v14  ;;  %1829 = vst [vmem:[%s2100_s15 + $0x48] sm:$0xff] %v1789_v62   ;;  %1831 = vst [vmem:[%s2100_s15 + $0x58] sm:$0xff] %v1799_v33   ;;  %v1319_v12 = vmul.f32 %v2306_v16, %v2306_v16  ;;  %v1323_v49 = vmul.f32 %v2310_v17, %v2310_v17 }
 0x1f3   : > { %1833 = vst [vmem:[%s2100_s15 + $0x68] sm:$0xff] %v1809_v40   ;;  %1377 = vadd.xlane.f32.xlu0 %v1305_v41  ;;  %1835 = vst [vmem:[%s2100_s15 + $0x78] sm:$0xff] %v1819_v44   ;;  %v1307_v50 = vadd.f32 %v1306_v45, %v1104_v3  ;;  %v1327_v9 = vmul.f32 %v2314_v18, %v2314_v18  ;;  %v1314_v22 = vmul.f32 %v2238_v34, %v2238_v34 }
 0x1f4   : > { %v1351_v13 = vadd.f32 %v1350_v48, %v1341_v47  ;;  %v1359_v51 = vadd.f32 %v1319_v12, %v1315_v46  ;;  %v1318_v52 = vmul.f32 %v2242_v35, %v2242_v35  ;;  %v1322_v17 = vmul.f32 %v2246_v36, %v2246_v36 }
 0x1f5   : > { %v1308_v14 = vadd.f32 %v1307_v50, %v1108_v5  ;;  %v1316_v55 = vmul.f32 %v1096_v1, %v1096_v1  ;;  %v1331_v18 = vmul.f32 %v2318_v23, %v2318_v23  ;;  %v1320_v56 = vmul.f32 %v1100_v2, %v1100_v2 }
 0x1f6   : > { %1386 = vadd.xlane.f32.xlu1 %v1351_v13  ;;  %v1360_v16 = vadd.f32 %v1359_v51, %v1323_v49  ;;  %v1352_v54 = vadd.f32 %v1318_v52, %v1314_v22  ;;  %v1326_v57 = vmul.f32 %v2250_v37, %v2250_v37  ;;  %v1335_v19 = vmul.f32 %v2322_v24, %v2322_v24 }
 0x1f7   : > { %v1309_v53 = vadd.f32 %v1308_v14, %v2367_v6  ;;  %v1324_v59 = vmul.f32 %v1104_v3, %v1104_v3  ;;  %v1366_v60 = vadd.f32 %v1320_v56, %v1316_v55  ;;  %v1330_v61 = vmul.f32 %v2254_v38, %v2254_v38 }
 0x1f8   : > { %v1361_v15 = vadd.f32 %v1360_v16, %v1327_v9  ;;  %v1353_v35 = vadd.f32 %v1352_v54, %v1322_v17  ;;  %v1339_v20 = vmul.f32 %v2328_v28, %v2328_v28  ;;  %v1328_v21 = vmul.f32 %v1108_v5, %v1108_v5 }
 0x1f9   : > { %v1310_v34 = vadd.f32 %v1309_v53, %v2371_v7  ;;  %v1367_v0 = vadd.f32 %v1366_v60, %v1324_v59  ;;  %v1334_v24 = vmul.f32 %v2258_v39, %v2258_v39  ;;  %v1343_v2 = vmul.f32 %v2334_v31, %v2334_v31 }
 0x1fa   : > { %v1362_v58 = vadd.f32 %v1361_v15, %v1331_v18  ;;  %v1354_v23 = vadd.f32 %v1353_v35, %v1326_v57  ;;  %v1332_v38 = vmul.f32 %v2367_v6, %v2367_v6  ;;  %v1338_v28 = vmul.f32 %v2263_v42, %v2263_v42 }
 0x1fb   : > { %v1311_v36 = vadd.f32 %v1310_v34, %v2375_v10  ;;  %v1368_v4 = vadd.f32 %v1367_v0, %v1328_v21  ;;  %v1336_v25 = vmul.f32 %v2371_v7, %v2371_v7  ;;  %v1342_v31 = vmul.f32 %v2267_v43, %v2267_v43 }
 0x1fc   : > { %v1363_v63 = vadd.f32 %v1362_v58, %v1335_v19  ;;  %v1355_v1 = vadd.f32 %v1354_v23, %v1330_v61  ;;  %v1340_v6 = vmul.f32 %v2375_v10, %v2375_v10  ;;  %v1344_v7 = vmul.f32 %v2379_v11, %v2379_v11 }
 0x1fd   : > { %v1312_v37 = vadd.f32 %v1311_v36, %v2379_v11  ;;  %v1369_v39 = vadd.f32 %v1368_v4, %v1332_v38 }
 0x1fe   : > { %v1364_v3 = vadd.f32 %v1363_v63, %v1339_v20  ;;  %v1356_v5 = vadd.f32 %v1355_v1, %v1334_v24 }
 0x1ff   : > { %1379 = vadd.xlane.f32.xlu0 %v1312_v37  ;;  %v1370_v27 = vadd.f32 %v1369_v39, %v1336_v25 }
 0x200   : > { %v1365_v8 = vadd.f32 %v1364_v3, %v1343_v2  ;;  %v1357_v26 = vadd.f32 %v1356_v5, %v1338_v28 }
 0x201   : > { %v1371_v29 = vadd.f32 %v1370_v27, %v1340_v6 }
 0x202   : > { %1390 = vadd.xlane.f32.xlu1 %v1365_v8  ;;  %v1358_v42 = vadd.f32 %v1357_v26, %v1342_v31 }
 0x203   : > { %v1372_v30 = vadd.f32 %v1371_v29, %v1344_v7 }
 0x204   : > { %1388 = vadd.xlane.f32.xlu0 %v1358_v42 }
 0x208   : > { %1392 = vadd.xlane.f32.xlu0 %v1372_v30 }
 0x273   : > { %v1374_v43 = vpop.xlane.xlu0 %1373 }
 0x274   : > { %1382 = vst.msk [vmem:[%s2105_s20] sm:$0xff] %vm1381_vm4, %v1374_v43 }
 0x279   : > { %v1376_v32 = vpop.xlane.xlu1 %1375 }
 0x27a   : > { %1383 = vst.msk [vmem:[%s2105_s20 + $0x8] sm:$0xff] %vm1381_vm4, %v1376_v32 }
 0x280   : > { %v1378_v10 = vpop.xlane.xlu0 %1377 }
 0x281   : > { %1384 = vst.msk [vmem:[%s2105_s20 + $0x10] sm:$0xff] %vm1381_vm4, %v1378_v10 }
 0x283   : > { %v1387_v62 = vpop.xlane.xlu1 %1386 }
 0x284   : > { %1394 = vst.msk [vmem:[%s2110_s24] sm:$0xff] %vm1381_vm4, %v1387_v62 }
 0x28c   : > { %v1380_v33 = vpop.xlane.xlu0 %1379 }
 0x28d   : > { %1385 = vst.msk [vmem:[%s2105_s20 + $0x18] sm:$0xff] %vm1381_vm4, %v1380_v33 }
 0x28f   : > { %v1391_v11 = vpop.xlane.xlu1 %1390 }
 0x290   : > { %1396 = vst.msk [vmem:[%s2110_s24 + $0x10] sm:$0xff] %vm1381_vm4, %v1391_v11 }
 0x291   : > { %v1389_v40 = vpop.xlane.xlu0 %1388 }
 0x292   : > { %1395 = vst.msk [vmem:[%s2110_s24 + $0x8] sm:$0xff] %vm1381_vm4, %v1389_v40 }
 0x295   : > { %v1393_v41 = vpop.xlane.xlu0 %1392 }
 0x296   : > { %1397 = vst.msk [vmem:[%s2110_s24 + $0x18] sm:$0xff] %vm1381_vm4, %v1393_v41 }
 0x297 PF: > { %s23_s29 = sadd.s32 1, %s2017_s29   ;;  %s2490_s8 = sld [smem:[#allocation6_spill]] }
 0x298   : > { %p20_p0 = scmp.ge.s32.totalorder %s23_s29, 10   ;;  %s2491_s26 = smov %s2009_s28 }
 0x299   : > { %s2492_s27 = smov %s2013_s0  ;;  %s2493_s28 = smov %s2496_s30 }
 0x29a   :  { %22 = sbr.rel (!%p20_p0) target bundleno = 18 (0x12), region = 95 }
 0x29d   : > { %s2494_s0 = smov %s2490_s8 }

// kernel: cnn2_forward.7
= control target key start
LH: loop header
LB: loop body
LE: loop exit
PB: predicated region body
PF: predicated region fallthrough
CT: control target
= control target key end

     0   :  { %s812_s0 = inlined_call_operand.vmem [shape: s32[2], index: 0, kind: input, shape index: {}]   ;;  %s813_s1 = inlined_call_operand.vmem [shape: bf16[2,4,32,128], index: 1, kind: input, shape index: {}]   ;;  %s814_s2 = inlined_call_operand.vmem [shape: f32[32,1], index: 2, kind: input, shape index: {}]   ;;  %s815_s3 = inlined_call_operand.vmem [shape: f32[32,1], index: 3, kind: input, shape index: {}]   ;;  %s816_s4 = inlined_call_operand.vmem [shape: f32[2,4,32,128], index: 4, kind: output, shape index: {}]  }
   0x1   :  { %s9_s17 = sshll.u32 %s812_s0, 4  ;;  %s10_s17 = int_to_ptr.vmem [resolvable:$true] %s9_s17 }
   0x2   :  { %s624_s18 = scalar_lea.vmem %s10_s17, 16  ;;  %p629_p1 = scmp.lt.s32.totalorder %s10_s17, %s10_s17 }
   0x3   :  { %p625_p0 = scmp.ne.s32.totalorder %s10_s17, %s624_s18  ;;  %p630_p2 = scmp.lt.s32.totalorder %s624_s18, %s624_s18 }
   0x5   :  { %p631_p3 = por %p630_p2, %p629_p1 }
   0x7   :  { %p632_p4 = pnand %p631_p3, %p625_p0 }
   0x9   :  { %635 = shalt.err (!%p632_p4)  }
   0xa   :  { %s662_s19 = smov [#allocation3]  }
   0xb   :  { %12 = dma.vmem_to_smem %s10_s17, 16, %s662_s19, [#allocation2] }
   0xc   :  { %648 = dma.done.wait [#allocation2], 16 }
   0xd   :  { %649 = vsyncadd [#allocation2], 4294967280 }
   0xe   :  { %14 = sfence }
   0xf   :  { %s692_s20 = smov 0   ;;  %s694_s21 = smov 0  }
  0x10   :  { %s696_s22 = smov 0  }
  0x11 LB: > { %s39_s0 = sadd.s32 1, %s656_s21  ;;  %p548_p5 = scmp.ge.s32.totalorder %s660_s22, 1  ;;  %s660_s22 = sphi %s696_s22, %s20_s22   ;;  %s656_s21 = sphi %s694_s21, %s820_s21   ;;  %s652_s20 = sphi %s692_s20, %s819_s20  }
  0x12   : > { %p41_p6 = scmp.ge.s32.totalorder %s39_s0, 2  ;;  %p180_p7 = scmp.lt.s32.totalorder %s660_s22, 3 }
  0x14   : > { %s822_s0 = smov (%p41_p6, %s39_s0), 0  ;;  %p181_p8 = pnand %p548_p5, %p180_p7 }
  0x15   : > { %v283_v0 = vld [vmem:[%s814_s2 + $0x10] sm:$0xff] (!%p181_p8)  ;;  %v281_v1 = vld [vmem:[%s814_s2] sm:$0xff] (!%p181_p8)  ;;  %v663_v2 = vmov (!%p181_p8), 0   ;;  %v284_v3 = vld [vmem:[%s814_s2 + $0x18] sm:$0xff] (!%p181_p8)  ;;  %p221_p9 = scmp.lt.s32.totalorder (!%p181_p8), %s652_s20, 1  ;;  %s248_s15 = sld [smem:[#allocation3 + %s652_s20]] (!%p181_p8)  ;;  %v394_v9 = vlaneseq (!%p181_p8) }
  0x16   : > { %184 = sbr.rel (%p181_p8) target bundleno = 178 (0xb2), region = 32  ;;  %623 = vset.pattern.permute.xlu1 (!%p181_p8), %v663_v2  ;;  %622 = vset.pattern.permute.xlu0 (!%p181_p8), %v663_v2  ;;  %v282_v4 = vld [vmem:[%s814_s2 + $0x8] sm:$0xff] (!%p181_p8)  ;;  %v321_v6 = vld [vmem:[%s815_s3] sm:$0xff] (!%p181_p8)  ;;  %v324_v7 = vld [vmem:[%s815_s3 + $0x18] sm:$0xff] (!%p181_p8) }
  0x17   : > { %297 = vperm.xlu1 (!%p181_p8), %623, %v283_v0   ;;  %287 = vperm.xlu0 (!%p181_p8), %622, %v281_v1   ;;  %v322_v5 = vld [vmem:[%s815_s3 + $0x8] sm:$0xff] (!%p181_p8)  ;;  %v323_v8 = vld [vmem:[%s815_s3 + $0x10] sm:$0xff] (!%p181_p8)  ;;  %v395_v22 = vand.u32 (!%p181_p8), 127, %v394_v9 }
  0x1b   : > { %302 = vperm.xlu1 (!%p181_p8), %623, %v284_v3   ;;  %292 = vperm.xlu0 (!%p181_p8), %622, %v282_v4   ;;  %v398_v26 = vstv (!%p181_p8), %s248_s15 }
  0x1c   : > { %vm745_vm0 = vcmp.lt.s32.totalorder (!%p181_p8), %v395_v22, %v398_v26 }
  0x1d   : > { %s738_s13 = scalar_select %p221_p9, %s652_s20, 1 }
  0x1f   : > { %332 = vperm.xlu1 %623, %v322_v5   ;;  %327 = vperm.xlu0 %622, %v321_v6   ;;  %s555_s14 = sshll.u32 %s738_s13, 6  ;;  %s556_s19 = sshll.u32 %s738_s13, 7 }
  0x20   : > { %s232_s18 = scalar_lea.vmem %s813_s1, %s555_s14  ;;  %s753_s24 = scalar_lea.vmem %s816_s4, %s556_s19 }
  0x21   : > { %v558_v10 = vld [vmem:[%s232_s18] sm:$0xff]   ;;  %v590_v11 = vld [vmem:[%s232_s18 + $0x10] sm:$0xff]   ;;  %v589_v14 = vld [vmem:[%s232_s18 + $0x8] sm:$0xff]  }
  0x22   : > { %v592_v12 = vld [vmem:[%s232_s18 + $0x20] sm:$0xff]   ;;  %v594_v13 = vld [vmem:[%s232_s18 + $0x30] sm:$0xff]   ;;  %v591_v15 = vld [vmem:[%s232_s18 + $0x18] sm:$0xff]   ;;  %v559_v20 = vunpack.c.l.bf16 %v558_v10  ;;  %v567_v21 = vunpack.c.l.bf16 %v590_v11  ;;  %v560_v25 = vunpack.c.h.bf16 %v558_v10  ;;  %v563_v27 = vunpack.c.l.bf16 %v589_v14 }
  0x23   : > { %342 = vperm.xlu1 %623, %v324_v7   ;;  %337 = vperm.xlu0 %622, %v323_v8   ;;  %v593_v16 = vld [vmem:[%s232_s18 + $0x28] sm:$0xff]   ;;  %v595_v17 = vld [vmem:[%s232_s18 + $0x38] sm:$0xff]   ;;  %v575_v23 = vunpack.c.l.bf16 %v592_v12  ;;  %v583_v24 = vunpack.c.l.bf16 %v594_v13  ;;  %v571_v28 = vunpack.c.l.bf16 %v591_v15  ;;  %v568_v31 = vunpack.c.h.bf16 %v590_v11 }
  0x24   : > { %v579_v29 = vunpack.c.l.bf16 %v593_v16  ;;  %v587_v30 = vunpack.c.l.bf16 %v595_v17  ;;  %v576_v32 = vunpack.c.h.bf16 %v592_v12  ;;  %v584_v33 = vunpack.c.h.bf16 %v594_v13 }
  0x25   : > { %v564_v34 = vunpack.c.h.bf16 %v589_v14  ;;  %v572_v38 = vunpack.c.h.bf16 %v591_v15  ;;  %v580_v39 = vunpack.c.h.bf16 %v593_v16  ;;  %v588_v40 = vunpack.c.h.bf16 %v595_v17 }
  0x96   : > { %v298_v18 = vpop.permute.xlu1 %297  ;;  %v288_v19 = vpop.permute.xlu0 %287 }
  0x97   : > { %v305_v41 = vmul.f32 %v559_v20, %v288_v19  ;;  %v309_v42 = vmul.f32 %v567_v21, %v288_v19  ;;  %v313_v43 = vmul.f32 %v575_v23, %v288_v19  ;;  %v317_v44 = vmul.f32 %v583_v24, %v288_v19 }
  0x98   : > { %v307_v45 = vmul.f32 %v563_v27, %v298_v18  ;;  %v311_v46 = vmul.f32 %v571_v28, %v298_v18  ;;  %v315_v47 = vmul.f32 %v579_v29, %v298_v18  ;;  %v319_v48 = vmul.f32 %v587_v30, %v298_v18 }
  0x9a   : > { %v303_v35 = vpop.permute.xlu1 %302  ;;  %v293_v36 = vpop.permute.xlu0 %292 }
  0x9b   : > { %v306_v49 = vmul.f32 %v560_v25, %v293_v36  ;;  %v310_v50 = vmul.f32 %v568_v31, %v293_v36  ;;  %v314_v51 = vmul.f32 %v576_v32, %v293_v36  ;;  %v318_v52 = vmul.f32 %v584_v33, %v293_v36 }
  0x9c   : > { %v308_v55 = vmul.f32 %v564_v34, %v303_v35  ;;  %v312_v56 = vmul.f32 %v572_v38, %v303_v35  ;;  %v316_v57 = vmul.f32 %v580_v39, %v303_v35  ;;  %v320_v58 = vmul.f32 %v588_v40, %v303_v35 }
  0x9e   : > { %v333_v53 = vpop.permute.xlu1 %332  ;;  %v328_v54 = vpop.permute.xlu0 %327 }
  0x9f   : > { %v346_v59 = vadd.f32 %v333_v53, %v306_v49  ;;  %v350_v60 = vadd.f32 %v333_v53, %v310_v50  ;;  %v354_v61 = vadd.f32 %v333_v53, %v314_v51  ;;  %v358_v62 = vadd.f32 %v333_v53, %v318_v52 }
  0xa0   : > { %v345_v63 = vadd.f32 %v328_v54, %v305_v41  ;;  %v349_v0 = vadd.f32 %v328_v54, %v309_v42  ;;  %v353_v1 = vadd.f32 %v328_v54, %v313_v43  ;;  %v357_v2 = vadd.f32 %v328_v54, %v317_v44 }
  0xa1   : > { %v362_v3 = vmax.f32 %v346_v59, 0.0  ;;  %v366_v4 = vmax.f32 %v350_v60, 0.0  ;;  %v370_v5 = vmax.f32 %v354_v61, 0.0  ;;  %v374_v6 = vmax.f32 %v358_v62, 0.0 }
  0xa2   : > { %v361_v7 = vmax.f32 %v345_v63, 0.0  ;;  %v365_v8 = vmax.f32 %v349_v0, 0.0  ;;  %v369_v9 = vmax.f32 %v353_v1, 0.0  ;;  %v373_v10 = vmax.f32 %v357_v2, 0.0  ;;  %v343_v19 = vpop.permute.xlu1 %342  ;;  %v338_v24 = vpop.permute.xlu0 %337 }
  0xa3   : > { %v378_v11 = vmin.f32 %v362_v3, 20.0  ;;  %v382_v12 = vmin.f32 %v366_v4, 20.0  ;;  %v386_v13 = vmin.f32 %v370_v5, 20.0  ;;  %v390_v14 = vmin.f32 %v374_v6, 20.0 }
  0xa4   : > { %v377_v15 = vmin.f32 %v361_v7, 20.0  ;;  %v381_v16 = vmin.f32 %v365_v8, 20.0  ;;  %v385_v17 = vmin.f32 %v369_v9, 20.0  ;;  %v389_v18 = vmin.f32 %v373_v10, 20.0 }
  0xa5   : > { %v401_v20 = vsel %vm745_vm0, %v378_v11, 0.0  ;;  %v405_v21 = vsel %vm745_vm0, %v382_v12, 0.0  ;;  %v409_v22 = vsel %vm745_vm0, %v386_v13, 0.0  ;;  %v413_v23 = vsel %vm745_vm0, %v390_v14, 0.0 }
  0xa6   : > { %417 = vst [vmem:[%s753_s24 + $0x8] sm:$0xff] %v401_v20  ;;  %421 = vst [vmem:[%s753_s24 + $0x28] sm:$0xff] %v405_v21  ;;  %v400_v25 = vsel %vm745_vm0, %v377_v15, 0.0  ;;  %v404_v26 = vsel %vm745_vm0, %v381_v16, 0.0  ;;  %v408_v27 = vsel %vm745_vm0, %v385_v17, 0.0  ;;  %v412_v28 = vsel %vm745_vm0, %v389_v18, 0.0 }
  0xa7   : > { %425 = vst [vmem:[%s753_s24 + $0x48] sm:$0xff] %v409_v22  ;;  %429 = vst [vmem:[%s753_s24 + $0x68] sm:$0xff] %v413_v23  ;;  %v348_v29 = vadd.f32 %v343_v19, %v308_v55  ;;  %v352_v30 = vadd.f32 %v343_v19, %v312_v56  ;;  %v356_v31 = vadd.f32 %v343_v19, %v316_v57 }
  0xa8   : > { %416 = vst [vmem:[%s753_s24] sm:$0xff] %v400_v25  ;;  %420 = vst [vmem:[%s753_s24 + $0x20] sm:$0xff] %v404_v26  ;;  %v360_v32 = vadd.f32 %v343_v19, %v320_v58  ;;  %v347_v33 = vadd.f32 %v338_v24, %v307_v45  ;;  %v351_v34 = vadd.f32 %v338_v24, %v311_v46 }
  0xa9   : > { %424 = vst [vmem:[%s753_s24 + $0x40] sm:$0xff] %v408_v27  ;;  %428 = vst [vmem:[%s753_s24 + $0x60] sm:$0xff] %v412_v28  ;;  %v355_v35 = vadd.f32 %v338_v24, %v315_v47  ;;  %v359_v36 = vadd.f32 %v338_v24, %v319_v48  ;;  %v364_v38 = vmax.f32 %v348_v29, 0.0  ;;  %v368_v39 = vmax.f32 %v352_v30, 0.0 }
  0xaa   : > { %v372_v40 = vmax.f32 %v356_v31, 0.0  ;;  %v376_v41 = vmax.f32 %v360_v32, 0.0  ;;  %v363_v42 = vmax.f32 %v347_v33, 0.0  ;;  %v367_v43 = vmax.f32 %v351_v34, 0.0 }
  0xab   : > { %v371_v44 = vmax.f32 %v355_v35, 0.0  ;;  %v375_v49 = vmax.f32 %v359_v36, 0.0  ;;  %v380_v50 = vmin.f32 %v364_v38, 20.0  ;;  %v384_v51 = vmin.f32 %v368_v39, 20.0 }
  0xac   : > { %v388_v52 = vmin.f32 %v372_v40, 20.0  ;;  %v392_v53 = vmin.f32 %v376_v41, 20.0  ;;  %v379_v45 = vmin.f32 %v363_v42, 20.0  ;;  %v383_v46 = vmin.f32 %v367_v43, 20.0 }
  0xad   : > { %v387_v47 = vmin.f32 %v371_v44, 20.0  ;;  %v391_v48 = vmin.f32 %v375_v49, 20.0  ;;  %v403_v54 = vsel %vm745_vm0, %v380_v50, 0.0  ;;  %v407_v55 = vsel %vm745_vm0, %v384_v51, 0.0 }
  0xae   : > { %v411_v56 = vsel %vm745_vm0, %v388_v52, 0.0  ;;  %v415_v57 = vsel %vm745_vm0, %v392_v53, 0.0  ;;  %419 = vst [vmem:[%s753_s24 + $0x18] sm:$0xff] %v403_v54  ;;  %423 = vst [vmem:[%s753_s24 + $0x38] sm:$0xff] %v407_v55  ;;  %v402_v58 = vsel %vm745_vm0, %v379_v45, 0.0  ;;  %v406_v59 = vsel %vm745_vm0, %v383_v46, 0.0 }
  0xaf   : > { %427 = vst [vmem:[%s753_s24 + $0x58] sm:$0xff] %v411_v56  ;;  %431 = vst [vmem:[%s753_s24 + $0x78] sm:$0xff] %v415_v57  ;;  %v410_v60 = vsel %vm745_vm0, %v387_v47, 0.0  ;;  %v414_v61 = vsel %vm745_vm0, %v391_v48, 0.0 }
  0xb0   : > { %418 = vst [vmem:[%s753_s24 + $0x10] sm:$0xff] %v402_v58  ;;  %422 = vst [vmem:[%s753_s24 + $0x30] sm:$0xff] %v406_v59 }
  0xb1   : > { %426 = vst [vmem:[%s753_s24 + $0x50] sm:$0xff] %v410_v60  ;;  %430 = vst [vmem:[%s753_s24 + $0x70] sm:$0xff] %v414_v61 }
  0xb2 PF: > { %s20_s22 = sadd.s32 1, %s660_s22   ;;  %s819_s20 = smov %s656_s21 }
  0xb3   : > { %p17_p10 = scmp.ge.s32.totalorder %s20_s22, 4   ;;  %s820_s21 = smov %s822_s0 }
  0xb5   :  { %19 = sbr.rel (!%p17_p10) target bundleno = 17 (0x11), region = 62 }

// kernel: cnn2_forward.6
= control target key start
LH: loop header
LB: loop body
LE: loop exit
PB: predicated region body
PF: predicated region fallthrough
CT: control target
= control target key end

     0   :  { %s6899_s0 = inlined_call_operand.vmem [shape: s32[2], index: 0, kind: input, shape index: {}]   ;;  %s6900_s1 = inlined_call_operand.vmem [shape: bf16[2,4,2816,128], index: 1, kind: input, shape index: {}]   ;;  %s6901_s2 = inlined_call_operand.vmem [shape: bf16[4,128,2816], index: 2, kind: input, shape index: {}]   ;;  %s6902_s3 = inlined_call_operand.vmem [shape: f32[32,1], index: 3, kind: input, shape index: {}]   ;;  %s6903_s4 = inlined_call_operand.vmem [shape: bf16[2,4,32,128], index: 4, kind: output, shape index: {0}]   ;;  %s6904_s5 = inlined_call_operand.vmem [shape: f32[2,32,1], index: 5, kind: output, shape index: {1}]   ;;  %s6905_s6 = inlined_call_operand.vmem [shape: f32[2,32,1], index: 6, kind: output, shape index: {2}]  }
   0x1   :  { %s12_s23 = sshll.u32 %s6899_s0, 4  ;;  %s13_s23 = int_to_ptr.vmem [resolvable:$true] %s12_s23 }
   0x2   :  { %s6060_s24 = scalar_lea.vmem %s13_s23, 16  ;;  %p6065_p1 = scmp.lt.s32.totalorder %s13_s23, %s13_s23 }
   0x3   :  { %p6061_p0 = scmp.ne.s32.totalorder %s13_s23, %s6060_s24  ;;  %p6066_p2 = scmp.lt.s32.totalorder %s6060_s24, %s6060_s24 }
   0x5   :  { %p6067_p3 = por %p6066_p2, %p6065_p1 }
   0x7   :  { %p6068_p4 = pnand %p6067_p3, %p6061_p0 }
   0x9   :  { %6071 = shalt.err (!%p6068_p4)  }
   0xa   :  { %s6114_s25 = smov [#allocation4]  }
   0xb   :  { %15 = dma.vmem_to_smem %s13_s23, 16, %s6114_s25, [#allocation3] }
   0xc   :  { %6092 = dma.done.wait [#allocation3], 16 }
   0xd   :  { %6093 = vsyncadd [#allocation3], 4294967280 }
   0xe   :  { %17 = sfence }
   0xf   :  { %s6155_s26 = smov 0   ;;  %s6157_s27 = smov 0  }
  0x10   :  { %s6159_s28 = smov 0   ;;  %s6161_s0 = smov 0  }
  0x11   :  { %s6163_s29 = smov 0  }
  0x12 LB: > { %s38_s30 = sadd.s32 1, %s6104_s28  ;;  %s49_s7 = sadd.s32 1, %s6108_s0  ;;  %s6112_s29 = sphi %s6163_s29, %s23_s29   ;;  %s6108_s0 = sphi %s6161_s0, %s6913_s0   ;;  %s6104_s28 = sphi %s6159_s28, %s6912_s28   ;;  %s6100_s27 = sphi %s6157_s27, %s6911_s27   ;;  %s6096_s26 = sphi %s6155_s26, %s6910_s26  }
  0x13   : > { %p39_p5 = scmp.ge.s32.totalorder %s38_s30, 4  ;;  %p4405_p6 = scmp.ge.s32.totalorder %s6112_s29, 1 }
  0x14   : > { %p252_p7 = scmp.lt.s32.totalorder %s6112_s29, 9 }
  0x15   : > { %s6915_s30 = smov (%p39_p5, %s38_s30), 0  ;;  %s6917_s7 = smov (!%p39_p5, %s49_s7), %s6108_s0 }
  0x16   : > { %p253_p8 = pnand %p4405_p6, %p252_p7  ;;  %p51_p9 = scmp.ge.s32.totalorder %s6917_s7, 2 }
  0x17   : > { %p311_p10 = scmp.lt.s32.totalorder (!%p253_p8), %s6100_s27, 1  ;;  %p313_p11 = scmp.lt.s32.totalorder (!%p253_p8), %s6096_s26, 3 }
  0x18   : > { %s6919_s7 = smov (%p51_p9, %s6917_s7), 0  ;;  %256 = sbr.rel (%p253_p8) target bundleno = 928 (0x3a0), region = 32 }
  0x19   : > { %6906 = sst [smem:[#allocation6_spill]] %s6919_s7  ;;  %p4413_p12 = scmp.ne.s32.totalorder (!%p253_p8), %s6096_s26, 0 }
  0x1a   : > { %s6188_s8 = sld [smem:[#allocation4 + %s6100_s27]] (!%p253_p8) }
  0x1f   : > { %s6921_s27 = smov (!%p311_p10, %s6100_s27), 1  ;;  %v6115_v0 = vmov (!%p4413_p12), 0.0  }
  0x20   : > { %s314_s9 = scalar_select %p313_p11, %s6096_s26, 3 }
  0x21   : > { %s5574_s10 = smul.u32 1408, %s6921_s27  ;;  %s4786_s11 = sshll.u32 %s6921_s27, 6  ;;  %362 = vst [vmem:[#allocation2] sm:$0xff] (!%p4413_p12), %v6115_v0  ;;  %363 = vst [vmem:[#allocation2 + $0x8] sm:$0xff] (!%p4413_p12), %v6115_v0 }
  0x22   : > { %s5573_s12 = smul.u32 352, %s314_s9  ;;  %s6194_s15 = scalar_lea.vmem %s6903_s4, %s4786_s11  ;;  %364 = vst [vmem:[#allocation2 + $0x10] sm:$0xff] (!%p4413_p12), %v6115_v0  ;;  %365 = vst [vmem:[#allocation2 + $0x18] sm:$0xff] (!%p4413_p12), %v6115_v0 }
  0x23   : > { %s4787_s16 = sshll.u32 %s6921_s27, 5  ;;  %361 = sbr.rel (%p4413_p12) target bundleno = 42 (0x2a), region = 36  ;;  %366 = vst [vmem:[#allocation2 + $0x20] sm:$0xff] (!%p4413_p12), %v6115_v0  ;;  %367 = vst [vmem:[#allocation2 + $0x28] sm:$0xff] (!%p4413_p12), %v6115_v0 }
  0x24   : > { %s320_s17 = sadd.s32 %s5574_s10, %s5573_s12  ;;  %s6199_s20 = scalar_lea.vmem %s6904_s5, %s4787_s16  ;;  %368 = vst [vmem:[#allocation2 + $0x30] sm:$0xff] (!%p4413_p12), %v6115_v0  ;;  %369 = vst [vmem:[#allocation2 + $0x38] sm:$0xff] (!%p4413_p12), %v6115_v0 }
  0x25   : > { %s4406_s21 = sshll.u32 %s320_s17, 2  ;;  %s6204_s24 = scalar_lea.vmem %s6905_s6, %s4787_s16  ;;  %370 = vst [vmem:[#allocation2 + $0x40] sm:$0xff] (!%p4413_p12), %v6115_v0  ;;  %371 = vst [vmem:[#allocation2 + $0x48] sm:$0xff] (!%p4413_p12), %v6115_v0 }
  0x26   : > { %s6209_s7 = scalar_lea.vmem %s6900_s1, %s4406_s21  ;;  %372 = vst [vmem:[#allocation2 + $0x50] sm:$0xff] (!%p4413_p12), %v6115_v0  ;;  %373 = vst [vmem:[#allocation2 + $0x58] sm:$0xff] (!%p4413_p12), %v6115_v0 }
  0x27   : > { %374 = vst [vmem:[#allocation2 + $0x60] sm:$0xff] (!%p4413_p12), %v6115_v0  ;;  %375 = vst [vmem:[#allocation2 + $0x68] sm:$0xff] (!%p4413_p12), %v6115_v0 }
  0x28   : > { %376 = vst [vmem:[#allocation2 + $0x70] sm:$0xff] (!%p4413_p12), %v6115_v0  ;;  %377 = vst [vmem:[#allocation2 + $0x78] sm:$0xff] (!%p4413_p12), %v6115_v0 }
  0x2a PF: > { %v5618_v1 = vld [vmem:[%s6209_s7 + $0x40] sm:$0xff]   ;;  %v5620_v3 = vld [vmem:[%s6209_s7 + $0x48] sm:$0xff]   ;;  %v5622_v5 = vld [vmem:[%s6209_s7 + $0x50] sm:$0xff]   ;;  %s4789_s27 = smul.u32 1408, %s6096_s26  ;;  %p4767_p13 = scmp.ne.s32.totalorder %s6096_s26, 3 }
  0x2b   : > { %v5619_v2 = vld [vmem:[%s6209_s7] sm:$0xff]   ;;  %4853 = vmatprep.subr.bf16.mxu0 %v5618_v1  ;;  %5557 = vmatprep.subr.bf16.mxu1 %v5618_v1  ;;  %v5621_v4 = vld [vmem:[%s6209_s7 + $0x8] sm:$0xff]   ;;  %v5623_v6 = vld [vmem:[%s6209_s7 + $0x10] sm:$0xff]   ;;  %vm4186_vm3 = vcmask (!%p4767_p13), 7168  }
  0x2c   : > { %4854 = vmatpush3.bf16.msra.mxu0 %v5619_v2  ;;  %5565 = vmatpush3.bf16.msra.mxu1 %v5619_v2  ;;  %v5624_v7 = vld [vmem:[%s6209_s7 + $0x58] sm:$0xff]   ;;  %v5626_v9 = vld [vmem:[%s6209_s7 + $0x60] sm:$0xff]   ;;  %s6225_s12 = scalar_lea.vmem %s6901_s2, %s4789_s27  ;;  %v5628_v11 = vld [vmem:[%s6209_s7 + $0x68] sm:$0xff]  }
  0x2d   : > { %4855 = vmatprep.subr.bf16.mxu0 %v5620_v3  ;;  %5558 = vmatprep.subr.bf16.mxu1 %v5620_v3  ;;  %v5625_v8 = vld [vmem:[%s6209_s7 + $0x18] sm:$0xff]   ;;  %v5627_v10 = vld [vmem:[%s6209_s7 + $0x20] sm:$0xff]   ;;  %v5629_v14 = vld [vmem:[%s6209_s7 + $0x28] sm:$0xff]  }
  0x2e   : > { %v5636_v12 = vld [vmem:[%s6225_s12 + $0x4] ss:$88 sps:$4 sm:$0xff]   ;;  %v5630_v15 = vld [vmem:[%s6209_s7 + $0x70] sm:$0xff]   ;;  %v5634_v19 = vld [vmem:[%s6225_s12] ss:$88 sps:$4 sm:$0xff]  }
  0x2f   : > { %v5639_v13 = vld [vmem:[%s6225_s12 + $0x2c4] ss:$88 sps:$4 sm:$0xff]   ;;  %2893 = vmatprep.mubr.bf16.mxu0 %v5636_v12  ;;  %v5631_v16 = vld [vmem:[%s6209_s7 + $0x30] sm:$0xff]   ;;  %v5637_v20 = vld [vmem:[%s6225_s12 + $0x2c0] ss:$88 sps:$4 sm:$0xff]  }
  0x30   : > { %4856 = vmatpush3.bf16.msra.mxu0 %v5621_v4  ;;  %5566 = vmatpush3.bf16.msra.mxu1 %v5621_v4  ;;  %v5632_v17 = vld [vmem:[%s6209_s7 + $0x78] sm:$0xff]   ;;  %v5640_v21 = vld [vmem:[%s6209_s7 + $0xc0] sm:$0xff]   ;;  %v5644_v25 = vld [vmem:[%s6209_s7 + $0xc8] sm:$0xff]  }
  0x31   : > { %4857 = vmatprep.subr.bf16.mxu0 %v5622_v5  ;;  %5559 = vmatprep.subr.bf16.mxu1 %v5622_v5  ;;  %v5633_v18 = vld [vmem:[%s6209_s7 + $0x38] sm:$0xff]   ;;  %v5641_v22 = vld [vmem:[%s6209_s7 + $0x140] sm:$0xff]   ;;  %v5645_v26 = vld [vmem:[%s6209_s7 + $0x148] sm:$0xff]  }
  0x32   : > { %2925 = vmatprep.mubr.bf16.mxu1 %v5639_v13  ;;  %v5642_v23 = vld [vmem:[%s6209_s7 + $0x80] sm:$0xff]   ;;  %v5648_v27 = vld [vmem:[%s6225_s12 + $0xb4] ss:$88 sps:$4 sm:$0xff]   ;;  %v5652_v32 = vld [vmem:[%s6225_s12 + $0xb0] ss:$88 sps:$4 sm:$0xff]  }
  0x33   : > { %v5643_v24 = vld [vmem:[%s6209_s7 + $0x100] sm:$0xff]   ;;  %v5646_v28 = vld [vmem:[%s6209_s7 + $0x88] sm:$0xff]   ;;  %v5654_v31 = vld [vmem:[%s6209_s7 + $0xd0] sm:$0xff]  }
  0x34   : > { %4858 = vmatpush3.bf16.msra.mxu0 %v5623_v6  ;;  %5567 = vmatpush3.bf16.msra.mxu1 %v5623_v6  ;;  %v5650_v29 = vld [vmem:[%s6225_s12 + $0x374] ss:$88 sps:$4 sm:$0xff]   ;;  %v5653_v34 = vld [vmem:[%s6225_s12 + $0x370] ss:$88 sps:$4 sm:$0xff]   ;;  %v5658_v37 = vld [vmem:[%s6209_s7 + $0xd8] sm:$0xff]  }
  0x35   : > { %4859 = vmatprep.subr.bf16.mxu0 %v5624_v7  ;;  %5560 = vmatprep.subr.bf16.mxu1 %v5624_v7  ;;  %v5647_v30 = vld [vmem:[%s6209_s7 + $0x108] sm:$0xff]   ;;  %v5655_v33 = vld [vmem:[%s6209_s7 + $0x150] sm:$0xff]   ;;  %v5659_v38 = vld [vmem:[%s6209_s7 + $0x158] sm:$0xff]  }
  0x36   : > { %v5656_v35 = vld [vmem:[%s6209_s7 + $0x90] sm:$0xff]   ;;  %v5662_v39 = vld [vmem:[%s6225_s12 + $0x164] ss:$88 sps:$4 sm:$0xff]   ;;  %v5666_v44 = vld [vmem:[%s6225_s12 + $0x160] ss:$88 sps:$4 sm:$0xff]  }
  0x37   : > { %v5657_v36 = vld [vmem:[%s6209_s7 + $0x110] sm:$0xff]   ;;  %v5660_v40 = vld [vmem:[%s6209_s7 + $0x98] sm:$0xff]   ;;  %v5668_v43 = vld [vmem:[%s6209_s7 + $0xe0] sm:$0xff]  }
  0x38   : > { %4860 = vmatpush3.bf16.msra.mxu0 %v5625_v8  ;;  %5568 = vmatpush3.bf16.msra.mxu1 %v5625_v8  ;;  %v5664_v41 = vld [vmem:[%s6225_s12 + $0x424] ss:$88 sps:$4 sm:$0xff]   ;;  %v5667_v45 = vld [vmem:[%s6225_s12 + $0x420] ss:$88 sps:$4 sm:$0xff]   ;;  %v5672_v49 = vld [vmem:[%s6209_s7 + $0xe8] sm:$0xff]  }
  0x39   : > { %4861 = vmatprep.subr.bf16.mxu0 %v5626_v9  ;;  %5561 = vmatprep.subr.bf16.mxu1 %v5626_v9  ;;  %v5661_v42 = vld [vmem:[%s6209_s7 + $0x118] sm:$0xff]   ;;  %v5669_v46 = vld [vmem:[%s6209_s7 + $0x160] sm:$0xff]   ;;  %v5673_v50 = vld [vmem:[%s6209_s7 + $0x168] sm:$0xff]  }
  0x3a   : > { %v5670_v47 = vld [vmem:[%s6209_s7 + $0xa0] sm:$0xff]   ;;  %v5676_v51 = vld [vmem:[%s6225_s12 + $0x214] ss:$88 sps:$4 sm:$0xff]   ;;  %v5680_v56 = vld [vmem:[%s6225_s12 + $0x210] ss:$88 sps:$4 sm:$0xff]  }
  0x3b   : > { %v5671_v48 = vld [vmem:[%s6209_s7 + $0x120] sm:$0xff]   ;;  %v5678_v52 = vld [vmem:[%s6225_s12 + $0x4d4] ss:$88 sps:$4 sm:$0xff]   ;;  %v5681_v57 = vld [vmem:[%s6225_s12 + $0x4d0] ss:$88 sps:$4 sm:$0xff]  }
  0x3c   : > { %4862 = vmatpush3.bf16.msra.mxu0 %v5627_v10  ;;  %5569 = vmatpush3.bf16.msra.mxu1 %v5627_v10  ;;  %v5674_v53 = vld [vmem:[%s6209_s7 + $0xa8] sm:$0xff]   ;;  %v5682_v55 = vld [vmem:[%s6209_s7 + $0xf0] sm:$0xff]   ;;  %v5686_v61 = vld [vmem:[%s6209_s7 + $0xf8] sm:$0xff]  }
  0x3d   : > { %4863 = vmatprep.subr.bf16.mxu0 %v5628_v11  ;;  %5562 = vmatprep.subr.bf16.mxu1 %v5628_v11  ;;  %v5675_v54 = vld [vmem:[%s6209_s7 + $0x128] sm:$0xff]   ;;  %v5683_v58 = vld [vmem:[%s6209_s7 + $0x170] sm:$0xff]   ;;  %v5687_v62 = vld [vmem:[%s6209_s7 + $0x178] sm:$0xff]  }
  0x3e   : > { %v5684_v59 = vld [vmem:[%s6209_s7 + $0xb0] sm:$0xff]   ;;  %v5688_v63 = vld [vmem:[%s6209_s7 + $0xb8] sm:$0xff]   ;;  %v5692_v1 = vld [vmem:[%s6225_s12 + $0xc] ss:$88 sps:$4 sm:$0xff]  }
  0x3f   : > { %v5685_v60 = vld [vmem:[%s6209_s7 + $0x130] sm:$0xff]   ;;  %v5689_v0 = vld [vmem:[%s6209_s7 + $0x138] sm:$0xff]   ;;  %v5690_v2 = vld [vmem:[%s6225_s12 + $0x8] ss:$88 sps:$4 sm:$0xff]  }
  0x40   : > { %4864 = vmatpush3.bf16.msra.mxu0 %v5629_v14  ;;  %5570 = vmatpush3.bf16.msra.mxu1 %v5629_v14  ;;  %v5693_v3 = vld [vmem:[%s6225_s12 + $0x10] ss:$88 sps:$4 sm:$0xff]   ;;  %v5695_v4 = vld [vmem:[%s6225_s12 + $0x14] ss:$88 sps:$4 sm:$0xff]   ;;  %v5696_v5 = vld [vmem:[%s6209_s7 + $0x1c0] sm:$0xff]  }
  0x41   : > { %4865 = vmatprep.subr.bf16.mxu0 %v5630_v15  ;;  %5563 = vmatprep.subr.bf16.mxu1 %v5630_v15  ;;  %v5697_v6 = vld [vmem:[%s6209_s7 + $0x180] sm:$0xff]   ;;  %v5700_v9 = vld [vmem:[%s6225_s12 + $0xbc] ss:$88 sps:$4 sm:$0xff]   ;;  %v5704_v11 = vld [vmem:[%s6225_s12 + $0xb8] ss:$88 sps:$4 sm:$0xff]  }
  0x42   : > { %v5698_v7 = vld [vmem:[%s6209_s7 + $0x240] sm:$0xff]   ;;  %v5706_v13 = vld [vmem:[%s6209_s7 + $0x1c8] sm:$0xff]  }
  0x43   : > { %v5699_v8 = vld [vmem:[%s6209_s7 + $0x200] sm:$0xff]   ;;  %v5707_v14 = vld [vmem:[%s6209_s7 + $0x188] sm:$0xff]  }
  0x44   : > { %4866 = vmatpush3.bf16.msra.mxu0 %v5631_v16  ;;  %5571 = vmatpush3.bf16.msra.mxu1 %v5631_v16  ;;  %v5702_v10 = vld [vmem:[%s6225_s12 + $0xc4] ss:$88 sps:$4 sm:$0xff]   ;;  %v5705_v12 = vld [vmem:[%s6225_s12 + $0xc0] ss:$88 sps:$4 sm:$0xff]   ;;  %v5708_v15 = vld [vmem:[%s6209_s7 + $0x248] sm:$0xff]  }
  0x45   : > { %4867 = vmatprep.subr.bf16.mxu0 %v5632_v17  ;;  %5564 = vmatprep.subr.bf16.mxu1 %v5632_v17  ;;  %v5709_v16 = vld [vmem:[%s6209_s7 + $0x208] sm:$0xff]  }
  0x46   : > { %v5710_v17 = vld [vmem:[%s6225_s12 + $0x16c] ss:$88 sps:$4 sm:$0xff]  }
  0x48   : > { %4868 = vmatpush3.bf16.msra.mxu0 %v5633_v18  ;;  %5572 = vmatpush3.bf16.msra.mxu1 %v5633_v18  ;;  %v5712_v18 = vld [vmem:[%s6225_s12 + $0x174] ss:$88 sps:$4 sm:$0xff]  }
  0x49   : > { %4917 = vmatprep.subr.bf16.mxu1 %v5640_v21  ;;  %4981 = vmatprep.subr.bf16.mxu0 %v5641_v22  ;;  %v5715_v21 = vld [vmem:[%s6225_s12 + $0x170] ss:$88 sps:$4 sm:$0xff]  }
  0x4a   : > { %v5717_v22 = vld [vmem:[%s6209_s7 + $0x190] sm:$0xff]  }
  0x4b   : > { %2894 = vmatmul.mubr.bf16.vlgmr.msra.gmra.mrb[0].mxu0 %v5634_v19  ;;  %2926 = vmatmul.mubr.bf16.vlgmr.msra.gmra.mrb[0].mxu1 %v5637_v20  ;;  %v5716_v19 = vld [vmem:[%s6209_s7 + $0x1d0] sm:$0xff]   ;;  %v5714_v20 = vld [vmem:[%s6225_s12 + $0x168] ss:$88 sps:$4 sm:$0xff]  }
  0x4c   : > { %4918 = vmatpush3.bf16.msra.mxu1 %v5642_v23  ;;  %4982 = vmatpush3.bf16.msra.mxu0 %v5643_v24  ;;  %v5718_v23 = vld [vmem:[%s6209_s7 + $0x250] sm:$0xff]  }
  0x4d   : > { %4919 = vmatprep.subr.bf16.mxu1 %v5644_v25  ;;  %4983 = vmatprep.subr.bf16.mxu0 %v5645_v26  ;;  %v5719_v24 = vld [vmem:[%s6209_s7 + $0x210] sm:$0xff]   ;;  %v5722_v26 = vld [vmem:[%s6225_s12 + $0x224] ss:$88 sps:$4 sm:$0xff]  }
  0x4e   : > { %2901 = vmatprep.mubr.bf16.mxu0 %v5648_v27  ;;  %2933 = vmatprep.mubr.bf16.mxu1 %v5650_v29  ;;  %v5720_v25 = vld [vmem:[%s6225_s12 + $0x21c] ss:$88 sps:$4 sm:$0xff]   ;;  %v5724_v29 = vld [vmem:[%s6225_s12 + $0x218] ss:$88 sps:$4 sm:$0xff]  }
  0x4f   : > { %v5726_v27 = vld [vmem:[%s6209_s7 + $0x1d8] sm:$0xff]  }
  0x50   : > { %4920 = vmatpush3.bf16.msra.mxu1 %v5646_v28  ;;  %4984 = vmatpush3.bf16.msra.mxu0 %v5647_v30  ;;  %v5727_v28 = vld [vmem:[%s6209_s7 + $0x198] sm:$0xff]  }
  0x51   : > { %4921 = vmatprep.subr.bf16.mxu1 %v5654_v31  ;;  %4985 = vmatprep.subr.bf16.mxu0 %v5655_v33  ;;  %v5728_v30 = vld [vmem:[%s6209_s7 + $0x258] sm:$0xff]   ;;  %v5730_v33 = vld [vmem:[%s6225_s12 + $0x2cc] ss:$88 sps:$4 sm:$0xff]  }
  0x52   : > { %v5729_v31 = vld [vmem:[%s6209_s7 + $0x218] sm:$0xff]  }
  0x53   : > { %2902 = vmatmul.mubr.bf16.gmra.mrb[4].mxu0 %v5652_v32  ;;  %2934 = vmatmul.mubr.bf16.gmra.mrb[4].mxu1 %v5653_v34  ;;  %v5725_v32 = vld [vmem:[%s6225_s12 + $0x220] ss:$88 sps:$4 sm:$0xff]   ;;  %v5732_v34 = vld [vmem:[%s6225_s12 + $0x2d4] ss:$88 sps:$4 sm:$0xff]  }
  0x54   : > { %4922 = vmatpush3.bf16.msra.mxu1 %v5656_v35  ;;  %4986 = vmatpush3.bf16.msra.mxu0 %v5657_v36  ;;  %v5736_v35 = vld [vmem:[%s6209_s7 + $0x1e0] sm:$0xff]  }
  0x55   : > { %4923 = vmatprep.subr.bf16.mxu1 %v5658_v37  ;;  %4987 = vmatprep.subr.bf16.mxu0 %v5659_v38  ;;  %v5737_v36 = vld [vmem:[%s6209_s7 + $0x1a0] sm:$0xff]  }
  0x56   : > { %2909 = vmatprep.mubr.bf16.mxu0 %v5662_v39  ;;  %2941 = vmatprep.mubr.bf16.mxu1 %v5664_v41  ;;  %v5738_v37 = vld [vmem:[%s6209_s7 + $0x260] sm:$0xff]   ;;  %v5740_v41 = vld [vmem:[%s6225_s12 + $0x37c] ss:$88 sps:$4 sm:$0xff]  }
  0x57   : > { %v5739_v38 = vld [vmem:[%s6209_s7 + $0x220] sm:$0xff]  }
  0x58   : > { %4924 = vmatpush3.bf16.msra.mxu1 %v5660_v40  ;;  %4988 = vmatpush3.bf16.msra.mxu0 %v5661_v42  ;;  %v5734_v39 = vld [vmem:[%s6225_s12 + $0x2c8] ss:$88 sps:$4 sm:$0xff]   ;;  %v5742_v42 = vld [vmem:[%s6225_s12 + $0x384] ss:$88 sps:$4 sm:$0xff]  }
  0x59   : > { %4925 = vmatprep.subr.bf16.mxu1 %v5668_v43  ;;  %4989 = vmatprep.subr.bf16.mxu0 %v5669_v46  ;;  %v5735_v40 = vld [vmem:[%s6225_s12 + $0x2d0] ss:$88 sps:$4 sm:$0xff]  }
  0x5a   : > { %v5746_v43 = vld [vmem:[%s6209_s7 + $0x1e8] sm:$0xff]  }
  0x5b   : > { %2910 = vmatmul.mubr.bf16.gmra.mrb[8].mxu0 %v5666_v44  ;;  %2942 = vmatmul.mubr.bf16.gmra.mrb[8].mxu1 %v5667_v45  ;;  %v5747_v44 = vld [vmem:[%s6209_s7 + $0x1a8] sm:$0xff]  }
  0x5c   : > { %4926 = vmatpush3.bf16.msra.mxu1 %v5670_v47  ;;  %4990 = vmatpush3.bf16.msra.mxu0 %v5671_v48  ;;  %v5748_v45 = vld [vmem:[%s6209_s7 + $0x268] sm:$0xff]   ;;  %v5744_v47 = vld [vmem:[%s6225_s12 + $0x378] ss:$88 sps:$4 sm:$0xff]  }
  0x5d   : > { %4927 = vmatprep.subr.bf16.mxu1 %v5672_v49  ;;  %4991 = vmatprep.subr.bf16.mxu0 %v5673_v50  ;;  %v5749_v46 = vld [vmem:[%s6209_s7 + $0x228] sm:$0xff]   ;;  %v5745_v48 = vld [vmem:[%s6225_s12 + $0x380] ss:$88 sps:$4 sm:$0xff]  }
  0x5e   : > { %2917 = vmatprep.mubr.bf16.mxu0 %v5676_v51  ;;  %2949 = vmatprep.mubr.bf16.mxu1 %v5678_v52  ;;  %v5750_v49 = vld [vmem:[%s6225_s12 + $0x42c] ss:$88 sps:$4 sm:$0xff]   ;;  %v5756_v51 = vld [vmem:[%s6209_s7 + $0x1f0] sm:$0xff]  }
  0x5f   : > { %v5752_v50 = vld [vmem:[%s6225_s12 + $0x434] ss:$88 sps:$4 sm:$0xff]  }
  0x60   : > { %4928 = vmatpush3.bf16.msra.mxu1 %v5674_v53  ;;  %4992 = vmatpush3.bf16.msra.mxu0 %v5675_v54  ;;  %v5757_v52 = vld [vmem:[%s6209_s7 + $0x1b0] sm:$0xff]  }
  0x61   : > { %4929 = vmatprep.subr.bf16.mxu1 %v5682_v55  ;;  %4993 = vmatprep.subr.bf16.mxu0 %v5683_v58  ;;  %v5758_v53 = vld [vmem:[%s6209_s7 + $0x270] sm:$0xff]   ;;  %v5754_v55 = vld [vmem:[%s6225_s12 + $0x428] ss:$88 sps:$4 sm:$0xff]  }
  0x62   : > { %v5759_v54 = vld [vmem:[%s6209_s7 + $0x230] sm:$0xff]  }
  0x63   : > { %2918 = vmatmul.mubr.bf16.gmra.mrb[12].mxu0 %v5680_v56  ;;  %2950 = vmatmul.mubr.bf16.gmra.mrb[12].mxu1 %v5681_v57  ;;  %v5755_v56 = vld [vmem:[%s6225_s12 + $0x430] ss:$88 sps:$4 sm:$0xff]   ;;  %v5766_v57 = vld [vmem:[%s6209_s7 + $0x1f8] sm:$0xff]  }
  0x64   : > { %4930 = vmatpush3.bf16.msra.mxu1 %v5684_v59  ;;  %4994 = vmatpush3.bf16.msra.mxu0 %v5685_v60  ;;  %v5760_v58 = vld [vmem:[%s6225_s12 + $0x4dc] ss:$88 sps:$4 sm:$0xff]  }
  0x65   : > { %4931 = vmatprep.subr.bf16.mxu1 %v5686_v61  ;;  %4995 = vmatprep.subr.bf16.mxu0 %v5687_v62  ;;  %v5762_v59 = vld [vmem:[%s6225_s12 + $0x4e4] ss:$88 sps:$4 sm:$0xff]  }
  0x66   : > { %2990 = vmatprep.mubr.bf16.mxu1 %v5692_v1  ;;  %3087 = vmatprep.mubr.bf16.mxu0 %v5695_v4  ;;  %v5767_v60 = vld [vmem:[%s6209_s7 + $0x1b8] sm:$0xff]  }
  0x67   : > { %v5768_v61 = vld [vmem:[%s6209_s7 + $0x278] sm:$0xff]  }
  0x68   : > { %4932 = vmatpush3.bf16.msra.mxu1 %v5688_v63  ;;  %4996 = vmatpush3.bf16.msra.mxu0 %v5689_v0  ;;  %v5769_v62 = vld [vmem:[%s6209_s7 + $0x238] sm:$0xff]   ;;  %v5776_v63 = vld [vmem:[%s6209_s7 + $0x2c0] sm:$0xff]  }
  0x69   : > { %5045 = vmatprep.subr.bf16.mxu1 %v5696_v5  ;;  %5109 = vmatprep.subr.bf16.mxu0 %v5698_v7  ;;  %v5764_v0 = vld [vmem:[%s6225_s12 + $0x4d8] ss:$88 sps:$4 sm:$0xff]   ;;  %v5775_v4 = vld [vmem:[%s6225_s12 + $0x24] ss:$88 sps:$4 sm:$0xff]  }
  0x6a   : > { %v5765_v1 = vld [vmem:[%s6225_s12 + $0x4e0] ss:$88 sps:$4 sm:$0xff]  }
  0x6b   : > { %2991 = vmatmul.mubr.bf16.vlgmr.msra.gmra.mrb[16].mxu1 %v5690_v2  ;;  %3088 = vmatmul.mubr.bf16.vlgmr.msra.gmra.mrb[16].mxu0 %v5693_v3  ;;  %v5778_v2 = vld [vmem:[%s6209_s7 + $0x340] sm:$0xff]   ;;  %v5772_v3 = vld [vmem:[%s6225_s12 + $0x1c] ss:$88 sps:$4 sm:$0xff]   ;;  %v5770_v5 = vld [vmem:[%s6225_s12 + $0x18] ss:$88 sps:$4 sm:$0xff]  }
  0x6c   : > { %5046 = vmatpush3.bf16.msra.mxu1 %v5697_v6  ;;  %5110 = vmatpush3.bf16.msra.mxu0 %v5699_v8  ;;  %v5773_v6 = vld [vmem:[%s6225_s12 + $0x20] ss:$88 sps:$4 sm:$0xff]  }
  0x6d   : > { %2998 = vmatprep.mubr.bf16.mxu1 %v5700_v9  ;;  %3095 = vmatprep.mubr.bf16.mxu0 %v5702_v10  ;;  %v5777_v7 = vld [vmem:[%s6209_s7 + $0x280] sm:$0xff]   ;;  %v5782_v10 = vld [vmem:[%s6225_s12 + $0xd4] ss:$88 sps:$4 sm:$0xff]  }
  0x6e   : > { %5047 = vmatprep.subr.bf16.mxu1 %v5706_v13  ;;  %5111 = vmatprep.subr.bf16.mxu0 %v5708_v15  ;;  %v5779_v8 = vld [vmem:[%s6209_s7 + $0x300] sm:$0xff]   ;;  %v5788_v13 = vld [vmem:[%s6209_s7 + $0x348] sm:$0xff]   ;;  %v5796_v15 = vld [vmem:[%s6209_s7 + $0x2d0] sm:$0xff]  }
  0x6f   : > { %v5780_v9 = vld [vmem:[%s6225_s12 + $0xcc] ss:$88 sps:$4 sm:$0xff]  }
  0x70   : > { %5048 = vmatpush3.bf16.msra.mxu1 %v5707_v14  ;;  %5112 = vmatpush3.bf16.msra.mxu0 %v5709_v16  ;;  %v5789_v14 = vld [vmem:[%s6209_s7 + $0x308] sm:$0xff]  }
  0x71   : > { %5049 = vmatprep.subr.bf16.mxu1 %v5716_v19  ;;  %5113 = vmatprep.subr.bf16.mxu0 %v5718_v23  ;;  %v5784_v16 = vld [vmem:[%s6225_s12 + $0xc8] ss:$88 sps:$4 sm:$0xff]   ;;  %v5790_v19 = vld [vmem:[%s6225_s12 + $0x17c] ss:$88 sps:$4 sm:$0xff]  }
  0x72   : > { %v5806_v23 = vld [vmem:[%s6209_s7 + $0x2d8] sm:$0xff]  }
  0x73   : > { %2999 = vmatmul.mubr.bf16.gmra.mrb[20].mxu1 %v5704_v11  ;;  %3096 = vmatmul.mubr.bf16.gmra.mrb[20].mxu0 %v5705_v12  ;;  %v5786_v11 = vld [vmem:[%s6209_s7 + $0x2c8] sm:$0xff]  }
  0x74   : > { %3006 = vmatprep.mubr.bf16.mxu1 %v5710_v17  ;;  %3103 = vmatprep.mubr.bf16.mxu0 %v5712_v18  ;;  %v5787_v12 = vld [vmem:[%s6209_s7 + $0x288] sm:$0xff]   ;;  %v5798_v18 = vld [vmem:[%s6209_s7 + $0x350] sm:$0xff]  }
  0x75   : > { %5050 = vmatpush3.bf16.msra.mxu1 %v5717_v22  ;;  %5114 = vmatpush3.bf16.msra.mxu0 %v5719_v24  ;;  %v5785_v17 = vld [vmem:[%s6225_s12 + $0xd0] ss:$88 sps:$4 sm:$0xff]   ;;  %v5808_v24 = vld [vmem:[%s6209_s7 + $0x358] sm:$0xff]  }
  0x76   : > { %5051 = vmatprep.subr.bf16.mxu1 %v5726_v27  ;;  %5115 = vmatprep.subr.bf16.mxu0 %v5728_v30  ;;  %v5799_v22 = vld [vmem:[%s6209_s7 + $0x310] sm:$0xff]   ;;  %v5807_v27 = vld [vmem:[%s6209_s7 + $0x298] sm:$0xff]  }
  0x77   : > { %v5802_v30 = vld [vmem:[%s6225_s12 + $0x234] ss:$88 sps:$4 sm:$0xff]  }
  0x79   : > { %5052 = vmatpush3.bf16.msra.mxu1 %v5727_v28  ;;  %5116 = vmatpush3.bf16.msra.mxu0 %v5729_v31  ;;  %v5809_v28 = vld [vmem:[%s6209_s7 + $0x318] sm:$0xff]   ;;  %v5816_v31 = vld [vmem:[%s6209_s7 + $0x2e0] sm:$0xff]  }
  0x7a   : > { %5053 = vmatprep.subr.bf16.mxu1 %v5736_v35  ;;  %5117 = vmatprep.subr.bf16.mxu0 %v5738_v37  ;;  %v5804_v35 = vld [vmem:[%s6225_s12 + $0x228] ss:$88 sps:$4 sm:$0xff]  }
  0x7b   : > { %3007 = vmatmul.mubr.bf16.gmra.mrb[24].mxu1 %v5714_v20  ;;  %3104 = vmatmul.mubr.bf16.gmra.mrb[24].mxu0 %v5715_v21  ;;  %v5792_v20 = vld [vmem:[%s6225_s12 + $0x184] ss:$88 sps:$4 sm:$0xff]   ;;  %v5797_v21 = vld [vmem:[%s6209_s7 + $0x290] sm:$0xff]   ;;  %v5826_v37 = vld [vmem:[%s6209_s7 + $0x2e8] sm:$0xff]  }
  0x7c   : > { %3014 = vmatprep.mubr.bf16.mxu1 %v5720_v25  ;;  %3111 = vmatprep.mubr.bf16.mxu0 %v5722_v26  ;;  %v5794_v25 = vld [vmem:[%s6225_s12 + $0x178] ss:$88 sps:$4 sm:$0xff]  }
  0x7d   : > { %5054 = vmatpush3.bf16.msra.mxu1 %v5737_v36  ;;  %5118 = vmatpush3.bf16.msra.mxu0 %v5739_v38  ;;  %v5795_v26 = vld [vmem:[%s6225_s12 + $0x180] ss:$88 sps:$4 sm:$0xff]   ;;  %v5805_v36 = vld [vmem:[%s6225_s12 + $0x230] ss:$88 sps:$4 sm:$0xff]   ;;  %v5810_v38 = vld [vmem:[%s6225_s12 + $0x2dc] ss:$88 sps:$4 sm:$0xff]  }
  0x7e   : > { %5055 = vmatprep.subr.bf16.mxu1 %v5746_v43  ;;  %5119 = vmatprep.subr.bf16.mxu0 %v5748_v45  ;;  %v5836_v43 = vld [vmem:[%s6209_s7 + $0x2f0] sm:$0xff]   ;;  %v5815_v45 = vld [vmem:[%s6225_s12 + $0x2e0] ss:$88 sps:$4 sm:$0xff]  }
  0x81   : > { %5056 = vmatpush3.bf16.msra.mxu1 %v5747_v44  ;;  %5120 = vmatpush3.bf16.msra.mxu0 %v5749_v46  ;;  %v5814_v44 = vld [vmem:[%s6225_s12 + $0x2d8] ss:$88 sps:$4 sm:$0xff]  }
  0x82   : > { %5057 = vmatprep.subr.bf16.mxu1 %v5756_v51  ;;  %5121 = vmatprep.subr.bf16.mxu0 %v5758_v53  ;;  %v5837_v46 = vld [vmem:[%s6209_s7 + $0x2b0] sm:$0xff]   ;;  %v5846_v51 = vld [vmem:[%s6209_s7 + $0x2f8] sm:$0xff]  }
  0x83   : > { %3015 = vmatmul.mubr.bf16.gmra.mrb[28].mxu1 %v5724_v29  ;;  %3112 = vmatmul.mubr.bf16.gmra.mrb[28].mxu0 %v5725_v32  ;;  %v5800_v29 = vld [vmem:[%s6225_s12 + $0x22c] ss:$88 sps:$4 sm:$0xff]   ;;  %v5848_v53 = vld [vmem:[%s6209_s7 + $0x378] sm:$0xff]  }
  0x84   : > { %3022 = vmatprep.mubr.bf16.mxu1 %v5730_v33  ;;  %3119 = vmatprep.mubr.bf16.mxu0 %v5732_v34  ;;  %v5817_v32 = vld [vmem:[%s6209_s7 + $0x2a0] sm:$0xff]  }
  0x85   : > { %5058 = vmatpush3.bf16.msra.mxu1 %v5757_v52  ;;  %5122 = vmatpush3.bf16.msra.mxu0 %v5759_v54  ;;  %v5818_v33 = vld [vmem:[%s6209_s7 + $0x360] sm:$0xff]   ;;  %v5847_v52 = vld [vmem:[%s6209_s7 + $0x2b8] sm:$0xff]  }
  0x86   : > { %5059 = vmatprep.subr.bf16.mxu1 %v5766_v57  ;;  %5123 = vmatprep.subr.bf16.mxu0 %v5768_v61  ;;  %v5819_v34 = vld [vmem:[%s6209_s7 + $0x320] sm:$0xff]   ;;  %v5849_v54 = vld [vmem:[%s6209_s7 + $0x338] sm:$0xff]  }
  0x87   : > { %v5830_v57 = vld [vmem:[%s6225_s12 + $0x43c] ss:$88 sps:$4 sm:$0xff]   ;;  %v5834_v61 = vld [vmem:[%s6225_s12 + $0x438] ss:$88 sps:$4 sm:$0xff]  }
  0x89   : > { %5060 = vmatpush3.bf16.msra.mxu1 %v5767_v60  ;;  %5124 = vmatpush3.bf16.msra.mxu0 %v5769_v62  ;;  %v5858_v60 = vld [vmem:[%s6209_s7 + $0x440] sm:$0xff]  }
  0x8a   : > { %5173 = vmatprep.subr.bf16.mxu1 %v5776_v63  ;;  %5237 = vmatprep.subr.bf16.mxu0 %v5778_v2  ;;  %v5835_v62 = vld [vmem:[%s6225_s12 + $0x440] ss:$88 sps:$4 sm:$0xff]   ;;  %v5840_v63 = vld [vmem:[%s6225_s12 + $0x4ec] ss:$88 sps:$4 sm:$0xff]   ;;  %v5845_v2 = vld [vmem:[%s6225_s12 + $0x4f0] ss:$88 sps:$4 sm:$0xff]  }
  0x8b   : > { %3023 = vmatmul.mubr.bf16.gmra.mrb[32].mxu1 %v5734_v39  ;;  %3120 = vmatmul.mubr.bf16.gmra.mrb[32].mxu0 %v5735_v40  ;;  %v5812_v39 = vld [vmem:[%s6225_s12 + $0x2e4] ss:$88 sps:$4 sm:$0xff]   ;;  %v5827_v40 = vld [vmem:[%s6209_s7 + $0x2a8] sm:$0xff]  }
  0x8c   : > { %3030 = vmatprep.mubr.bf16.mxu1 %v5740_v41  ;;  %3127 = vmatprep.mubr.bf16.mxu0 %v5742_v42  ;;  %v5828_v41 = vld [vmem:[%s6209_s7 + $0x368] sm:$0xff]  }
  0x8d   : > { %v5829_v42 = vld [vmem:[%s6209_s7 + $0x328] sm:$0xff]  }
  0x93   : > { %3031 = vmatmul.mubr.bf16.gmra.mrb[36].mxu1 %v5744_v47  ;;  %3128 = vmatmul.mubr.bf16.gmra.mrb[36].mxu0 %v5745_v48  ;;  %v5820_v47 = vld [vmem:[%s6225_s12 + $0x38c] ss:$88 sps:$4 sm:$0xff]   ;;  %v5838_v48 = vld [vmem:[%s6209_s7 + $0x370] sm:$0xff]  }
  0x94   : > { %3038 = vmatprep.mubr.bf16.mxu1 %v5750_v49  ;;  %3135 = vmatprep.mubr.bf16.mxu0 %v5752_v50  ;;  %v5839_v49 = vld [vmem:[%s6209_s7 + $0x330] sm:$0xff]  }
  0x95   : > { %v5822_v50 = vld [vmem:[%s6225_s12 + $0x394] ss:$88 sps:$4 sm:$0xff]  }
  0x9b   : > { %3039 = vmatmul.mubr.bf16.gmra.mrb[40].mxu1 %v5754_v55  ;;  %3136 = vmatmul.mubr.bf16.gmra.mrb[40].mxu0 %v5755_v56  ;;  %v5824_v55 = vld [vmem:[%s6225_s12 + $0x388] ss:$88 sps:$4 sm:$0xff]  }
  0x9c   : > { %3046 = vmatprep.mubr.bf16.mxu1 %v5760_v58  ;;  %3143 = vmatprep.mubr.bf16.mxu0 %v5762_v59  ;;  %v5825_v56 = vld [vmem:[%s6225_s12 + $0x390] ss:$88 sps:$4 sm:$0xff]   ;;  %v5832_v58 = vld [vmem:[%s6225_s12 + $0x444] ss:$88 sps:$4 sm:$0xff]  }
  0x9d   : > { %v5856_v59 = vld [vmem:[%s6209_s7 + $0x3c0] sm:$0xff]  }
  0xa3   : > { %3047 = vmatmul.mubr.bf16.gmra.mrb[44].mxu1 %v5764_v0  ;;  %3144 = vmatmul.mubr.bf16.gmra.mrb[44].mxu0 %v5765_v1  ;;  %v5842_v0 = vld [vmem:[%s6225_s12 + $0x4f4] ss:$88 sps:$4 sm:$0xff]   ;;  %v5844_v1 = vld [vmem:[%s6225_s12 + $0x4e8] ss:$88 sps:$4 sm:$0xff]  }
  0xa4   : > { %3184 = vmatprep.mubr.bf16.mxu1 %v5772_v3  ;;  %3281 = vmatprep.mubr.bf16.mxu0 %v5775_v4  ;;  %v5852_v3 = vld [vmem:[%s6225_s12 + $0x2c] ss:$88 sps:$4 sm:$0xff]  }
  0xa5   : > { %v5855_v4 = vld [vmem:[%s6225_s12 + $0x34] ss:$88 sps:$4 sm:$0xff]  }
  0xab   : > { %3185 = vmatmul.mubr.bf16.vlgmr.msra.gmra.mrb[48].mxu1 %v5770_v5  ;;  %3282 = vmatmul.mubr.bf16.vlgmr.msra.gmra.mrb[48].mxu0 %v5773_v6  ;;  %v5850_v5 = vld [vmem:[%s6225_s12 + $0x28] ss:$88 sps:$4 sm:$0xff]  }
  0xac   : > { %5174 = vmatpush3.bf16.msra.mxu1 %v5777_v7  ;;  %5238 = vmatpush3.bf16.msra.mxu0 %v5779_v8  ;;  %v5853_v6 = vld [vmem:[%s6225_s12 + $0x30] ss:$88 sps:$4 sm:$0xff]   ;;  %v5857_v7 = vld [vmem:[%s6209_s7 + $0x380] sm:$0xff]  }
  0xad   : > { %3192 = vmatprep.mubr.bf16.mxu1 %v5780_v9  ;;  %3289 = vmatprep.mubr.bf16.mxu0 %v5782_v10  ;;  %v5859_v8 = vld [vmem:[%s6209_s7 + $0x400] sm:$0xff]   ;;  %v5860_v9 = vld [vmem:[%s6225_s12 + $0xdc] ss:$88 sps:$4 sm:$0xff]  }
  0xae   : > { %5175 = vmatprep.subr.bf16.mxu1 %v5786_v11  ;;  %5239 = vmatprep.subr.bf16.mxu0 %v5788_v13  ;;  %v5862_v10 = vld [vmem:[%s6225_s12 + $0xe4] ss:$88 sps:$4 sm:$0xff]   ;;  %v5866_v11 = vld [vmem:[%s6209_s7 + $0x3c8] sm:$0xff]  }
  0xaf   : > { %v5867_v13 = vld [vmem:[%s6209_s7 + $0x388] sm:$0xff]  }
  0xb0   : > { %5176 = vmatpush3.bf16.msra.mxu1 %v5787_v12  ;;  %5240 = vmatpush3.bf16.msra.mxu0 %v5789_v14  ;;  %v5868_v12 = vld [vmem:[%s6209_s7 + $0x448] sm:$0xff]  }
  0xb1   : > { %5177 = vmatprep.subr.bf16.mxu1 %v5796_v15  ;;  %5241 = vmatprep.subr.bf16.mxu0 %v5798_v18  ;;  %v5869_v14 = vld [vmem:[%s6209_s7 + $0x408] sm:$0xff]   ;;  %v5876_v15 = vld [vmem:[%s6209_s7 + $0x3d0] sm:$0xff]  }
  0xb2   : > { %v5878_v18 = vld [vmem:[%s6209_s7 + $0x450] sm:$0xff]  }
  0xb3   : > { %3193 = vmatmul.mubr.bf16.gmra.mrb[52].mxu1 %v5784_v16  ;;  %3290 = vmatmul.mubr.bf16.gmra.mrb[52].mxu0 %v5785_v17  ;;  %v5864_v16 = vld [vmem:[%s6225_s12 + $0xd8] ss:$88 sps:$4 sm:$0xff]  }
  0xb4   : > { %3200 = vmatprep.mubr.bf16.mxu1 %v5790_v19  ;;  %3297 = vmatprep.mubr.bf16.mxu0 %v5792_v20  ;;  %v5865_v17 = vld [vmem:[%s6225_s12 + $0xe0] ss:$88 sps:$4 sm:$0xff]   ;;  %v5870_v19 = vld [vmem:[%s6225_s12 + $0x18c] ss:$88 sps:$4 sm:$0xff]  }
  0xb5   : > { %5178 = vmatpush3.bf16.msra.mxu1 %v5797_v21  ;;  %5242 = vmatpush3.bf16.msra.mxu0 %v5799_v22  ;;  %v5872_v20 = vld [vmem:[%s6225_s12 + $0x194] ss:$88 sps:$4 sm:$0xff]  }
  0xb6   : > { %5179 = vmatprep.subr.bf16.mxu1 %v5806_v23  ;;  %5243 = vmatprep.subr.bf16.mxu0 %v5808_v24  ;;  %v5877_v21 = vld [vmem:[%s6209_s7 + $0x390] sm:$0xff]   ;;  %v5886_v23 = vld [vmem:[%s6209_s7 + $0x3d8] sm:$0xff]  }
  0xb7   : > { %v5879_v22 = vld [vmem:[%s6209_s7 + $0x410] sm:$0xff]   ;;  %v5888_v24 = vld [vmem:[%s6209_s7 + $0x458] sm:$0xff]  }
  0xb9   : > { %5180 = vmatpush3.bf16.msra.mxu1 %v5807_v27  ;;  %5244 = vmatpush3.bf16.msra.mxu0 %v5809_v28  ;;  %v5874_v27 = vld [vmem:[%s6225_s12 + $0x188] ss:$88 sps:$4 sm:$0xff]  }
  0xba   : > { %5181 = vmatprep.subr.bf16.mxu1 %v5816_v31  ;;  %5245 = vmatprep.subr.bf16.mxu0 %v5818_v33  ;;  %v5875_v28 = vld [vmem:[%s6225_s12 + $0x190] ss:$88 sps:$4 sm:$0xff]   ;;  %v5880_v31 = vld [vmem:[%s6225_s12 + $0x23c] ss:$88 sps:$4 sm:$0xff]   ;;  %v5897_v33 = vld [vmem:[%s6209_s7 + $0x3a0] sm:$0xff]  }
  0xbb   : > { %3201 = vmatmul.mubr.bf16.gmra.mrb[56].mxu1 %v5794_v25  ;;  %3298 = vmatmul.mubr.bf16.gmra.mrb[56].mxu0 %v5795_v26  ;;  %v5887_v25 = vld [vmem:[%s6209_s7 + $0x398] sm:$0xff]  }
  0xbc   : > { %3208 = vmatprep.mubr.bf16.mxu1 %v5800_v29  ;;  %3305 = vmatprep.mubr.bf16.mxu0 %v5802_v30  ;;  %v5889_v26 = vld [vmem:[%s6209_s7 + $0x418] sm:$0xff]   ;;  %v5896_v29 = vld [vmem:[%s6209_s7 + $0x3e0] sm:$0xff]  }
  0xbd   : > { %5182 = vmatpush3.bf16.msra.mxu1 %v5817_v32  ;;  %5246 = vmatpush3.bf16.msra.mxu0 %v5819_v34  ;;  %v5898_v30 = vld [vmem:[%s6209_s7 + $0x460] sm:$0xff]  }
  0xbe   : > { %5183 = vmatprep.subr.bf16.mxu1 %v5826_v37  ;;  %5247 = vmatprep.subr.bf16.mxu0 %v5828_v41  ;;  %v5882_v32 = vld [vmem:[%s6225_s12 + $0x244] ss:$88 sps:$4 sm:$0xff]   ;;  %v5907_v37 = vld [vmem:[%s6209_s7 + $0x3a8] sm:$0xff]   ;;  %v5916_v41 = vld [vmem:[%s6209_s7 + $0x3f0] sm:$0xff]  }
  0xbf   : > { %v5899_v34 = vld [vmem:[%s6209_s7 + $0x420] sm:$0xff]  }
  0xc1   : > { %5184 = vmatpush3.bf16.msra.mxu1 %v5827_v40  ;;  %5248 = vmatpush3.bf16.msra.mxu0 %v5829_v42  ;;  %v5885_v40 = vld [vmem:[%s6225_s12 + $0x240] ss:$88 sps:$4 sm:$0xff]   ;;  %v5890_v42 = vld [vmem:[%s6225_s12 + $0x2ec] ss:$88 sps:$4 sm:$0xff]  }
  0xc2   : > { %5185 = vmatprep.subr.bf16.mxu1 %v5836_v43  ;;  %5249 = vmatprep.subr.bf16.mxu0 %v5838_v48  ;;  %v5918_v43 = vld [vmem:[%s6209_s7 + $0x470] sm:$0xff]   ;;  %v5928_v48 = vld [vmem:[%s6209_s7 + $0x478] sm:$0xff]  }
  0xc3   : > { %3209 = vmatmul.mubr.bf16.gmra.mrb[60].mxu1 %v5804_v35  ;;  %3306 = vmatmul.mubr.bf16.gmra.mrb[60].mxu0 %v5805_v36  ;;  %v5906_v35 = vld [vmem:[%s6209_s7 + $0x3e8] sm:$0xff]  }
  0xc4   : > { %3216 = vmatprep.mubr.bf16.mxu1 %v5810_v38  ;;  %3313 = vmatprep.mubr.bf16.mxu0 %v5812_v39  ;;  %v5908_v36 = vld [vmem:[%s6209_s7 + $0x468] sm:$0xff]   ;;  %v5884_v39 = vld [vmem:[%s6225_s12 + $0x238] ss:$88 sps:$4 sm:$0xff]  }
  0xc5   : > { %5186 = vmatpush3.bf16.msra.mxu1 %v5837_v46  ;;  %5250 = vmatpush3.bf16.msra.mxu0 %v5839_v49  ;;  %v5909_v38 = vld [vmem:[%s6209_s7 + $0x428] sm:$0xff]   ;;  %v5919_v46 = vld [vmem:[%s6209_s7 + $0x430] sm:$0xff]   ;;  %v5927_v49 = vld [vmem:[%s6209_s7 + $0x3b8] sm:$0xff]  }
  0xc6   : > { %5187 = vmatprep.subr.bf16.mxu1 %v5846_v51  ;;  %5251 = vmatprep.subr.bf16.mxu0 %v5848_v53  ;;  %v5895_v51 = vld [vmem:[%s6225_s12 + $0x2f0] ss:$88 sps:$4 sm:$0xff]   ;;  %v5900_v53 = vld [vmem:[%s6225_s12 + $0x39c] ss:$88 sps:$4 sm:$0xff]  }
  0xc9   : > { %5188 = vmatpush3.bf16.msra.mxu1 %v5847_v52  ;;  %5252 = vmatpush3.bf16.msra.mxu0 %v5849_v54  ;;  %v5929_v52 = vld [vmem:[%s6209_s7 + $0x438] sm:$0xff]   ;;  %v5936_v54 = vld [vmem:[%s6209_s7 + $0x4c0] sm:$0xff]  }
  0xca   : > { %5301 = vmatprep.subr.bf16.mxu1 %v5856_v59  ;;  %5365 = vmatprep.subr.bf16.mxu0 %v5858_v60  ;;  %v5910_v59 = vld [vmem:[%s6225_s12 + $0x44c] ss:$88 sps:$4 sm:$0xff]  }
  0xcb   : > { %3217 = vmatmul.mubr.bf16.gmra.mrb[64].mxu1 %v5814_v44  ;;  %3314 = vmatmul.mubr.bf16.gmra.mrb[64].mxu0 %v5815_v45  ;;  %v5892_v44 = vld [vmem:[%s6225_s12 + $0x2f4] ss:$88 sps:$4 sm:$0xff]  }
  0xcc   : > { %3224 = vmatprep.mubr.bf16.mxu1 %v5820_v47  ;;  %3321 = vmatprep.mubr.bf16.mxu0 %v5822_v50  ;;  %v5917_v45 = vld [vmem:[%s6209_s7 + $0x3b0] sm:$0xff]   ;;  %v5926_v47 = vld [vmem:[%s6209_s7 + $0x3f8] sm:$0xff]   ;;  %v5894_v50 = vld [vmem:[%s6225_s12 + $0x2e8] ss:$88 sps:$4 sm:$0xff]  }
  0xcd   : > { %v5912_v60 = vld [vmem:[%s6225_s12 + $0x454] ss:$88 sps:$4 sm:$0xff]  }
  0xd3   : > { %3225 = vmatmul.mubr.bf16.gmra.mrb[68].mxu1 %v5824_v55  ;;  %3322 = vmatmul.mubr.bf16.gmra.mrb[68].mxu0 %v5825_v56  ;;  %v5902_v55 = vld [vmem:[%s6225_s12 + $0x3a4] ss:$88 sps:$4 sm:$0xff]  }
  0xd4   : > { %3232 = vmatprep.mubr.bf16.mxu1 %v5830_v57  ;;  %3329 = vmatprep.mubr.bf16.mxu0 %v5832_v58  ;;  %v5938_v56 = vld [vmem:[%s6209_s7 + $0x540] sm:$0xff]   ;;  %v5904_v57 = vld [vmem:[%s6225_s12 + $0x398] ss:$88 sps:$4 sm:$0xff]  }
  0xd5   : > { %v5905_v58 = vld [vmem:[%s6225_s12 + $0x3a0] ss:$88 sps:$4 sm:$0xff]  }
  0xdb   : > { %3233 = vmatmul.mubr.bf16.gmra.mrb[72].mxu1 %v5834_v61  ;;  %3330 = vmatmul.mubr.bf16.gmra.mrb[72].mxu0 %v5835_v62  ;;  %v5914_v61 = vld [vmem:[%s6225_s12 + $0x448] ss:$88 sps:$4 sm:$0xff]  }
  0xdc   : > { %3240 = vmatprep.mubr.bf16.mxu1 %v5840_v63  ;;  %3337 = vmatprep.mubr.bf16.mxu0 %v5842_v0  ;;  %v5915_v62 = vld [vmem:[%s6225_s12 + $0x450] ss:$88 sps:$4 sm:$0xff]   ;;  %v5920_v63 = vld [vmem:[%s6225_s12 + $0x4fc] ss:$88 sps:$4 sm:$0xff]  }
  0xdd   : > { %v5922_v0 = vld [vmem:[%s6225_s12 + $0x504] ss:$88 sps:$4 sm:$0xff]  }
  0xe3   : > { %3241 = vmatmul.mubr.bf16.gmra.mrb[76].mxu1 %v5844_v1  ;;  %3338 = vmatmul.mubr.bf16.gmra.mrb[76].mxu0 %v5845_v2 }
  0xe4   : > { %3378 = vmatprep.mubr.bf16.mxu1 %v5852_v3  ;;  %3475 = vmatprep.mubr.bf16.mxu0 %v5855_v4  ;;  %v5924_v3 = vld [vmem:[%s6225_s12 + $0x4f8] ss:$88 sps:$4 sm:$0xff]  }
  0xeb   : > { %3379 = vmatmul.mubr.bf16.vlgmr.msra.gmra.mrb[80].mxu1 %v5850_v5  ;;  %3476 = vmatmul.mubr.bf16.vlgmr.msra.gmra.mrb[80].mxu0 %v5853_v6  ;;  %v5925_v6 = vld [vmem:[%s6225_s12 + $0x500] ss:$88 sps:$4 sm:$0xff]  }
  0xec   : > { %5302 = vmatpush3.bf16.msra.mxu1 %v5857_v7  ;;  %5366 = vmatpush3.bf16.msra.mxu0 %v5859_v8 }
  0xed   : > { %3386 = vmatprep.mubr.bf16.mxu1 %v5860_v9  ;;  %3483 = vmatprep.mubr.bf16.mxu0 %v5862_v10 }
  0xee   : > { %5303 = vmatprep.subr.bf16.mxu1 %v5866_v11  ;;  %5367 = vmatprep.subr.bf16.mxu0 %v5868_v12  ;;  %v5932_v11 = vld [vmem:[%s6225_s12 + $0x3c] ss:$88 sps:$4 sm:$0xff]  }
  0xef   : > { %v5935_v12 = vld [vmem:[%s6225_s12 + $0x44] ss:$88 sps:$4 sm:$0xff]  }
  0xf0   : > { %5304 = vmatpush3.bf16.msra.mxu1 %v5867_v13  ;;  %5368 = vmatpush3.bf16.msra.mxu0 %v5869_v14 }
  0xf1   : > { %5305 = vmatprep.subr.bf16.mxu1 %v5876_v15  ;;  %5369 = vmatprep.subr.bf16.mxu0 %v5878_v18 }
  0xf3   : > { %3387 = vmatmul.mubr.bf16.gmra.mrb[84].mxu1 %v5864_v16  ;;  %3484 = vmatmul.mubr.bf16.gmra.mrb[84].mxu0 %v5865_v17  ;;  %v5930_v17 = vld [vmem:[%s6225_s12 + $0x38] ss:$88 sps:$4 sm:$0xff]  }
  0xf4   : > { %3394 = vmatprep.mubr.bf16.mxu1 %v5870_v19  ;;  %3491 = vmatprep.mubr.bf16.mxu0 %v5872_v20  ;;  %v5933_v20 = vld [vmem:[%s6225_s12 + $0x40] ss:$88 sps:$4 sm:$0xff]  }
  0xf5   : > { %5306 = vmatpush3.bf16.msra.mxu1 %v5877_v21  ;;  %5370 = vmatpush3.bf16.msra.mxu0 %v5879_v22 }
  0xf6   : > { %5307 = vmatprep.subr.bf16.mxu1 %v5886_v23  ;;  %5371 = vmatprep.subr.bf16.mxu0 %v5888_v24  ;;  %v5937_v23 = vld [vmem:[%s6209_s7 + $0x480] sm:$0xff]  }
  0xf7   : > { %v5940_v24 = vld [vmem:[%s6225_s12 + $0xec] ss:$88 sps:$4 sm:$0xff]  }
  0xf9   : > { %5308 = vmatpush3.bf16.msra.mxu1 %v5887_v25  ;;  %5372 = vmatpush3.bf16.msra.mxu0 %v5889_v26 }
  0xfa   : > { %5309 = vmatprep.subr.bf16.mxu1 %v5896_v29  ;;  %5373 = vmatprep.subr.bf16.mxu0 %v5898_v30  ;;  %v5939_v29 = vld [vmem:[%s6209_s7 + $0x500] sm:$0xff]   ;;  %v5942_v30 = vld [vmem:[%s6225_s12 + $0xf4] ss:$88 sps:$4 sm:$0xff]  }
  0xfb   : > { %3395 = vmatmul.mubr.bf16.gmra.mrb[88].mxu1 %v5874_v27  ;;  %3492 = vmatmul.mubr.bf16.gmra.mrb[88].mxu0 %v5875_v28 }
  0xfc   : > { %3402 = vmatprep.mubr.bf16.mxu1 %v5880_v31  ;;  %3499 = vmatprep.mubr.bf16.mxu0 %v5882_v32  ;;  %v5946_v31 = vld [vmem:[%s6209_s7 + $0x4c8] sm:$0xff]  }
  0xfd   : > { %5310 = vmatpush3.bf16.msra.mxu1 %v5897_v33  ;;  %5374 = vmatpush3.bf16.msra.mxu0 %v5899_v34 }
  0xfe   : > { %5311 = vmatprep.subr.bf16.mxu1 %v5906_v35  ;;  %5375 = vmatprep.subr.bf16.mxu0 %v5908_v36  ;;  %v5947_v36 = vld [vmem:[%s6209_s7 + $0x488] sm:$0xff]  }
 0x101   : > { %5312 = vmatpush3.bf16.msra.mxu1 %v5907_v37  ;;  %5376 = vmatpush3.bf16.msra.mxu0 %v5909_v38  ;;  %v5948_v37 = vld [vmem:[%s6209_s7 + $0x548] sm:$0xff]  }
 0x102   : > { %5313 = vmatprep.subr.bf16.mxu1 %v5916_v41  ;;  %5377 = vmatprep.subr.bf16.mxu0 %v5918_v43  ;;  %v5949_v38 = vld [vmem:[%s6209_s7 + $0x508] sm:$0xff]  }
 0x103   : > { %3403 = vmatmul.mubr.bf16.gmra.mrb[92].mxu1 %v5884_v39  ;;  %3500 = vmatmul.mubr.bf16.gmra.mrb[92].mxu0 %v5885_v40  ;;  %v5956_v39 = vld [vmem:[%s6209_s7 + $0x4d0] sm:$0xff]   ;;  %v5944_v40 = vld [vmem:[%s6225_s12 + $0xe8] ss:$88 sps:$4 sm:$0xff]  }
 0x104   : > { %3410 = vmatprep.mubr.bf16.mxu1 %v5890_v42  ;;  %3507 = vmatprep.mubr.bf16.mxu0 %v5892_v44  ;;  %v5945_v41 = vld [vmem:[%s6225_s12 + $0xf0] ss:$88 sps:$4 sm:$0xff]  }
 0x105   : > { %5314 = vmatpush3.bf16.msra.mxu1 %v5917_v45  ;;  %5378 = vmatpush3.bf16.msra.mxu0 %v5919_v46  ;;  %v5958_v42 = vld [vmem:[%s6209_s7 + $0x550] sm:$0xff]  }
 0x106   : > { %5315 = vmatprep.subr.bf16.mxu1 %v5926_v47  ;;  %5379 = vmatprep.subr.bf16.mxu0 %v5928_v48  ;;  %v5950_v45 = vld [vmem:[%s6225_s12 + $0x19c] ss:$88 sps:$4 sm:$0xff]  }
 0x107   : > { %v5952_v48 = vld [vmem:[%s6225_s12 + $0x1a4] ss:$88 sps:$4 sm:$0xff]  }
 0x109   : > { %5316 = vmatpush3.bf16.msra.mxu1 %v5927_v49  ;;  %5380 = vmatpush3.bf16.msra.mxu0 %v5929_v52  ;;  %v5957_v49 = vld [vmem:[%s6209_s7 + $0x490] sm:$0xff]  }
 0x10a   : > { %5429 = vmatprep.subr.bf16.mxu1 %v5936_v54  ;;  %5493 = vmatprep.subr.bf16.mxu0 %v5938_v56 }
 0x10b   : > { %3411 = vmatmul.mubr.bf16.gmra.mrb[96].mxu1 %v5894_v50  ;;  %3508 = vmatmul.mubr.bf16.gmra.mrb[96].mxu0 %v5895_v51  ;;  %v5959_v50 = vld [vmem:[%s6209_s7 + $0x510] sm:$0xff]  }
 0x10c   : > { %3418 = vmatprep.mubr.bf16.mxu1 %v5900_v53  ;;  %3515 = vmatprep.mubr.bf16.mxu0 %v5902_v55 }
 0x113   : > { %3419 = vmatmul.mubr.bf16.gmra.mrb[100].mxu1 %v5904_v57  ;;  %3516 = vmatmul.mubr.bf16.gmra.mrb[100].mxu0 %v5905_v58  ;;  %v5966_v57 = vld [vmem:[%s6209_s7 + $0x4d8] sm:$0xff]  }
 0x114   : > { %3426 = vmatprep.mubr.bf16.mxu1 %v5910_v59  ;;  %3523 = vmatprep.mubr.bf16.mxu0 %v5912_v60  ;;  %v5968_v58 = vld [vmem:[%s6209_s7 + $0x558] sm:$0xff]  }
 0x11b   : > { %3427 = vmatmul.mubr.bf16.gmra.mrb[104].mxu1 %v5914_v61  ;;  %3524 = vmatmul.mubr.bf16.gmra.mrb[104].mxu0 %v5915_v62  ;;  %v5967_v61 = vld [vmem:[%s6209_s7 + $0x498] sm:$0xff]  }
 0x11c   : > { %3434 = vmatprep.mubr.bf16.mxu1 %v5920_v63  ;;  %3531 = vmatprep.mubr.bf16.mxu0 %v5922_v0  ;;  %v5954_v62 = vld [vmem:[%s6225_s12 + $0x198] ss:$88 sps:$4 sm:$0xff]  }
 0x11d   : > { %v5955_v63 = vld [vmem:[%s6225_s12 + $0x1a0] ss:$88 sps:$4 sm:$0xff]  }
 0x11e   : > { %v4869_v1 = vpop.f32.mrb[0].mxu0  ;;  %v4893_v2 = vpop.f32.mrb[0].mxu1  ;;  %v5969_v0 = vld [vmem:[%s6209_s7 + $0x518] sm:$0xff]  }
 0x11f   : > { %v4870_v4 = vpop.f32.mrb[1].mxu0  ;;  %v4894_v5 = vpop.f32.mrb[1].mxu1 }
 0x120   : > { %v6476_v7 = vadd.f32 %v4870_v4, %v4869_v1  ;;  %v6478_v8 = vadd.f32 %v4894_v5, %v4893_v2  ;;  %v4872_v9 = vpop.f32.mrb[2].mxu0  ;;  %v4896_v10 = vpop.f32.mrb[2].mxu1  ;;  %v5962_v4 = vld [vmem:[%s6225_s12 + $0x254] ss:$88 sps:$4 sm:$0xff]   ;;  %v5976_v5 = vld [vmem:[%s6209_s7 + $0x4e0] sm:$0xff]  }
 0x121   : > { %v4873_v13 = vpop.f32.mrb[3].mxu0  ;;  %v4897_v14 = vpop.f32.mrb[3].mxu1 }
 0x122   : > { %v6482_v15 = vadd.f32 %v4873_v13, %v4872_v9  ;;  %v6484_v16 = vadd.f32 %v4897_v14, %v4896_v10 }
 0x123   : > { %3435 = vmatmul.mubr.bf16.gmra.mrb[108].mxu1 %v5924_v3  ;;  %3532 = vmatmul.mubr.bf16.gmra.mrb[108].mxu0 %v5925_v6  ;;  %v5960_v3 = vld [vmem:[%s6225_s12 + $0x24c] ss:$88 sps:$4 sm:$0xff]  }
 0x124   : > { %3572 = vmatprep.mubr.bf16.mxu1 %v5932_v11  ;;  %3669 = vmatprep.mubr.bf16.mxu0 %v5935_v12  ;;  %v5978_v6 = vld [vmem:[%s6209_s7 + $0x560] sm:$0xff]  }
 0x125   : > { %v5977_v11 = vld [vmem:[%s6209_s7 + $0x4a0] sm:$0xff]  }
 0x126   : > { %v4875_v18 = vpop.f32.mrb[4].mxu0  ;;  %v4899_v19 = vpop.f32.mrb[4].mxu1 }
 0x127   : > { %v4876_v21 = vpop.f32.mrb[5].mxu0  ;;  %v4900_v22 = vpop.f32.mrb[5].mxu1 }
 0x128   : > { %v6490_v25 = vadd.f32 %v4876_v21, %v4875_v18  ;;  %v6492_v26 = vadd.f32 %v4900_v22, %v4899_v19  ;;  %v4878_v27 = vpop.f32.mrb[6].mxu0  ;;  %v4902_v28 = vpop.f32.mrb[6].mxu1  ;;  %v5979_v18 = vld [vmem:[%s6209_s7 + $0x520] sm:$0xff]   ;;  %v5986_v19 = vld [vmem:[%s6209_s7 + $0x4e8] sm:$0xff]  }
 0x129   : > { %v4879_v32 = vpop.f32.mrb[7].mxu0  ;;  %v4903_v33 = vpop.f32.mrb[7].mxu1 }
 0x12a   : > { %v6497_v34 = vadd.f32 %v4879_v32, %v4878_v27  ;;  %v6499_v35 = vadd.f32 %v4903_v33, %v4902_v28  ;;  %v5987_v27 = vld [vmem:[%s6209_s7 + $0x4a8] sm:$0xff]   ;;  %v5996_v33 = vld [vmem:[%s6209_s7 + $0x4f0] sm:$0xff]  }
 0x12b   : > { %3573 = vmatmul.mubr.bf16.vlgmr.msra.gmra.mrb[112].mxu1 %v5930_v17  ;;  %3670 = vmatmul.mubr.bf16.vlgmr.msra.gmra.mrb[112].mxu0 %v5933_v20  ;;  %v5964_v28 = vld [vmem:[%s6225_s12 + $0x248] ss:$88 sps:$4 sm:$0xff]  }
 0x12c   : > { %5430 = vmatpush3.bf16.msra.mxu1 %v5937_v23  ;;  %5494 = vmatpush3.bf16.msra.mxu0 %v5939_v29  ;;  %v5989_v29 = vld [vmem:[%s6209_s7 + $0x528] sm:$0xff]  }
 0x12d   : > { %3580 = vmatprep.mubr.bf16.mxu1 %v5940_v24  ;;  %3677 = vmatprep.mubr.bf16.mxu0 %v5942_v30  ;;  %v5988_v24 = vld [vmem:[%s6209_s7 + $0x568] sm:$0xff]  }
 0x12e   : > { %v4881_v43 = vpop.f32.mrb[8].mxu0  ;;  %v4905_v44 = vpop.f32.mrb[8].mxu1  ;;  %5431 = vmatprep.subr.bf16.mxu1 %v5946_v31  ;;  %5495 = vmatprep.subr.bf16.mxu0 %v5948_v37  ;;  %v5965_v32 = vld [vmem:[%s6225_s12 + $0x250] ss:$88 sps:$4 sm:$0xff]  }
 0x12f   : > { %v4882_v46 = vpop.f32.mrb[9].mxu0  ;;  %v4906_v47 = vpop.f32.mrb[9].mxu1 }
 0x130   : > { %v6512_v51 = vadd.f32 %v4882_v46, %v4881_v43  ;;  %v6514_v52 = vadd.f32 %v4906_v47, %v4905_v44  ;;  %v4884_v53 = vpop.f32.mrb[10].mxu0  ;;  %v4908_v54 = vpop.f32.mrb[10].mxu1  ;;  %5432 = vmatpush3.bf16.msra.mxu1 %v5947_v36  ;;  %5496 = vmatpush3.bf16.msra.mxu0 %v5949_v38  ;;  %v5998_v36 = vld [vmem:[%s6209_s7 + $0x570] sm:$0xff]   ;;  %v5972_v44 = vld [vmem:[%s6225_s12 + $0x304] ss:$88 sps:$4 sm:$0xff]  }
 0x131   : > { %v4885_v55 = vpop.f32.mrb[11].mxu0  ;;  %v4909_v56 = vpop.f32.mrb[11].mxu1  ;;  %5433 = vmatprep.subr.bf16.mxu1 %v5956_v39  ;;  %5497 = vmatprep.subr.bf16.mxu0 %v5958_v42  ;;  %v5970_v39 = vld [vmem:[%s6225_s12 + $0x2fc] ss:$88 sps:$4 sm:$0xff]  }
 0x132   : > { %v6518_v59 = vadd.f32 %v4885_v55, %v4884_v53  ;;  %v6520_v60 = vadd.f32 %v4909_v56, %v4908_v54  ;;  %v5997_v47 = vld [vmem:[%s6209_s7 + $0x4b0] sm:$0xff]   ;;  %v6008_v55 = vld [vmem:[%s6209_s7 + $0x578] sm:$0xff]  }
 0x133   : > { %3581 = vmatmul.mubr.bf16.gmra.mrb[116].mxu1 %v5944_v40  ;;  %3678 = vmatmul.mubr.bf16.gmra.mrb[116].mxu0 %v5945_v41 }
 0x134   : > { %3588 = vmatprep.mubr.bf16.mxu1 %v5950_v45  ;;  %3685 = vmatprep.mubr.bf16.mxu0 %v5952_v48  ;;  %v5999_v48 = vld [vmem:[%s6209_s7 + $0x530] sm:$0xff]  }
 0x135   : > { %5434 = vmatpush3.bf16.msra.mxu1 %v5957_v49  ;;  %5498 = vmatpush3.bf16.msra.mxu0 %v5959_v50  ;;  %v6006_v49 = vld [vmem:[%s6209_s7 + $0x4f8] sm:$0xff]  }
 0x136   : > { %v4887_v1 = vpop.f32.mrb[12].mxu0  ;;  %v4911_v2 = vpop.f32.mrb[12].mxu1  ;;  %5435 = vmatprep.subr.bf16.mxu1 %v5966_v57  ;;  %5499 = vmatprep.subr.bf16.mxu0 %v5968_v58  ;;  %v6007_v58 = vld [vmem:[%s6209_s7 + $0x4b8] sm:$0xff]  }
 0x137   : > { %v4888_v9 = vpop.f32.mrb[13].mxu0  ;;  %v4912_v10 = vpop.f32.mrb[13].mxu1 }
 0x138   : > { %v6531_v12 = vadd.f32 %v4888_v9, %v4887_v1  ;;  %v6533_v13 = vadd.f32 %v4912_v10, %v4911_v2  ;;  %v4890_v14 = vpop.f32.mrb[14].mxu0  ;;  %v4914_v17 = vpop.f32.mrb[14].mxu1  ;;  %v5982_v10 = vld [vmem:[%s6225_s12 + $0x3b4] ss:$88 sps:$4 sm:$0xff]  }
 0x139   : > { %v4891_v20 = vpop.f32.mrb[15].mxu0  ;;  %v4915_v21 = vpop.f32.mrb[15].mxu1  ;;  %5436 = vmatpush3.bf16.msra.mxu1 %v5967_v61  ;;  %5500 = vmatpush3.bf16.msra.mxu0 %v5969_v0  ;;  %v5974_v0 = vld [vmem:[%s6225_s12 + $0x2f8] ss:$88 sps:$4 sm:$0xff]  }
 0x13a   : > { %v6537_v22 = vadd.f32 %v4891_v20, %v4890_v14  ;;  %v6539_v23 = vadd.f32 %v4915_v21, %v4914_v17  ;;  %5437 = vmatprep.subr.bf16.mxu1 %v5976_v5  ;;  %5501 = vmatprep.subr.bf16.mxu0 %v5978_v6 }
 0x13b   : > { %3589 = vmatmul.mubr.bf16.gmra.mrb[120].mxu1 %v5954_v62  ;;  %3686 = vmatmul.mubr.bf16.gmra.mrb[120].mxu0 %v5955_v63 }
 0x13c   : > { %3596 = vmatprep.mubr.bf16.mxu1 %v5960_v3  ;;  %3693 = vmatprep.mubr.bf16.mxu0 %v5962_v4  ;;  %v5975_v3 = vld [vmem:[%s6225_s12 + $0x300] ss:$88 sps:$4 sm:$0xff]   ;;  %v5980_v4 = vld [vmem:[%s6225_s12 + $0x3ac] ss:$88 sps:$4 sm:$0xff]  }
 0x13d   : > { %5438 = vmatpush3.bf16.msra.mxu1 %v5977_v11  ;;  %5502 = vmatpush3.bf16.msra.mxu0 %v5979_v18 }
 0x13e   : > { %v4933_v30 = vpop.f32.mrb[16].mxu1  ;;  %v4997_v31 = vpop.f32.mrb[16].mxu0  ;;  %5439 = vmatprep.subr.bf16.mxu1 %v5986_v19  ;;  %5503 = vmatprep.subr.bf16.mxu0 %v5988_v24 }
 0x13f   : > { %v4934_v37 = vpop.f32.mrb[17].mxu1  ;;  %v4998_v38 = vpop.f32.mrb[17].mxu0 }
 0x140   : > { %v4935_v40 = vadd.f32 %v4934_v37, %v4933_v30  ;;  %v4999_v41 = vadd.f32 %v4998_v38, %v4997_v31  ;;  %v4936_v42 = vpop.f32.mrb[18].mxu1  ;;  %v5000_v43 = vpop.f32.mrb[18].mxu0 }
 0x141   : > { %v4937_v45 = vpop.f32.mrb[19].mxu1  ;;  %v5001_v46 = vpop.f32.mrb[19].mxu0  ;;  %5440 = vmatpush3.bf16.msra.mxu1 %v5987_v27  ;;  %5504 = vmatpush3.bf16.msra.mxu0 %v5989_v29  ;;  %v5984_v29 = vld [vmem:[%s6225_s12 + $0x3a8] ss:$88 sps:$4 sm:$0xff]  }
 0x142   : > { %v2993_v50 = vadd.f32 %v4935_v40, %v6476_v7  ;;  %v4938_v53 = vadd.f32 %v4937_v45, %v4936_v42  ;;  %v5002_v54 = vadd.f32 %v5001_v46, %v5000_v43  ;;  %5441 = vmatprep.subr.bf16.mxu1 %v5996_v33  ;;  %5505 = vmatprep.subr.bf16.mxu0 %v5998_v36  ;;  %v6009_v7 = vld [vmem:[%s6209_s7 + $0x538] sm:$0xff]  }
 0x143   : > { %3597 = vmatmul.mubr.bf16.gmra.mrb[124].mxu1 %v5964_v28  ;;  %3694 = vmatmul.mubr.bf16.gmra.mrb[124].mxu0 %v5965_v32  ;;  %v5990_v32 = vld [vmem:[%s6225_s12 + $0x45c] ss:$88 sps:$4 sm:$0xff]  }
 0x144   : > { %v6555_v56 = vadd.f32 %v4999_v41, %v2993_v50  ;;  %v2996_v57 = vadd.f32 %v4938_v53, %v6482_v15  ;;  %3604 = vmatprep.mubr.bf16.mxu1 %v5970_v39  ;;  %3701 = vmatprep.mubr.bf16.mxu0 %v5972_v44  ;;  %v5992_v39 = vld [vmem:[%s6225_s12 + $0x464] ss:$88 sps:$4 sm:$0xff]   ;;  %v5994_v53 = vld [vmem:[%s6225_s12 + $0x458] ss:$88 sps:$4 sm:$0xff]  }
 0x145   : > { %5442 = vmatpush3.bf16.msra.mxu1 %v5997_v47  ;;  %5506 = vmatpush3.bf16.msra.mxu0 %v5999_v48 }
 0x146   : > { %v6560_v61 = vadd.f32 %v5002_v54, %v2996_v57  ;;  %v4939_v62 = vpop.f32.mrb[20].mxu1  ;;  %v5003_v63 = vpop.f32.mrb[20].mxu0  ;;  %5443 = vmatprep.subr.bf16.mxu1 %v6006_v49  ;;  %5507 = vmatprep.subr.bf16.mxu0 %v6008_v55 }
 0x147   : > { %v4940_v1 = vpop.f32.mrb[21].mxu1  ;;  %v5004_v2 = vpop.f32.mrb[21].mxu0 }
 0x148   : > { %v4941_v15 = vadd.f32 %v4940_v1, %v4939_v62  ;;  %v5005_v5 = vadd.f32 %v5004_v2, %v5003_v63  ;;  %v4942_v6 = vpop.f32.mrb[22].mxu1  ;;  %v5006_v9 = vpop.f32.mrb[22].mxu0  ;;  %v6002_v62 = vld [vmem:[%s6225_s12 + $0x514] ss:$88 sps:$4 sm:$0xff]  }
 0x149   : > { %v4943_v11 = vpop.f32.mrb[23].mxu1  ;;  %v5007_v14 = vpop.f32.mrb[23].mxu0  ;;  %5444 = vmatpush3.bf16.msra.mxu1 %v6007_v58  ;;  %5508 = vmatpush3.bf16.msra.mxu0 %v6009_v7  ;;  %v6000_v7 = vld [vmem:[%s6225_s12 + $0x50c] ss:$88 sps:$4 sm:$0xff]  }
 0x14a   : > { %v3001_v17 = vadd.f32 %v4941_v15, %v6490_v25  ;;  %v4944_v18 = vadd.f32 %v4943_v11, %v4942_v6  ;;  %v5008_v19 = vadd.f32 %v5007_v14, %v5006_v9  ;;  %v5985_v25 = vld [vmem:[%s6225_s12 + $0x3b0] ss:$88 sps:$4 sm:$0xff]  }
 0x14b   : > { %3605 = vmatmul.mubr.bf16.gmra.mrb[128].mxu1 %v5974_v0  ;;  %3702 = vmatmul.mubr.bf16.gmra.mrb[128].mxu0 %v5975_v3  ;;  %v6004_v11 = vld [vmem:[%s6225_s12 + $0x508] ss:$88 sps:$4 sm:$0xff]  }
 0x14c   : > { %v6567_v20 = vadd.f32 %v5005_v5, %v3001_v17  ;;  %v3004_v21 = vadd.f32 %v4944_v18, %v6497_v34  ;;  %3612 = vmatprep.mubr.bf16.mxu1 %v5980_v4  ;;  %3709 = vmatprep.mubr.bf16.mxu0 %v5982_v10 }
 0x14e   : > { %v6570_v24 = vadd.f32 %v5008_v19, %v3004_v21  ;;  %v4945_v27 = vpop.f32.mrb[24].mxu1  ;;  %v5009_v28 = vpop.f32.mrb[24].mxu0  ;;  %v6012_v21 = vld [vmem:[%s6225_s12 + $0x4c] ss:$88 sps:$4 sm:$0xff]  }
 0x14f   : > { %v4946_v30 = vpop.f32.mrb[25].mxu1  ;;  %v5010_v31 = vpop.f32.mrb[25].mxu0 }
 0x150   : > { %v4947_v33 = vadd.f32 %v4946_v30, %v4945_v27  ;;  %v5011_v36 = vadd.f32 %v5010_v31, %v5009_v28  ;;  %v4948_v37 = vpop.f32.mrb[26].mxu1  ;;  %v5012_v38 = vpop.f32.mrb[26].mxu0  ;;  %v6015_v27 = vld [vmem:[%s6225_s12 + $0x54] ss:$88 sps:$4 sm:$0xff]  }
 0x151   : > { %v4949_v40 = vpop.f32.mrb[27].mxu1  ;;  %v5013_v41 = vpop.f32.mrb[27].mxu0 }
 0x152   : > { %v3009_v34 = vadd.f32 %v4947_v33, %v6512_v51  ;;  %v4950_v42 = vadd.f32 %v4949_v40, %v4948_v37  ;;  %v5014_v43 = vadd.f32 %v5013_v41, %v5012_v38  ;;  %v5995_v51 = vld [vmem:[%s6225_s12 + $0x460] ss:$88 sps:$4 sm:$0xff]  }
 0x153   : > { %3613 = vmatmul.mubr.bf16.gmra.mrb[132].mxu1 %v5984_v29  ;;  %3710 = vmatmul.mubr.bf16.gmra.mrb[132].mxu0 %v5985_v25  ;;  %v6010_v40 = vld [vmem:[%s6225_s12 + $0x48] ss:$88 sps:$4 sm:$0xff]  }
 0x154   : > { %v6577_v44 = vadd.f32 %v5011_v36, %v3009_v34  ;;  %v3012_v45 = vadd.f32 %v4950_v42, %v6518_v59  ;;  %3620 = vmatprep.mubr.bf16.mxu1 %v5990_v32  ;;  %3717 = vmatprep.mubr.bf16.mxu0 %v5992_v39 }
 0x156   : > { %v6580_v46 = vadd.f32 %v5014_v43, %v3012_v45  ;;  %v4951_v47 = vpop.f32.mrb[28].mxu1  ;;  %v5015_v48 = vpop.f32.mrb[28].mxu0  ;;  %v6016_v45 = vld [vmem:[%s6225_s12 + $0xfc] ss:$88 sps:$4 sm:$0xff]  }
 0x157   : > { %v4952_v49 = vpop.f32.mrb[29].mxu1  ;;  %v5016_v50 = vpop.f32.mrb[29].mxu0 }
 0x158   : > { %v4953_v54 = vadd.f32 %v4952_v49, %v4951_v47  ;;  %v5017_v55 = vadd.f32 %v5016_v50, %v5015_v48  ;;  %v4954_v57 = vpop.f32.mrb[30].mxu1  ;;  %v5018_v58 = vpop.f32.mrb[30].mxu0  ;;  %v6018_v47 = vld [vmem:[%s6225_s12 + $0x104] ss:$88 sps:$4 sm:$0xff]  }
 0x159   : > { %v4955_v63 = vpop.f32.mrb[31].mxu1  ;;  %v5019_v0 = vpop.f32.mrb[31].mxu0 }
 0x15a   : > { %v3017_v59 = vadd.f32 %v4953_v54, %v6531_v12  ;;  %v4956_v1 = vadd.f32 %v4955_v63, %v4954_v57  ;;  %v5020_v2 = vadd.f32 %v5019_v0, %v5018_v58  ;;  %v6005_v12 = vld [vmem:[%s6225_s12 + $0x510] ss:$88 sps:$4 sm:$0xff]  }
 0x15b   : > { %3621 = vmatmul.mubr.bf16.gmra.mrb[136].mxu1 %v5994_v53  ;;  %3718 = vmatmul.mubr.bf16.gmra.mrb[136].mxu0 %v5995_v51  ;;  %v6020_v63 = vld [vmem:[%s6225_s12 + $0xf8] ss:$88 sps:$4 sm:$0xff]  }
 0x15c   : > { %v6587_v3 = vadd.f32 %v5017_v55, %v3017_v59  ;;  %v3020_v4 = vadd.f32 %v4956_v1, %v6537_v22  ;;  %3628 = vmatprep.mubr.bf16.mxu1 %v6000_v7  ;;  %3725 = vmatprep.mubr.bf16.mxu0 %v6002_v62 }
 0x15e   : > { %v6590_v15 = vadd.f32 %v5020_v2, %v3020_v4  ;;  %v4957_v5 = vpop.f32.mrb[32].mxu1  ;;  %v5021_v6 = vpop.f32.mrb[32].mxu0  ;;  %v6022_v4 = vld [vmem:[%s6225_s12 + $0x1ac] ss:$88 sps:$4 sm:$0xff]  }
 0x15f   : > { %v4958_v9 = vpop.f32.mrb[33].mxu1  ;;  %v5022_v10 = vpop.f32.mrb[33].mxu0 }
 0x160   : > { %v4959_v14 = vadd.f32 %v4958_v9, %v4957_v5  ;;  %v5023_v17 = vadd.f32 %v5022_v10, %v5021_v6  ;;  %v4960_v18 = vpop.f32.mrb[34].mxu1  ;;  %v5024_v19 = vpop.f32.mrb[34].mxu0  ;;  %v6024_v5 = vld [vmem:[%s6225_s12 + $0x1b4] ss:$88 sps:$4 sm:$0xff]  }
 0x161   : > { %v4961_v28 = vpop.f32.mrb[35].mxu1  ;;  %v5025_v29 = vpop.f32.mrb[35].mxu0 }
 0x162   : > { %v3025_v22 = vadd.f32 %v4959_v14, %v6478_v8  ;;  %v4962_v30 = vadd.f32 %v4961_v28, %v4960_v18  ;;  %v5026_v31 = vadd.f32 %v5025_v29, %v5024_v19  ;;  %v6013_v8 = vld [vmem:[%s6225_s12 + $0x50] ss:$88 sps:$4 sm:$0xff]  }
 0x163   : > { %3629 = vmatmul.mubr.bf16.gmra.mrb[140].mxu1 %v6004_v11  ;;  %3726 = vmatmul.mubr.bf16.gmra.mrb[140].mxu0 %v6005_v12  ;;  %v6026_v28 = vld [vmem:[%s6225_s12 + $0x1a8] ss:$88 sps:$4 sm:$0xff]  }
 0x164   : > { %v6597_v25 = vadd.f32 %v5023_v17, %v3025_v22  ;;  %v3028_v32 = vadd.f32 %v4962_v30, %v6484_v16  ;;  %3766 = vmatprep.mubr.bf16.mxu1 %v6012_v21  ;;  %3863 = vmatprep.mubr.bf16.mxu0 %v6015_v27 }
 0x166   : > { %v6600_v33 = vadd.f32 %v5026_v31, %v3028_v32  ;;  %v4963_v36 = vpop.f32.mrb[36].mxu1  ;;  %v5027_v37 = vpop.f32.mrb[36].mxu0  ;;  %v6028_v32 = vld [vmem:[%s6225_s12 + $0x25c] ss:$88 sps:$4 sm:$0xff]  }
 0x167   : > { %v4964_v38 = vpop.f32.mrb[37].mxu1  ;;  %v5028_v39 = vpop.f32.mrb[37].mxu0 }
 0x168   : > { %v4965_v41 = vadd.f32 %v4964_v38, %v4963_v36  ;;  %v5029_v34 = vadd.f32 %v5028_v39, %v5027_v37  ;;  %v4966_v42 = vpop.f32.mrb[38].mxu1  ;;  %v5030_v43 = vpop.f32.mrb[38].mxu0  ;;  %v6030_v36 = vld [vmem:[%s6225_s12 + $0x264] ss:$88 sps:$4 sm:$0xff]  }
 0x169   : > { %v4967_v48 = vpop.f32.mrb[39].mxu1  ;;  %v5031_v49 = vpop.f32.mrb[39].mxu0 }
 0x16a   : > { %v3033_v16 = vadd.f32 %v4965_v41, %v6492_v26  ;;  %v4968_v50 = vadd.f32 %v4967_v48, %v4966_v42  ;;  %v5032_v53 = vadd.f32 %v5031_v49, %v5030_v43  ;;  %v6021_v26 = vld [vmem:[%s6225_s12 + $0x100] ss:$88 sps:$4 sm:$0xff]  }
 0x16b   : > { %3767 = vmatmul.mubr.bf16.vlgmr.msra.gmra.mrb[144].mxu1 %v6010_v40  ;;  %3864 = vmatmul.mubr.bf16.vlgmr.msra.gmra.mrb[144].mxu0 %v6013_v8  ;;  %v6032_v48 = vld [vmem:[%s6225_s12 + $0x258] ss:$88 sps:$4 sm:$0xff]  }
 0x16c   : > { %v6607_v51 = vadd.f32 %v5029_v34, %v3033_v16  ;;  %v3036_v54 = vadd.f32 %v4968_v50, %v6499_v35  ;;  %3774 = vmatprep.mubr.bf16.mxu1 %v6016_v45  ;;  %3871 = vmatprep.mubr.bf16.mxu0 %v6018_v47 }
 0x16e   : > { %v6610_v55 = vadd.f32 %v5032_v53, %v3036_v54  ;;  %v4969_v57 = vpop.f32.mrb[40].mxu1  ;;  %v5033_v58 = vpop.f32.mrb[40].mxu0  ;;  %v6034_v54 = vld [vmem:[%s6225_s12 + $0x30c] ss:$88 sps:$4 sm:$0xff]  }
 0x16f   : > { %v4970_v7 = vpop.f32.mrb[41].mxu1  ;;  %v5034_v62 = vpop.f32.mrb[41].mxu0 }
 0x170   : > { %v4971_v0 = vadd.f32 %v4970_v7, %v4969_v57  ;;  %v5035_v59 = vadd.f32 %v5034_v62, %v5033_v58  ;;  %v4972_v1 = vpop.f32.mrb[42].mxu1  ;;  %v5036_v2 = vpop.f32.mrb[42].mxu0  ;;  %v6036_v57 = vld [vmem:[%s6225_s12 + $0x314] ss:$88 sps:$4 sm:$0xff]  }
 0x171   : > { %v4973_v6 = vpop.f32.mrb[43].mxu1  ;;  %v5037_v9 = vpop.f32.mrb[43].mxu0 }
 0x172   : > { %v3041_v35 = vadd.f32 %v4971_v0, %v6514_v52  ;;  %v4974_v10 = vadd.f32 %v4973_v6, %v4972_v1  ;;  %v5038_v11 = vadd.f32 %v5037_v9, %v5036_v2  ;;  %v6027_v52 = vld [vmem:[%s6225_s12 + $0x1b0] ss:$88 sps:$4 sm:$0xff]  }
 0x173   : > { %3775 = vmatmul.mubr.bf16.gmra.mrb[148].mxu1 %v6020_v63  ;;  %3872 = vmatmul.mubr.bf16.gmra.mrb[148].mxu0 %v6021_v26  ;;  %v6038_v6 = vld [vmem:[%s6225_s12 + $0x308] ss:$88 sps:$4 sm:$0xff]  }
 0x174   : > { %v6617_v12 = vadd.f32 %v5035_v59, %v3041_v35  ;;  %v3044_v14 = vadd.f32 %v4974_v10, %v6520_v60  ;;  %3782 = vmatprep.mubr.bf16.mxu1 %v6022_v4  ;;  %3879 = vmatprep.mubr.bf16.mxu0 %v6024_v5 }
 0x176   : > { %v6620_v17 = vadd.f32 %v5038_v11, %v3044_v14  ;;  %v4975_v18 = vpop.f32.mrb[44].mxu1  ;;  %v5039_v19 = vpop.f32.mrb[44].mxu0  ;;  %v6040_v14 = vld [vmem:[%s6225_s12 + $0x3bc] ss:$88 sps:$4 sm:$0xff]  }
 0x177   : > { %v4976_v21 = vpop.f32.mrb[45].mxu1  ;;  %v5040_v27 = vpop.f32.mrb[45].mxu0 }
 0x178   : > { %v4977_v29 = vadd.f32 %v4976_v21, %v4975_v18  ;;  %v5041_v22 = vadd.f32 %v5040_v27, %v5039_v19  ;;  %v4978_v30 = vpop.f32.mrb[46].mxu1  ;;  %v5042_v31 = vpop.f32.mrb[46].mxu0  ;;  %v6042_v18 = vld [vmem:[%s6225_s12 + $0x3c4] ss:$88 sps:$4 sm:$0xff]  }
 0x179   : > { %v4979_v37 = vpop.f32.mrb[47].mxu1  ;;  %v5043_v38 = vpop.f32.mrb[47].mxu0 }
 0x17a   : > { %v3049_v60 = vadd.f32 %v4977_v29, %v6533_v13  ;;  %v4980_v39 = vadd.f32 %v4979_v37, %v4978_v30  ;;  %v5044_v40 = vadd.f32 %v5043_v38, %v5042_v31  ;;  %v6033_v13 = vld [vmem:[%s6225_s12 + $0x260] ss:$88 sps:$4 sm:$0xff]  }
 0x17b   : > { %3783 = vmatmul.mubr.bf16.gmra.mrb[152].mxu1 %v6026_v28  ;;  %3880 = vmatmul.mubr.bf16.gmra.mrb[152].mxu0 %v6027_v52  ;;  %v6044_v37 = vld [vmem:[%s6225_s12 + $0x3b8] ss:$88 sps:$4 sm:$0xff]  }
 0x17c   : > { %v6627_v8 = vadd.f32 %v5041_v22, %v3049_v60  ;;  %v3052_v41 = vadd.f32 %v4980_v39, %v6539_v23  ;;  %3790 = vmatprep.mubr.bf16.mxu1 %v6028_v32  ;;  %3887 = vmatprep.mubr.bf16.mxu0 %v6030_v36 }
 0x17e   : > { %v6630_v34 = vadd.f32 %v5044_v40, %v3052_v41  ;;  %v5061_v42 = vpop.f32.mrb[48].mxu1  ;;  %v5125_v43 = vpop.f32.mrb[48].mxu0  ;;  %v6046_v41 = vld [vmem:[%s6225_s12 + $0x46c] ss:$88 sps:$4 sm:$0xff]  }
 0x17f   : > { %v5062_v45 = vpop.f32.mrb[49].mxu1  ;;  %v5126_v47 = vpop.f32.mrb[49].mxu0 }
 0x180   : > { %v5063_v49 = vadd.f32 %v5062_v45, %v5061_v42  ;;  %v5127_v16 = vadd.f32 %v5126_v47, %v5125_v43  ;;  %v5064_v50 = vpop.f32.mrb[50].mxu1  ;;  %v5128_v53 = vpop.f32.mrb[50].mxu0  ;;  %v6048_v42 = vld [vmem:[%s6225_s12 + $0x474] ss:$88 sps:$4 sm:$0xff]  }
 0x181   : > { %v5065_v58 = vpop.f32.mrb[51].mxu1  ;;  %v5129_v7 = vpop.f32.mrb[51].mxu0 }
 0x182   : > { %v3187_v23 = vadd.f32 %v5063_v49, %v6555_v56  ;;  %v5066_v62 = vadd.f32 %v5065_v58, %v5064_v50  ;;  %v5130_v63 = vadd.f32 %v5129_v7, %v5128_v53  ;;  %v6039_v56 = vld [vmem:[%s6225_s12 + $0x310] ss:$88 sps:$4 sm:$0xff]  }
 0x183   : > { %3791 = vmatmul.mubr.bf16.gmra.mrb[156].mxu1 %v6032_v48  ;;  %3888 = vmatmul.mubr.bf16.gmra.mrb[156].mxu0 %v6033_v13  ;;  %v6050_v58 = vld [vmem:[%s6225_s12 + $0x468] ss:$88 sps:$4 sm:$0xff]  }
 0x184   : > { %v6637_v26 = vadd.f32 %v5127_v16, %v3187_v23  ;;  %v3190_v0 = vadd.f32 %v5066_v62, %v6560_v61  ;;  %3798 = vmatprep.mubr.bf16.mxu1 %v6034_v54  ;;  %3895 = vmatprep.mubr.bf16.mxu0 %v6036_v57 }
 0x186   : > { %v6640_v59 = vadd.f32 %v5130_v63, %v3190_v0  ;;  %v5067_v1 = vpop.f32.mrb[52].mxu1  ;;  %v5131_v2 = vpop.f32.mrb[52].mxu0  ;;  %v6052_v0 = vld [vmem:[%s6225_s12 + $0x51c] ss:$88 sps:$4 sm:$0xff]  }
 0x187   : > { %v5068_v4 = vpop.f32.mrb[53].mxu1  ;;  %v5132_v5 = vpop.f32.mrb[53].mxu0 }
 0x188   : > { %v5069_v9 = vadd.f32 %v5068_v4, %v5067_v1  ;;  %v5133_v35 = vadd.f32 %v5132_v5, %v5131_v2  ;;  %v5070_v10 = vpop.f32.mrb[54].mxu1  ;;  %v5134_v11 = vpop.f32.mrb[54].mxu0  ;;  %v6054_v1 = vld [vmem:[%s6225_s12 + $0x524] ss:$88 sps:$4 sm:$0xff]  }
 0x189   : > { %v5071_v19 = vpop.f32.mrb[55].mxu1  ;;  %v5135_v21 = vpop.f32.mrb[55].mxu0 }
 0x18a   : > { %v3195_v61 = vadd.f32 %v5069_v9, %v6567_v20  ;;  %v5072_v27 = vadd.f32 %v5071_v19, %v5070_v10  ;;  %v5136_v28 = vadd.f32 %v5135_v21, %v5134_v11  ;;  %v6045_v20 = vld [vmem:[%s6225_s12 + $0x3c0] ss:$88 sps:$4 sm:$0xff]  }
 0x18b   : > { %3799 = vmatmul.mubr.bf16.gmra.mrb[160].mxu1 %v6038_v6  ;;  %3896 = vmatmul.mubr.bf16.gmra.mrb[160].mxu0 %v6039_v56  ;;  %v6056_v19 = vld [vmem:[%s6225_s12 + $0x518] ss:$88 sps:$4 sm:$0xff]  }
 0x18c   : > { %v6647_v52 = vadd.f32 %v5133_v35, %v3195_v61  ;;  %v3198_v29 = vadd.f32 %v5072_v27, %v6570_v24  ;;  %3806 = vmatprep.mubr.bf16.mxu1 %v6040_v14  ;;  %3903 = vmatprep.mubr.bf16.mxu0 %v6042_v18  ;;  %v6057_v21 = vld [vmem:[%s6225_s12 + $0x520] ss:$88 sps:$4 sm:$0xff]  }
 0x18e   : > { %v6650_v22 = vadd.f32 %v5136_v28, %v3198_v29  ;;  %v5073_v30 = vpop.f32.mrb[56].mxu1  ;;  %v5137_v31 = vpop.f32.mrb[56].mxu0 }
 0x18f   : > { %v5074_v32 = vpop.f32.mrb[57].mxu1  ;;  %v5138_v36 = vpop.f32.mrb[57].mxu0 }
 0x190   : > { %v5075_v38 = vadd.f32 %v5074_v32, %v5073_v30  ;;  %v5139_v60 = vadd.f32 %v5138_v36, %v5137_v31  ;;  %v5076_v39 = vpop.f32.mrb[58].mxu1  ;;  %v5140_v40 = vpop.f32.mrb[58].mxu0 }
 0x191   : > { %v5077_v43 = vpop.f32.mrb[59].mxu1  ;;  %v5141_v45 = vpop.f32.mrb[59].mxu0 }
 0x192   : > { %v3203_v24 = vadd.f32 %v5075_v38, %v6577_v44  ;;  %v5078_v47 = vadd.f32 %v5077_v43, %v5076_v39  ;;  %v5142_v48 = vadd.f32 %v5141_v45, %v5140_v40  ;;  %v6051_v44 = vld [vmem:[%s6225_s12 + $0x470] ss:$88 sps:$4 sm:$0xff]  }
 0x193   : > { %3807 = vmatmul.mubr.bf16.gmra.mrb[164].mxu1 %v6044_v37  ;;  %3904 = vmatmul.mubr.bf16.gmra.mrb[164].mxu0 %v6045_v20 }
 0x194   : > { %v6657_v13 = vadd.f32 %v5139_v60, %v3203_v24  ;;  %v3206_v49 = vadd.f32 %v5078_v47, %v6580_v46  ;;  %3814 = vmatprep.mubr.bf16.mxu1 %v6046_v41  ;;  %3911 = vmatprep.mubr.bf16.mxu0 %v6048_v42 }
 0x196   : > { %v6660_v16 = vadd.f32 %v5142_v48, %v3206_v49  ;;  %v5079_v50 = vpop.f32.mrb[60].mxu1  ;;  %v5143_v53 = vpop.f32.mrb[60].mxu0 }
 0x197   : > { %v5080_v54 = vpop.f32.mrb[61].mxu1  ;;  %v5144_v57 = vpop.f32.mrb[61].mxu0 }
 0x198   : > { %v5081_v7 = vadd.f32 %v5080_v54, %v5079_v50  ;;  %v5145_v23 = vadd.f32 %v5144_v57, %v5143_v53  ;;  %v5082_v62 = vpop.f32.mrb[62].mxu1  ;;  %v5146_v63 = vpop.f32.mrb[62].mxu0 }
 0x199   : > { %v5083_v2 = vpop.f32.mrb[63].mxu1  ;;  %v5147_v4 = vpop.f32.mrb[63].mxu0 }
 0x19a   : > { %v3211_v46 = vadd.f32 %v5081_v7, %v6587_v3  ;;  %v5084_v5 = vadd.f32 %v5083_v2, %v5082_v62  ;;  %v5148_v6 = vadd.f32 %v5147_v4, %v5146_v63 }
 0x19b   : > { %3815 = vmatmul.mubr.bf16.gmra.mrb[168].mxu1 %v6050_v58  ;;  %3912 = vmatmul.mubr.bf16.gmra.mrb[168].mxu0 %v6051_v44 }
 0x19c   : > { %v6667_v56 = vadd.f32 %v5145_v23, %v3211_v46  ;;  %v3214_v9 = vadd.f32 %v5084_v5, %v6590_v15  ;;  %3822 = vmatprep.mubr.bf16.mxu1 %v6052_v0  ;;  %3919 = vmatprep.mubr.bf16.mxu0 %v6054_v1 }
 0x19e   : > { %v6670_v35 = vadd.f32 %v5148_v6, %v3214_v9  ;;  %v5085_v10 = vpop.f32.mrb[64].mxu1  ;;  %v5149_v11 = vpop.f32.mrb[64].mxu0 }
 0x19f   : > { %v5086_v14 = vpop.f32.mrb[65].mxu1  ;;  %v5150_v18 = vpop.f32.mrb[65].mxu0 }
 0x1a0   : > { %v5087_v61 = vadd.f32 %v5086_v14, %v5085_v10  ;;  %v5151_v3 = vadd.f32 %v5150_v18, %v5149_v11  ;;  %v5088_v27 = vpop.f32.mrb[66].mxu1  ;;  %v5152_v28 = vpop.f32.mrb[66].mxu0 }
 0x1a1   : > { %v5089_v29 = vpop.f32.mrb[67].mxu1  ;;  %v5153_v30 = vpop.f32.mrb[67].mxu0 }
 0x1a2   : > { %v3219_v31 = vadd.f32 %v5087_v61, %v6597_v25  ;;  %v5090_v32 = vadd.f32 %v5089_v29, %v5088_v27  ;;  %v5154_v15 = vadd.f32 %v5153_v30, %v5152_v28 }
 0x1a3   : > { %3823 = vmatmul.mubr.bf16.gmra.mrb[172].mxu1 %v6056_v19  ;;  %3920 = vmatmul.mubr.bf16.gmra.mrb[172].mxu0 %v6057_v21 }
 0x1a4   : > { %v6675_v36 = vadd.f32 %v5151_v3, %v3219_v31  ;;  %v3222_v37 = vadd.f32 %v5090_v32, %v6600_v33 }
 0x1a6   : > { %v6678_v20 = vadd.f32 %v5154_v15, %v3222_v37  ;;  %v5091_v38 = vpop.f32.mrb[68].mxu1  ;;  %v5155_v60 = vpop.f32.mrb[68].mxu0 }
 0x1a7   : > { %v5092_v39 = vpop.f32.mrb[69].mxu1  ;;  %v5156_v40 = vpop.f32.mrb[69].mxu0 }
 0x1a8   : > { %v5093_v41 = vadd.f32 %v5092_v39, %v5091_v38  ;;  %v5157_v42 = vadd.f32 %v5156_v40, %v5155_v60  ;;  %v5094_v43 = vpop.f32.mrb[70].mxu1  ;;  %v5158_v45 = vpop.f32.mrb[70].mxu0 }
 0x1a9   : > { %v5095_v24 = vpop.f32.mrb[71].mxu1  ;;  %v5159_v25 = vpop.f32.mrb[71].mxu0 }
 0x1aa   : > { %v3227_v47 = vadd.f32 %v5093_v41, %v6607_v51  ;;  %v5096_v48 = vadd.f32 %v5095_v24, %v5094_v43  ;;  %v5160_v49 = vadd.f32 %v5159_v25, %v5158_v45 }
 0x1ac   : > { %v6681_v50 = vadd.f32 %v5157_v42, %v3227_v47  ;;  %v3230_v33 = vadd.f32 %v5096_v48, %v6610_v55 }
 0x1ae   : > { %v6684_v53 = vadd.f32 %v5160_v49, %v3230_v33  ;;  %v5097_v54 = vpop.f32.mrb[72].mxu1  ;;  %v5161_v57 = vpop.f32.mrb[72].mxu0 }
 0x1af   : > { %v5098_v58 = vpop.f32.mrb[73].mxu1  ;;  %v5162_v44 = vpop.f32.mrb[73].mxu0 }
 0x1b0   : > { %v5099_v7 = vadd.f32 %v5098_v58, %v5097_v54  ;;  %v5163_v23 = vadd.f32 %v5162_v44, %v5161_v57  ;;  %v5100_v62 = vpop.f32.mrb[74].mxu1  ;;  %v5164_v63 = vpop.f32.mrb[74].mxu0 }
 0x1b1   : > { %v5101_v0 = vpop.f32.mrb[75].mxu1  ;;  %v5165_v1 = vpop.f32.mrb[75].mxu0 }
 0x1b2   : > { %v3235_v51 = vadd.f32 %v5099_v7, %v6617_v12  ;;  %v5102_v2 = vadd.f32 %v5101_v0, %v5100_v62  ;;  %v5166_v4 = vadd.f32 %v5165_v1, %v5164_v63 }
 0x1b4   : > { %v6687_v46 = vadd.f32 %v5163_v23, %v3235_v51  ;;  %v3238_v55 = vadd.f32 %v5102_v2, %v6620_v17 }
 0x1b6   : > { %v6690_v5 = vadd.f32 %v5166_v4, %v3238_v55  ;;  %v5103_v6 = vpop.f32.mrb[76].mxu1  ;;  %v5167_v9 = vpop.f32.mrb[76].mxu0 }
 0x1b7   : > { %v5104_v10 = vpop.f32.mrb[77].mxu1  ;;  %v5168_v11 = vpop.f32.mrb[77].mxu0 }
 0x1b8   : > { %v5105_v14 = vadd.f32 %v5104_v10, %v5103_v6  ;;  %v5169_v18 = vadd.f32 %v5168_v11, %v5167_v9  ;;  %v5106_v19 = vpop.f32.mrb[78].mxu1  ;;  %v5170_v21 = vpop.f32.mrb[78].mxu0 }
 0x1b9   : > { %v5107_v61 = vpop.f32.mrb[79].mxu1  ;;  %v5171_v3 = vpop.f32.mrb[79].mxu0 }
 0x1ba   : > { %v3243_v12 = vadd.f32 %v5105_v14, %v6627_v8  ;;  %v5108_v27 = vadd.f32 %v5107_v61, %v5106_v19  ;;  %v5172_v28 = vadd.f32 %v5171_v3, %v5170_v21 }
 0x1bc   : > { %v6693_v29 = vadd.f32 %v5169_v18, %v3243_v12  ;;  %v3246_v17 = vadd.f32 %v5108_v27, %v6630_v34 }
 0x1be   : > { %v6696_v30 = vadd.f32 %v5172_v28, %v3246_v17  ;;  %v5189_v31 = vpop.f32.mrb[80].mxu1  ;;  %v5253_v32 = vpop.f32.mrb[80].mxu0 }
 0x1bf   : > { %v5190_v15 = vpop.f32.mrb[81].mxu1  ;;  %v5254_v37 = vpop.f32.mrb[81].mxu0 }
 0x1c0   : > { %v5191_v38 = vadd.f32 %v5190_v15, %v5189_v31  ;;  %v5255_v60 = vadd.f32 %v5254_v37, %v5253_v32  ;;  %v5192_v39 = vpop.f32.mrb[82].mxu1  ;;  %v5256_v40 = vpop.f32.mrb[82].mxu0 }
 0x1c1   : > { %v5193_v41 = vpop.f32.mrb[83].mxu1  ;;  %v5257_v42 = vpop.f32.mrb[83].mxu0 }
 0x1c2   : > { %v3381_v8 = vadd.f32 %v5191_v38, %v6637_v26  ;;  %v5194_v43 = vadd.f32 %v5193_v41, %v5192_v39  ;;  %v5258_v45 = vadd.f32 %v5257_v42, %v5256_v40 }
 0x1c4   : > { %v6699_v24 = vadd.f32 %v5255_v60, %v3381_v8  ;;  %v3384_v34 = vadd.f32 %v5194_v43, %v6640_v59 }
 0x1c6   : > { %v6702_v25 = vadd.f32 %v5258_v45, %v3384_v34  ;;  %v5195_v47 = vpop.f32.mrb[84].mxu1  ;;  %v5259_v48 = vpop.f32.mrb[84].mxu0 }
 0x1c7   : > { %v5196_v49 = vpop.f32.mrb[85].mxu1  ;;  %v5260_v33 = vpop.f32.mrb[85].mxu0 }
 0x1c8   : > { %v5197_v54 = vadd.f32 %v5196_v49, %v5195_v47  ;;  %v5261_v57 = vadd.f32 %v5260_v33, %v5259_v48  ;;  %v5198_v58 = vpop.f32.mrb[86].mxu1  ;;  %v5262_v44 = vpop.f32.mrb[86].mxu0 }
 0x1c9   : > { %v5199_v7 = vpop.f32.mrb[87].mxu1  ;;  %v5263_v23 = vpop.f32.mrb[87].mxu0 }
 0x1ca   : > { %v3389_v26 = vadd.f32 %v5197_v54, %v6647_v52  ;;  %v5200_v62 = vadd.f32 %v5199_v7, %v5198_v58  ;;  %v5264_v63 = vadd.f32 %v5263_v23, %v5262_v44 }
 0x1cc   : > { %v6705_v0 = vadd.f32 %v5261_v57, %v3389_v26  ;;  %v3392_v59 = vadd.f32 %v5200_v62, %v6650_v22 }
 0x1ce   : > { %v6708_v1 = vadd.f32 %v5264_v63, %v3392_v59  ;;  %v5201_v51 = vpop.f32.mrb[88].mxu1  ;;  %v5265_v2 = vpop.f32.mrb[88].mxu0 }
 0x1cf   : > { %v5202_v4 = vpop.f32.mrb[89].mxu1  ;;  %v5266_v55 = vpop.f32.mrb[89].mxu0 }
 0x1d0   : > { %v5203_v6 = vadd.f32 %v5202_v4, %v5201_v51  ;;  %v5267_v9 = vadd.f32 %v5266_v55, %v5265_v2  ;;  %v5204_v10 = vpop.f32.mrb[90].mxu1  ;;  %v5268_v11 = vpop.f32.mrb[90].mxu0 }
 0x1d1   : > { %v5205_v14 = vpop.f32.mrb[91].mxu1  ;;  %v5269_v18 = vpop.f32.mrb[91].mxu0 }
 0x1d2   : > { %v3397_v52 = vadd.f32 %v5203_v6, %v6657_v13  ;;  %v5206_v19 = vadd.f32 %v5205_v14, %v5204_v10  ;;  %v5270_v21 = vadd.f32 %v5269_v18, %v5268_v11 }
 0x1d4   : > { %v6711_v61 = vadd.f32 %v5267_v9, %v3397_v52  ;;  %v3400_v22 = vadd.f32 %v5206_v19, %v6660_v16 }
 0x1d6   : > { %v6714_v3 = vadd.f32 %v5270_v21, %v3400_v22  ;;  %v5207_v12 = vpop.f32.mrb[92].mxu1  ;;  %v5271_v27 = vpop.f32.mrb[92].mxu0 }
 0x1d7   : > { %v5208_v28 = vpop.f32.mrb[93].mxu1  ;;  %v5272_v17 = vpop.f32.mrb[93].mxu0 }
 0x1d8   : > { %v5209_v31 = vadd.f32 %v5208_v28, %v5207_v12  ;;  %v5273_v32 = vadd.f32 %v5272_v17, %v5271_v27  ;;  %v5210_v15 = vpop.f32.mrb[94].mxu1  ;;  %v5274_v37 = vpop.f32.mrb[94].mxu0 }
 0x1d9   : > { %v5211_v38 = vpop.f32.mrb[95].mxu1  ;;  %v5275_v60 = vpop.f32.mrb[95].mxu0 }
 0x1da   : > { %v3405_v13 = vadd.f32 %v5209_v31, %v6667_v56  ;;  %v5212_v39 = vadd.f32 %v5211_v38, %v5210_v15  ;;  %v5276_v40 = vadd.f32 %v5275_v60, %v5274_v37 }
 0x1dc   : > { %v6717_v41 = vadd.f32 %v5273_v32, %v3405_v13  ;;  %v3408_v16 = vadd.f32 %v5212_v39, %v6670_v35 }
 0x1de   : > { %v6720_v42 = vadd.f32 %v5276_v40, %v3408_v16  ;;  %v5213_v8 = vpop.f32.mrb[96].mxu1  ;;  %v5277_v43 = vpop.f32.mrb[96].mxu0 }
 0x1df   : > { %v5214_v45 = vpop.f32.mrb[97].mxu1  ;;  %v5278_v34 = vpop.f32.mrb[97].mxu0 }
 0x1e0   : > { %v5215_v47 = vadd.f32 %v5214_v45, %v5213_v8  ;;  %v5279_v48 = vadd.f32 %v5278_v34, %v5277_v43  ;;  %v5216_v49 = vpop.f32.mrb[98].mxu1  ;;  %v5280_v33 = vpop.f32.mrb[98].mxu0 }
 0x1e1   : > { %v5217_v54 = vpop.f32.mrb[99].mxu1  ;;  %v5281_v57 = vpop.f32.mrb[99].mxu0 }
 0x1e2   : > { %v3413_v56 = vadd.f32 %v5215_v47, %v6675_v36  ;;  %v5218_v58 = vadd.f32 %v5217_v54, %v5216_v49  ;;  %v5282_v44 = vadd.f32 %v5281_v57, %v5280_v33 }
 0x1e4   : > { %v6723_v7 = vadd.f32 %v5279_v48, %v3413_v56  ;;  %v3416_v35 = vadd.f32 %v5218_v58, %v6678_v20 }
 0x1e6   : > { %v6726_v23 = vadd.f32 %v5282_v44, %v3416_v35  ;;  %v5219_v26 = vpop.f32.mrb[100].mxu1  ;;  %v5283_v62 = vpop.f32.mrb[100].mxu0 }
 0x1e7   : > { %v5220_v63 = vpop.f32.mrb[101].mxu1  ;;  %v5284_v59 = vpop.f32.mrb[101].mxu0 }
 0x1e8   : > { %v5221_v51 = vadd.f32 %v5220_v63, %v5219_v26  ;;  %v5285_v2 = vadd.f32 %v5284_v59, %v5283_v62  ;;  %v5222_v4 = vpop.f32.mrb[102].mxu1  ;;  %v5286_v55 = vpop.f32.mrb[102].mxu0 }
 0x1e9   : > { %v5223_v6 = vpop.f32.mrb[103].mxu1  ;;  %v5287_v9 = vpop.f32.mrb[103].mxu0 }
 0x1ea   : > { %v3421_v36 = vadd.f32 %v5221_v51, %v6681_v50  ;;  %v5224_v10 = vadd.f32 %v5223_v6, %v5222_v4  ;;  %v5288_v11 = vadd.f32 %v5287_v9, %v5286_v55 }
 0x1ec   : > { %v6729_v14 = vadd.f32 %v5285_v2, %v3421_v36  ;;  %v3424_v20 = vadd.f32 %v5224_v10, %v6684_v53 }
 0x1ee   : > { %v6732_v18 = vadd.f32 %v5288_v11, %v3424_v20  ;;  %v5225_v52 = vpop.f32.mrb[104].mxu1  ;;  %v5289_v19 = vpop.f32.mrb[104].mxu0 }
 0x1ef   : > { %v5226_v21 = vpop.f32.mrb[105].mxu1  ;;  %v5290_v22 = vpop.f32.mrb[105].mxu0 }
 0x1f0   : > { %v5227_v12 = vadd.f32 %v5226_v21, %v5225_v52  ;;  %v5291_v27 = vadd.f32 %v5290_v22, %v5289_v19  ;;  %v5228_v28 = vpop.f32.mrb[106].mxu1  ;;  %v5292_v17 = vpop.f32.mrb[106].mxu0 }
 0x1f1   : > { %v5229_v31 = vpop.f32.mrb[107].mxu1  ;;  %v5293_v32 = vpop.f32.mrb[107].mxu0 }
 0x1f2   : > { %v3429_v50 = vadd.f32 %v5227_v12, %v6687_v46  ;;  %v5230_v15 = vadd.f32 %v5229_v31, %v5228_v28  ;;  %v5294_v37 = vadd.f32 %v5293_v32, %v5292_v17 }
 0x1f4   : > { %v6735_v38 = vadd.f32 %v5291_v27, %v3429_v50  ;;  %v3432_v53 = vadd.f32 %v5230_v15, %v6690_v5 }
 0x1f6   : > { %v6738_v60 = vadd.f32 %v5294_v37, %v3432_v53  ;;  %v5231_v13 = vpop.f32.mrb[108].mxu1  ;;  %v5295_v39 = vpop.f32.mrb[108].mxu0 }
 0x1f7   : > { %v5232_v40 = vpop.f32.mrb[109].mxu1  ;;  %v5296_v16 = vpop.f32.mrb[109].mxu0 }
 0x1f8   : > { %v5233_v8 = vadd.f32 %v5232_v40, %v5231_v13  ;;  %v5297_v43 = vadd.f32 %v5296_v16, %v5295_v39  ;;  %v5234_v45 = vpop.f32.mrb[110].mxu1  ;;  %v5298_v34 = vpop.f32.mrb[110].mxu0 }
 0x1f9   : > { %v5235_v47 = vpop.f32.mrb[111].mxu1  ;;  %v5299_v48 = vpop.f32.mrb[111].mxu0 }
 0x1fa   : > { %v3437_v46 = vadd.f32 %v5233_v8, %v6693_v29  ;;  %v5236_v49 = vadd.f32 %v5235_v47, %v5234_v45  ;;  %v5300_v33 = vadd.f32 %v5299_v48, %v5298_v34 }
 0x1fc   : > { %v6741_v54 = vadd.f32 %v5297_v43, %v3437_v46  ;;  %v3440_v5 = vadd.f32 %v5236_v49, %v6696_v30 }
 0x1fe   : > { %v6744_v57 = vadd.f32 %v5300_v33, %v3440_v5  ;;  %v5317_v56 = vpop.f32.mrb[112].mxu1  ;;  %v5381_v58 = vpop.f32.mrb[112].mxu0 }
 0x1ff   : > { %v5318_v44 = vpop.f32.mrb[113].mxu1  ;;  %v5382_v35 = vpop.f32.mrb[113].mxu0 }
 0x200   : > { %v5319_v26 = vadd.f32 %v5318_v44, %v5317_v56  ;;  %v5383_v62 = vadd.f32 %v5382_v35, %v5381_v58  ;;  %v5320_v63 = vpop.f32.mrb[114].mxu1  ;;  %v5384_v59 = vpop.f32.mrb[114].mxu0 }
 0x201   : > { %v5321_v51 = vpop.f32.mrb[115].mxu1  ;;  %v5385_v2 = vpop.f32.mrb[115].mxu0 }
 0x202   : > { %v3575_v29 = vadd.f32 %v5319_v26, %v6699_v24  ;;  %v5322_v4 = vadd.f32 %v5321_v51, %v5320_v63  ;;  %v5386_v55 = vadd.f32 %v5385_v2, %v5384_v59 }
 0x204   : > { %v6747_v6 = vadd.f32 %v5383_v62, %v3575_v29  ;;  %v3578_v30 = vadd.f32 %v5322_v4, %v6702_v25 }
 0x206   : > { %v6750_v9 = vadd.f32 %v5386_v55, %v3578_v30  ;;  %v5323_v36 = vpop.f32.mrb[116].mxu1  ;;  %v5387_v10 = vpop.f32.mrb[116].mxu0 }
 0x207   : > { %v5324_v11 = vpop.f32.mrb[117].mxu1  ;;  %v5388_v20 = vpop.f32.mrb[117].mxu0 }
 0x208   : > { %v5325_v52 = vadd.f32 %v5324_v11, %v5323_v36  ;;  %v5389_v19 = vadd.f32 %v5388_v20, %v5387_v10  ;;  %v5326_v21 = vpop.f32.mrb[118].mxu1  ;;  %v5390_v22 = vpop.f32.mrb[118].mxu0 }
 0x209   : > { %v5327_v12 = vpop.f32.mrb[119].mxu1  ;;  %v5391_v27 = vpop.f32.mrb[119].mxu0 }
 0x20a   : > { %v3583_v24 = vadd.f32 %v5325_v52, %v6705_v0  ;;  %v5328_v28 = vadd.f32 %v5327_v12, %v5326_v21  ;;  %v5392_v17 = vadd.f32 %v5391_v27, %v5390_v22 }
 0x20c   : > { %v6753_v31 = vadd.f32 %v5389_v19, %v3583_v24  ;;  %v3586_v25 = vadd.f32 %v5328_v28, %v6708_v1 }
 0x20e   : > { %v6756_v32 = vadd.f32 %v5392_v17, %v3586_v25  ;;  %v5329_v50 = vpop.f32.mrb[120].mxu1  ;;  %v5393_v15 = vpop.f32.mrb[120].mxu0 }
 0x20f   : > { %v5330_v37 = vpop.f32.mrb[121].mxu1  ;;  %v5394_v53 = vpop.f32.mrb[121].mxu0 }
 0x210   : > { %v5331_v13 = vadd.f32 %v5330_v37, %v5329_v50  ;;  %v5395_v39 = vadd.f32 %v5394_v53, %v5393_v15  ;;  %v5332_v40 = vpop.f32.mrb[122].mxu1  ;;  %v5396_v16 = vpop.f32.mrb[122].mxu0 }
 0x211   : > { %v5333_v8 = vpop.f32.mrb[123].mxu1  ;;  %v5397_v43 = vpop.f32.mrb[123].mxu0 }
 0x212   : > { %v3591_v0 = vadd.f32 %v5331_v13, %v6711_v61  ;;  %v5334_v45 = vadd.f32 %v5333_v8, %v5332_v40  ;;  %v5398_v34 = vadd.f32 %v5397_v43, %v5396_v16 }
 0x214   : > { %v6759_v47 = vadd.f32 %v5395_v39, %v3591_v0  ;;  %v3594_v1 = vadd.f32 %v5334_v45, %v6714_v3 }
 0x216   : > { %v6762_v48 = vadd.f32 %v5398_v34, %v3594_v1  ;;  %v5335_v46 = vpop.f32.mrb[124].mxu1  ;;  %v5399_v49 = vpop.f32.mrb[124].mxu0 }
 0x217   : > { %v5336_v33 = vpop.f32.mrb[125].mxu1  ;;  %v5400_v5 = vpop.f32.mrb[125].mxu0 }
 0x218   : > { %v5337_v56 = vadd.f32 %v5336_v33, %v5335_v46  ;;  %v5401_v58 = vadd.f32 %v5400_v5, %v5399_v49  ;;  %v5338_v44 = vpop.f32.mrb[126].mxu1  ;;  %v5402_v35 = vpop.f32.mrb[126].mxu0 }
 0x219   : > { %v5339_v26 = vpop.f32.mrb[127].mxu1  ;;  %v5403_v62 = vpop.f32.mrb[127].mxu0 }
 0x21a   : > { %v3599_v61 = vadd.f32 %v5337_v56, %v6717_v41  ;;  %v5340_v63 = vadd.f32 %v5339_v26, %v5338_v44  ;;  %v5404_v59 = vadd.f32 %v5403_v62, %v5402_v35 }
 0x21c   : > { %v6765_v51 = vadd.f32 %v5401_v58, %v3599_v61  ;;  %v3602_v3 = vadd.f32 %v5340_v63, %v6720_v42 }
 0x21e   : > { %v6768_v2 = vadd.f32 %v5404_v59, %v3602_v3  ;;  %v5341_v29 = vpop.f32.mrb[128].mxu1  ;;  %v5405_v4 = vpop.f32.mrb[128].mxu0 }
 0x21f   : > { %v5342_v55 = vpop.f32.mrb[129].mxu1  ;;  %v5406_v30 = vpop.f32.mrb[129].mxu0 }
 0x220   : > { %v5343_v36 = vadd.f32 %v5342_v55, %v5341_v29  ;;  %v5407_v10 = vadd.f32 %v5406_v30, %v5405_v4  ;;  %v5344_v11 = vpop.f32.mrb[130].mxu1  ;;  %v5408_v20 = vpop.f32.mrb[130].mxu0 }
 0x221   : > { %v5345_v52 = vpop.f32.mrb[131].mxu1  ;;  %v5409_v19 = vpop.f32.mrb[131].mxu0 }
 0x222   : > { %v3607_v41 = vadd.f32 %v5343_v36, %v6723_v7  ;;  %v5346_v21 = vadd.f32 %v5345_v52, %v5344_v11  ;;  %v5410_v22 = vadd.f32 %v5409_v19, %v5408_v20 }
 0x224   : > { %v6771_v12 = vadd.f32 %v5407_v10, %v3607_v41  ;;  %v3610_v42 = vadd.f32 %v5346_v21, %v6726_v23 }
 0x226   : > { %v6774_v27 = vadd.f32 %v5410_v22, %v3610_v42  ;;  %v5347_v24 = vpop.f32.mrb[132].mxu1  ;;  %v5411_v28 = vpop.f32.mrb[132].mxu0 }
 0x227   : > { %v5348_v17 = vpop.f32.mrb[133].mxu1  ;;  %v5412_v25 = vpop.f32.mrb[133].mxu0 }
 0x228   : > { %v5349_v50 = vadd.f32 %v5348_v17, %v5347_v24  ;;  %v5413_v15 = vadd.f32 %v5412_v25, %v5411_v28  ;;  %v5350_v37 = vpop.f32.mrb[134].mxu1  ;;  %v5414_v53 = vpop.f32.mrb[134].mxu0 }
 0x229   : > { %v5351_v13 = vpop.f32.mrb[135].mxu1  ;;  %v5415_v39 = vpop.f32.mrb[135].mxu0 }
 0x22a   : > { %v3615_v7 = vadd.f32 %v5349_v50, %v6729_v14  ;;  %v5352_v40 = vadd.f32 %v5351_v13, %v5350_v37  ;;  %v5416_v16 = vadd.f32 %v5415_v39, %v5414_v53  ;;  %v378_v13 = vld [vmem:[#allocation2] sm:$0xff] }
 0x22c   : > { %v6777_v8 = vadd.f32 %v5413_v15, %v3615_v7  ;;  %v3618_v23 = vadd.f32 %v5352_v40, %v6732_v18  ;;  %v379_v7 = vld [vmem:[#allocation2 + $0x8] sm:$0xff] }
 0x22e   : > { %v6780_v43 = vadd.f32 %v5416_v16, %v3618_v23  ;;  %v5353_v0 = vpop.f32.mrb[136].mxu1  ;;  %v5417_v45 = vpop.f32.mrb[136].mxu0 }
 0x22f   : > { %v5354_v34 = vpop.f32.mrb[137].mxu1  ;;  %v5418_v1 = vpop.f32.mrb[137].mxu0 }
 0x230   : > { %v5355_v46 = vadd.f32 %v5354_v34, %v5353_v0  ;;  %v5419_v49 = vadd.f32 %v5418_v1, %v5417_v45  ;;  %v5356_v33 = vpop.f32.mrb[138].mxu1  ;;  %v5420_v5 = vpop.f32.mrb[138].mxu0 }
 0x231   : > { %v5357_v56 = vpop.f32.mrb[139].mxu1  ;;  %v5421_v58 = vpop.f32.mrb[139].mxu0 }
 0x232   : > { %v3623_v14 = vadd.f32 %v5355_v46, %v6735_v38  ;;  %v5358_v44 = vadd.f32 %v5357_v56, %v5356_v33  ;;  %v5422_v35 = vadd.f32 %v5421_v58, %v5420_v5 }
 0x234   : > { %v6783_v26 = vadd.f32 %v5419_v49, %v3623_v14  ;;  %v3626_v18 = vadd.f32 %v5358_v44, %v6738_v60  ;;  %v380_v44 = vld [vmem:[#allocation2 + $0x10] sm:$0xff] }
 0x236   : > { %v6786_v62 = vadd.f32 %v5422_v35, %v3626_v18  ;;  %v5359_v61 = vpop.f32.mrb[140].mxu1  ;;  %v5423_v63 = vpop.f32.mrb[140].mxu0 }
 0x237   : > { %v5360_v59 = vpop.f32.mrb[141].mxu1  ;;  %v5424_v3 = vpop.f32.mrb[141].mxu0 }
 0x238   : > { %v5361_v29 = vadd.f32 %v5360_v59, %v5359_v61  ;;  %v5425_v4 = vadd.f32 %v5424_v3, %v5423_v63  ;;  %v5362_v55 = vpop.f32.mrb[142].mxu1  ;;  %v5426_v30 = vpop.f32.mrb[142].mxu0  ;;  %v381_v61 = vld [vmem:[#allocation2 + $0x18] sm:$0xff] }
 0x239   : > { %v5363_v36 = vpop.f32.mrb[143].mxu1  ;;  %v5427_v10 = vpop.f32.mrb[143].mxu0 }
 0x23a   : > { %v3631_v38 = vadd.f32 %v5361_v29, %v6741_v54  ;;  %v5364_v11 = vadd.f32 %v5363_v36, %v5362_v55  ;;  %v5428_v20 = vadd.f32 %v5427_v10, %v5426_v30 }
 0x23c   : > { %v6789_v52 = vadd.f32 %v5425_v4, %v3631_v38  ;;  %v3634_v60 = vadd.f32 %v5364_v11, %v6744_v57 }
 0x23e   : > { %v6792_v19 = vadd.f32 %v5428_v20, %v3634_v60  ;;  %v5445_v41 = vpop.f32.mrb[144].mxu1  ;;  %v5509_v21 = vpop.f32.mrb[144].mxu0 }
 0x23f   : > { %v5446_v22 = vpop.f32.mrb[145].mxu1  ;;  %v5510_v42 = vpop.f32.mrb[145].mxu0 }
 0x240   : > { %v5447_v24 = vadd.f32 %v5446_v22, %v5445_v41  ;;  %v5511_v28 = vadd.f32 %v5510_v42, %v5509_v21  ;;  %v5448_v17 = vpop.f32.mrb[146].mxu1  ;;  %v5512_v25 = vpop.f32.mrb[146].mxu0  ;;  %v382_v21 = vld [vmem:[#allocation2 + $0x20] sm:$0xff] }
 0x241   : > { %v5449_v50 = vpop.f32.mrb[147].mxu1  ;;  %v5513_v15 = vpop.f32.mrb[147].mxu0 }
 0x242   : > { %v3769_v54 = vadd.f32 %v5447_v24, %v6747_v6  ;;  %v5450_v37 = vadd.f32 %v5449_v50, %v5448_v17  ;;  %v5514_v53 = vadd.f32 %v5513_v15, %v5512_v25  ;;  %v383_v24 = vld [vmem:[#allocation2 + $0x28] sm:$0xff] }
 0x244   : > { %v3866_v39 = vadd.f32 %v5511_v28, %v3769_v54  ;;  %v3772_v57 = vadd.f32 %v5450_v37, %v6750_v9 }
 0x246   : > { %v3928_v40 = vadd.f32 %v3866_v39, %v378_v13  ;;  %v3869_v16 = vadd.f32 %v5514_v53, %v3772_v57  ;;  %v5451_v23 = vpop.f32.mrb[148].mxu1  ;;  %v5515_v0 = vpop.f32.mrb[148].mxu0 }
 0x247   : > { %v5452_v45 = vpop.f32.mrb[149].mxu1  ;;  %v5516_v34 = vpop.f32.mrb[149].mxu0 }
 0x248   : > { %3944 = vst [vmem:[#allocation2] sm:$0xff] %v3928_v40  ;;  %v3929_v1 = vadd.f32 %v3869_v16, %v379_v7  ;;  %v5453_v46 = vadd.f32 %v5452_v45, %v5451_v23  ;;  %v5517_v49 = vadd.f32 %v5516_v34, %v5515_v0  ;;  %v5454_v33 = vpop.f32.mrb[150].mxu1  ;;  %v5518_v5 = vpop.f32.mrb[150].mxu0  ;;  %v384_v23 = vld [vmem:[#allocation2 + $0x30] sm:$0xff]  ;;  %v385_v34 = vld [vmem:[#allocation2 + $0x38] sm:$0xff] }
 0x249   : > { %v5455_v6 = vpop.f32.mrb[151].mxu1  ;;  %v5519_v56 = vpop.f32.mrb[151].mxu0 }
 0x24a   : > { %3945 = vst [vmem:[#allocation2 + $0x8] sm:$0xff] %v3929_v1  ;;  %v3777_v58 = vadd.f32 %v5453_v46, %v6753_v31  ;;  %v5456_v14 = vadd.f32 %v5455_v6, %v5454_v33  ;;  %v5520_v9 = vadd.f32 %v5519_v56, %v5518_v5 }
 0x24c   : > { %v3874_v35 = vadd.f32 %v5517_v49, %v3777_v58  ;;  %v3780_v18 = vadd.f32 %v5456_v14, %v6756_v32 }
 0x24e   : > { %v3930_v63 = vadd.f32 %v3874_v35, %v380_v44  ;;  %v3877_v59 = vadd.f32 %v5520_v9, %v3780_v18  ;;  %v5457_v3 = vpop.f32.mrb[152].mxu1  ;;  %v5521_v29 = vpop.f32.mrb[152].mxu0 }
 0x24f   : > { %v5458_v4 = vpop.f32.mrb[153].mxu1  ;;  %v5522_v55 = vpop.f32.mrb[153].mxu0 }
 0x250   : > { %3946 = vst [vmem:[#allocation2 + $0x10] sm:$0xff] %v3930_v63  ;;  %v3931_v30 = vadd.f32 %v3877_v59, %v381_v61  ;;  %v5459_v36 = vadd.f32 %v5458_v4, %v5457_v3  ;;  %v5523_v10 = vadd.f32 %v5522_v55, %v5521_v29  ;;  %v5460_v38 = vpop.f32.mrb[154].mxu1  ;;  %v5524_v11 = vpop.f32.mrb[154].mxu0  ;;  %v386_v63 = vld [vmem:[#allocation2 + $0x40] sm:$0xff]  ;;  %v387_v29 = vld [vmem:[#allocation2 + $0x48] sm:$0xff] }
 0x251   : > { %v5461_v31 = vpop.f32.mrb[155].mxu1  ;;  %v5525_v20 = vpop.f32.mrb[155].mxu0 }
 0x252   : > { %3947 = vst [vmem:[#allocation2 + $0x18] sm:$0xff] %v3931_v30  ;;  %v3785_v60 = vadd.f32 %v5459_v36, %v6759_v47  ;;  %v5462_v41 = vadd.f32 %v5461_v31, %v5460_v38  ;;  %v5526_v32 = vadd.f32 %v5525_v20, %v5524_v11 }
 0x254   : > { %v3882_v22 = vadd.f32 %v5523_v10, %v3785_v60  ;;  %v3788_v42 = vadd.f32 %v5462_v41, %v6762_v48 }
 0x256   : > { %v3932_v28 = vadd.f32 %v3882_v22, %v382_v21  ;;  %v3885_v17 = vadd.f32 %v5526_v32, %v3788_v42  ;;  %v5463_v25 = vpop.f32.mrb[156].mxu1  ;;  %v5527_v50 = vpop.f32.mrb[156].mxu0  ;;  %v388_v42 = vld [vmem:[#allocation2 + $0x50] sm:$0xff] }
 0x257   : > { %v5464_v15 = vpop.f32.mrb[157].mxu1  ;;  %v5528_v54 = vpop.f32.mrb[157].mxu0 }
 0x258   : > { %3948 = vst [vmem:[#allocation2 + $0x20] sm:$0xff] %v3932_v28  ;;  %v3933_v37 = vadd.f32 %v3885_v17, %v383_v24  ;;  %v5465_v53 = vadd.f32 %v5464_v15, %v5463_v25  ;;  %v5529_v13 = vadd.f32 %v5528_v54, %v5527_v50  ;;  %v5466_v39 = vpop.f32.mrb[158].mxu1  ;;  %v5530_v57 = vpop.f32.mrb[158].mxu0  ;;  %v389_v17 = vld [vmem:[#allocation2 + $0x58] sm:$0xff] }
 0x259   : > { %v5467_v47 = vpop.f32.mrb[159].mxu1  ;;  %v5531_v7 = vpop.f32.mrb[159].mxu0 }
 0x25a   : > { %3949 = vst [vmem:[#allocation2 + $0x28] sm:$0xff] %v3933_v37  ;;  %v3793_v40 = vadd.f32 %v5465_v53, %v6765_v51  ;;  %v5468_v16 = vadd.f32 %v5467_v47, %v5466_v39  ;;  %v5532_v48 = vadd.f32 %v5531_v7, %v5530_v57 }
 0x25c   : > { %v3890_v0 = vadd.f32 %v5529_v13, %v3793_v40  ;;  %v3796_v45 = vadd.f32 %v5468_v16, %v6768_v2 }
 0x25e   : > { %v3934_v1 = vadd.f32 %v3890_v0, %v384_v23  ;;  %v3893_v46 = vadd.f32 %v5532_v48, %v3796_v45  ;;  %v5469_v49 = vpop.f32.mrb[160].mxu1  ;;  %v5533_v33 = vpop.f32.mrb[160].mxu0  ;;  %v390_v23 = vld [vmem:[#allocation2 + $0x60] sm:$0xff] }
 0x25f   : > { %v5470_v5 = vpop.f32.mrb[161].mxu1  ;;  %v5534_v6 = vpop.f32.mrb[161].mxu0 }
 0x260   : > { %3950 = vst [vmem:[#allocation2 + $0x30] sm:$0xff] %v3934_v1  ;;  %v3935_v56 = vadd.f32 %v3893_v46, %v385_v34  ;;  %v5471_v58 = vadd.f32 %v5470_v5, %v5469_v49  ;;  %v5535_v14 = vadd.f32 %v5534_v6, %v5533_v33  ;;  %v5472_v9 = vpop.f32.mrb[162].mxu1  ;;  %v5536_v44 = vpop.f32.mrb[162].mxu0  ;;  %v391_v34 = vld [vmem:[#allocation2 + $0x68] sm:$0xff] }
 0x261   : > { %v5473_v51 = vpop.f32.mrb[163].mxu1  ;;  %v5537_v35 = vpop.f32.mrb[163].mxu0 }
 0x262   : > { %3951 = vst [vmem:[#allocation2 + $0x38] sm:$0xff] %v3935_v56  ;;  %v3801_v18 = vadd.f32 %v5471_v58, %v6771_v12  ;;  %v5474_v61 = vadd.f32 %v5473_v51, %v5472_v9  ;;  %v5538_v2 = vadd.f32 %v5537_v35, %v5536_v44 }
 0x264   : > { %v3898_v59 = vadd.f32 %v5535_v14, %v3801_v18  ;;  %v3804_v3 = vadd.f32 %v5474_v61, %v6774_v27  ;;  %v392_v61 = vld [vmem:[#allocation2 + $0x70] sm:$0xff] }
 0x266   : > { %v3936_v4 = vadd.f32 %v3898_v59, %v386_v63  ;;  %v3901_v55 = vadd.f32 %v5538_v2, %v3804_v3  ;;  %v5475_v30 = vpop.f32.mrb[164].mxu1  ;;  %v5539_v36 = vpop.f32.mrb[164].mxu0  ;;  %v393_v59 = vld [vmem:[#allocation2 + $0x78] sm:$0xff] }
 0x267   : > { %v5476_v10 = vpop.f32.mrb[165].mxu1  ;;  %v5540_v38 = vpop.f32.mrb[165].mxu0 }
 0x268   : > { %3952 = vst [vmem:[#allocation2 + $0x40] sm:$0xff] %v3936_v4  ;;  %v3937_v11 = vadd.f32 %v3901_v55, %v387_v29  ;;  %v5477_v31 = vadd.f32 %v5476_v10, %v5475_v30  ;;  %v5541_v20 = vadd.f32 %v5540_v38, %v5539_v36  ;;  %v5478_v60 = vpop.f32.mrb[166].mxu1  ;;  %v5542_v41 = vpop.f32.mrb[166].mxu0  ;;  %v3980_v55 = vld [vmem:[%s6902_s3] sm:$0xff] (!%p4767_p13)  ;;  %v6116_v30 = vmov (!%p4767_p13), 0   ;;  %v3981_v36 = vld [vmem:[%s6902_s3 + $0x8] sm:$0xff] (!%p4767_p13) }
 0x269   : > { %v5479_v12 = vpop.f32.mrb[167].mxu1  ;;  %v5543_v32 = vpop.f32.mrb[167].mxu0  ;;  %6059 = vset.pattern.permute.xlu1 (!%p4767_p13), %v6116_v30  ;;  %6058 = vset.pattern.permute.xlu0 (!%p4767_p13), %v6116_v30  ;;  %v4021_v10 = vlaneseq (!%p4767_p13) }
 0x26a   : > { %3953 = vst [vmem:[#allocation2 + $0x48] sm:$0xff] %v3937_v11  ;;  %v3809_v21 = vadd.f32 %v5477_v31, %v6777_v8  ;;  %v5480_v22 = vadd.f32 %v5479_v12, %v5478_v60  ;;  %v5544_v27 = vadd.f32 %v5543_v32, %v5542_v41  ;;  %3986 = vperm.xlu0 (!%p4767_p13), %6058, %v3980_v55   ;;  %v4031_v11 = vstv (!%p4767_p13), %s6188_s8  ;;  %v3966_v31 = vld [vmem:[#allocation2 + $0x10] sm:$0xff] (!%p4767_p13)  ;;  %v3964_v41 = vld [vmem:[#allocation2] sm:$0xff] (!%p4767_p13) }
 0x26b   : > { %v4022_v38 = vand.u32 (!%p4767_p13), 127, %v4021_v10  ;;  %v3968_v12 = vld [vmem:[#allocation2 + $0x20] sm:$0xff] (!%p4767_p13) }
 0x26c   : > { %v3906_v24 = vadd.f32 %v5541_v20, %v3809_v21  ;;  %v3812_v28 = vadd.f32 %v5480_v22, %v6780_v43  ;;  %v3970_v20 = vld [vmem:[#allocation2 + $0x30] sm:$0xff] (!%p4767_p13) }
 0x26d   : > { %vm4030_vm0 = vcmp.lt.s32.totalorder (!%p4767_p13), %v4022_v38, 8  ;;  %vm4032_vm1 = vcmp.lt.s32.totalorder (!%p4767_p13), %v4022_v38, %v4031_v11 }
 0x26e   : > { %v3938_v25 = vadd.f32 %v3906_v24, %v388_v42  ;;  %v3909_v50 = vadd.f32 %v5544_v27, %v3812_v28  ;;  %v5481_v15 = vpop.f32.mrb[168].mxu1  ;;  %v5545_v54 = vpop.f32.mrb[168].mxu0  ;;  %3991 = vperm.xlu0 (!%p4767_p13), %6058, %v3981_v36   ;;  %vm6824_vm2 = vmand (!%p4767_p13), %vm4030_vm0, %vm4032_vm1 }
 0x26f   : > { %v5482_v37 = vpop.f32.mrb[169].mxu1  ;;  %v5546_v53 = vpop.f32.mrb[169].mxu0  ;;  %v3972_v32 = vld [vmem:[#allocation2 + $0x40] sm:$0xff] (!%p4767_p13) }
 0x270   : > { %3954 = vst [vmem:[#allocation2 + $0x50] sm:$0xff] %v3938_v25  ;;  %v3939_v13 = vadd.f32 %v3909_v50, %v389_v17  ;;  %v5483_v39 = vadd.f32 %v5482_v37, %v5481_v15  ;;  %v5547_v57 = vadd.f32 %v5546_v53, %v5545_v54  ;;  %v5484_v47 = vpop.f32.mrb[170].mxu1  ;;  %v5548_v7 = vpop.f32.mrb[170].mxu0  ;;  %v3967_v15 = vld [vmem:[#allocation2 + $0x18] sm:$0xff] (!%p4767_p13) }
 0x271   : > { %v5485_v8 = vpop.f32.mrb[171].mxu1  ;;  %v5549_v40 = vpop.f32.mrb[171].mxu0  ;;  %v3971_v54 = vld [vmem:[#allocation2 + $0x38] sm:$0xff] (!%p4767_p13) }
 0x272   : > { %3955 = vst [vmem:[#allocation2 + $0x58] sm:$0xff] %v3939_v13  ;;  %v3817_v16 = vadd.f32 %v5483_v39, %v6783_v26  ;;  %v5486_v48 = vadd.f32 %v5485_v8, %v5484_v47  ;;  %v5550_v43 = vadd.f32 %v5549_v40, %v5548_v7  ;;  %v3965_v39 = vld [vmem:[#allocation2 + $0x8] sm:$0xff] (!%p4767_p13) }
 0x273   : > { %v3973_v8 = vld [vmem:[#allocation2 + $0x48] sm:$0xff] (!%p4767_p13) }
 0x274   : > { %v3914_v0 = vadd.f32 %v5547_v57, %v3817_v16  ;;  %v3820_v45 = vadd.f32 %v5486_v48, %v6786_v62  ;;  %v3969_v57 = vld [vmem:[#allocation2 + $0x28] sm:$0xff] (!%p4767_p13) }
 0x276   : > { %v3940_v1 = vadd.f32 %v3914_v0, %v390_v23  ;;  %v3917_v46 = vadd.f32 %v5550_v43, %v3820_v45  ;;  %v5487_v49 = vpop.f32.mrb[172].mxu1  ;;  %v5551_v33 = vpop.f32.mrb[172].mxu0 }
 0x277   : > { %v5488_v5 = vpop.f32.mrb[173].mxu1  ;;  %v5552_v6 = vpop.f32.mrb[173].mxu0  ;;  %v3974_v60 = vld [vmem:[#allocation2 + $0x50] sm:$0xff] (!%p4767_p13) }
 0x278   : > { %3956 = vst [vmem:[#allocation2 + $0x60] sm:$0xff] %v3940_v1  ;;  %v3941_v56 = vadd.f32 %v3917_v46, %v391_v34  ;;  %v5489_v58 = vadd.f32 %v5488_v5, %v5487_v49  ;;  %v5553_v14 = vadd.f32 %v5552_v6, %v5551_v33  ;;  %v5490_v9 = vpop.f32.mrb[174].mxu1  ;;  %v5554_v44 = vpop.f32.mrb[174].mxu0 }
 0x279   : > { %v5491_v26 = vpop.f32.mrb[175].mxu1  ;;  %v5555_v51 = vpop.f32.mrb[175].mxu0  ;;  %v3975_v13 = vld [vmem:[#allocation2 + $0x58] sm:$0xff] (!%p4767_p13) }
 0x27a   : > { %3957 = vst [vmem:[#allocation2 + $0x68] sm:$0xff] %v3941_v56  ;;  %v3825_v35 = vadd.f32 %v5489_v58, %v6789_v52  ;;  %v5492_v18 = vadd.f32 %v5491_v26, %v5490_v9  ;;  %v5556_v62 = vadd.f32 %v5555_v51, %v5554_v44  ;;  %v3982_v52 = vld [vmem:[%s6902_s3 + $0x10] sm:$0xff] (!%p4767_p13) }
 0x27b   : > { %3996 = vperm.xlu1 (!%p4767_p13), %6059, %v3982_v52  }
 0x27c   : > { %v3922_v2 = vadd.f32 %v5553_v14, %v3825_v35  ;;  %v3828_v63 = vadd.f32 %v5492_v18, %v6792_v19  ;;  %3963 = sbr.rel (%p4767_p13) target bundleno = 928 (0x3a0), region = 40  ;;  %v3983_v19 = vld [vmem:[%s6902_s3 + $0x18] sm:$0xff] (!%p4767_p13) }
 0x27e   : > { %v3942_v3 = vadd.f32 %v3922_v2, %v392_v61  ;;  %v3925_v29 = vadd.f32 %v5556_v62, %v3828_v63 }
 0x27f   : > { %4001 = vperm.xlu1 (!%p4767_p13), %6059, %v3983_v19   ;;  %v3976_v21 = vld [vmem:[#allocation2 + $0x60] sm:$0xff] (!%p4767_p13) }
 0x280   : > { %3958 = vst [vmem:[#allocation2 + $0x70] sm:$0xff] %v3942_v3  ;;  %v3943_v4 = vadd.f32 %v3925_v29, %v393_v59 }
 0x281   : > { %v3977_v16 = vld [vmem:[#allocation2 + $0x68] sm:$0xff] (!%p4767_p13) }
 0x282   : > { %3959 = vst [vmem:[#allocation2 + $0x78] sm:$0xff] %v3943_v4 }
 0x287   : > { %v3978_v22 = vld [vmem:[#allocation2 + $0x70] sm:$0xff] }
 0x289   : > { %v3979_v59 = vld [vmem:[#allocation2 + $0x78] sm:$0xff] }
 0x2e9   : > { %v3987_v42 = vpop.permute.xlu0 %3986 }
 0x2ea   : > { %v4004_v50 = vadd.f32 %v3987_v42, %v3964_v41  ;;  %v4008_v37 = vadd.f32 %v3987_v42, %v3968_v12  ;;  %v4012_v53 = vadd.f32 %v3987_v42, %v3972_v32  ;;  %v4016_v47 = vadd.f32 %v3987_v42, %v3976_v21 }
 0x2ec   : > { %v4042_v40 = vsel %vm6824_vm2, %v4004_v50, 0.0  ;;  %v4046_v34 = vsel %vm6824_vm2, %v4008_v37, 0.0  ;;  %v4050_v1 = vsel %vm6824_vm2, %v4012_v53, 0.0  ;;  %v4054_v46 = vsel %vm6824_vm2, %v4016_v47, 0.0 }
 0x2ed   : > { %v3992_v45 = vpop.permute.xlu0 %3991  ;;  %v4138_v9 = vadd.f32 %v4046_v34, %v4042_v40  ;;  %v4150_v35 = vmul.f32 %v4042_v40, %v4042_v40  ;;  %v4154_v18 = vmul.f32 %v4046_v34, %v4046_v34  ;;  %v4158_v10 = vmul.f32 %v4050_v1, %v4050_v1 }
 0x2ee   : > { %v4005_v56 = vadd.f32 %v3992_v45, %v3965_v39  ;;  %v4009_v58 = vadd.f32 %v3992_v45, %v3969_v57  ;;  %v4013_v14 = vadd.f32 %v3992_v45, %v3973_v8  ;;  %v4017_v44 = vadd.f32 %v3992_v45, %v3977_v16 }
 0x2ef   : > { %v4139_v62 = vadd.f32 %v4138_v9, %v4050_v1  ;;  %v4166_v38 = vadd.f32 %v4154_v18, %v4150_v35 }
 0x2f0   : > { %v4043_v26 = vsel %vm6824_vm2, %v4005_v56, 0.0  ;;  %v4047_v61 = vsel %vm6824_vm2, %v4009_v58, 0.0  ;;  %v4051_v2 = vsel %vm6824_vm2, %v4013_v14, 0.0  ;;  %v4055_v63 = vsel %vm6824_vm2, %v4017_v44, 0.0 }
 0x2f1   : > { %v4819_v3 = vpack.c.bf16 %v4047_v61, %v4046_v34  ;;  %v4829_v29 = vpack.c.bf16 %v4051_v2, %v4050_v1  ;;  %v4839_v4 = vpack.c.bf16 %v4055_v63, %v4054_v46  ;;  %v4141_v52 = vadd.f32 %v4047_v61, %v4043_v26 }
 0x2f2   : > { %v4140_v55 = vadd.f32 %v4139_v62, %v4054_v46  ;;  %v4809_v30 = vpack.c.bf16 %v4043_v26, %v4042_v40  ;;  %v4167_v32 = vadd.f32 %v4166_v38, %v4158_v10  ;;  %v4151_v53 = vmul.f32 %v4043_v26, %v4043_v26 }
 0x2f3   : > { %4847 = vst [vmem:[%s6194_s15 + $0x10] sm:$0xff] %v4819_v3   ;;  %4849 = vst [vmem:[%s6194_s15 + $0x20] sm:$0xff] %v4829_v29   ;;  %v4142_v36 = vadd.f32 %v4141_v52, %v4051_v2  ;;  %v4155_v24 = vmul.f32 %v4047_v61, %v4047_v61  ;;  %v4159_v8 = vmul.f32 %v4051_v2, %v4051_v2 }
 0x2f4   : > { %4851 = vst [vmem:[%s6194_s15 + $0x30] sm:$0xff] %v4839_v4   ;;  %4178 = vadd.xlane.f32.xlu0 %v4140_v55  ;;  %4810 = vst [vmem:[%s6194_s15] sm:$0xff] %v4809_v30  }
 0x2f5   : > { %v4143_v12 = vadd.f32 %v4142_v36, %v4055_v63  ;;  %v4169_v40 = vadd.f32 %v4155_v24, %v4151_v53 }
 0x2f7   : > { %4180 = vadd.xlane.f32.xlu1 %v4143_v12 }
 0x2fa   : > { %v3997_v27 = vpop.permute.xlu1 %3996 }
 0x2fb   : > { %v4006_v28 = vadd.f32 %v3997_v27, %v3966_v31  ;;  %v4010_v17 = vadd.f32 %v3997_v27, %v3970_v20  ;;  %v4014_v25 = vadd.f32 %v3997_v27, %v3974_v60  ;;  %v4018_v7 = vadd.f32 %v3997_v27, %v3978_v22 }
 0x2fd   : > { %v4044_v48 = vsel %vm6824_vm2, %v4006_v28, 0.0  ;;  %v4048_v43 = vsel %vm6824_vm2, %v4010_v17, 0.0  ;;  %v4052_v23 = vsel %vm6824_vm2, %v4014_v25, 0.0  ;;  %v4056_v49 = vsel %vm6824_vm2, %v4018_v7, 0.0 }
 0x2fe   : > { %v4002_v0 = vpop.permute.xlu1 %4001  ;;  %v4144_v51 = vadd.f32 %v4048_v43, %v4044_v48  ;;  %v4162_v25 = vmul.f32 %v4054_v46, %v4054_v46  ;;  %v4152_v50 = vmul.f32 %v4044_v48, %v4044_v48  ;;  %v4164_v39 = vmul.f32 %v4056_v49, %v4056_v49 }
 0x2ff   : > { %v4007_v33 = vadd.f32 %v4002_v0, %v3967_v15  ;;  %v4011_v5 = vadd.f32 %v4002_v0, %v3971_v54  ;;  %v4015_v6 = vadd.f32 %v4002_v0, %v3975_v13  ;;  %v4019_v11 = vadd.f32 %v4002_v0, %v3979_v59 }
 0x300   : > { %v4145_v19 = vadd.f32 %v4144_v51, %v4052_v23  ;;  %v4156_v15 = vmul.f32 %v4048_v43, %v4048_v43  ;;  %v4160_v54 = vmul.f32 %v4052_v23, %v4052_v23  ;;  %v4168_v13 = vadd.f32 %v4167_v32, %v4162_v25 }
 0x301   : > { %v4045_v20 = vsel %vm6824_vm2, %v4007_v33, 0.0  ;;  %v4049_v60 = vsel %vm6824_vm2, %v4011_v5, 0.0  ;;  %v4053_v41 = vsel %vm6824_vm2, %v4015_v6, 0.0  ;;  %v4057_v21 = vsel %vm6824_vm2, %v4019_v11, 0.0 }
 0x302   : > { %v4146_v31 = vadd.f32 %v4145_v19, %v4056_v49  ;;  %v4814_v22 = vpack.c.bf16 %v4045_v20, %v4044_v48  ;;  %v4824_v27 = vpack.c.bf16 %v4049_v60, %v4048_v43  ;;  %v4834_v42 = vpack.c.bf16 %v4053_v41, %v4052_v23  ;;  %4191 = vadd.xlane.f32.xlu1 %v4168_v13 }
 0x303   : > { %v4844_v28 = vpack.c.bf16 %v4057_v21, %v4056_v49  ;;  %v4147_v17 = vadd.f32 %v4049_v60, %v4045_v20  ;;  %v4172_v57 = vadd.f32 %v4156_v15, %v4152_v50  ;;  %v4153_v47 = vmul.f32 %v4045_v20, %v4045_v20 }
 0x304   : > { %4846 = vst [vmem:[%s6194_s15 + $0x8] sm:$0xff] %v4814_v22   ;;  %4182 = vadd.xlane.f32.xlu0 %v4146_v31  ;;  %4848 = vst [vmem:[%s6194_s15 + $0x18] sm:$0xff] %v4824_v27   ;;  %v4157_v16 = vmul.f32 %v4049_v60, %v4049_v60  ;;  %v4163_v48 = vmul.f32 %v4055_v63, %v4055_v63  ;;  %v4170_v43 = vadd.f32 %v4169_v40, %v4159_v8 }
 0x305   : > { %4850 = vst [vmem:[%s6194_s15 + $0x28] sm:$0xff] %v4834_v42   ;;  %4852 = vst [vmem:[%s6194_s15 + $0x38] sm:$0xff] %v4844_v28   ;;  %v4148_v37 = vadd.f32 %v4147_v17, %v4053_v41  ;;  %v4173_v0 = vadd.f32 %v4172_v57, %v4160_v54  ;;  %v4161_v23 = vmul.f32 %v4053_v41, %v4053_v41 }
 0x306   : > { %v4175_v45 = vadd.f32 %v4157_v16, %v4153_v47  ;;  %v4171_v1 = vadd.f32 %v4170_v43, %v4163_v48  ;;  %v4165_v49 = vmul.f32 %v4057_v21, %v4057_v21 }
 0x307   : > { %v4149_v7 = vadd.f32 %v4148_v37, %v4057_v21  ;;  %v4174_v34 = vadd.f32 %v4173_v0, %v4164_v39 }
 0x308   : > { %v4176_v46 = vadd.f32 %v4175_v45, %v4161_v23 }
 0x309   : > { %4184 = vadd.xlane.f32.xlu0 %v4149_v7  ;;  %4195 = vadd.xlane.f32.xlu1 %v4174_v34 }
 0x30a   : > { %v4177_v33 = vadd.f32 %v4176_v46, %v4165_v49 }
 0x30d   : > { %4193 = vadd.xlane.f32.xlu0 %v4171_v1 }
 0x311   : > { %4197 = vadd.xlane.f32.xlu0 %v4177_v33 }
 0x381   : > { %v4179_v5 = vpop.xlane.xlu0 %4178 }
 0x382   : > { %4187 = vst.msk [vmem:[%s6199_s20] sm:$0xff] %vm4186_vm3, %v4179_v5 }
 0x384   : > { %v4181_v6 = vpop.xlane.xlu1 %4180 }
 0x385   : > { %4188 = vst.msk [vmem:[%s6199_s20 + $0x8] sm:$0xff] %vm4186_vm3, %v4181_v6 }
 0x38f   : > { %v4192_v58 = vpop.xlane.xlu1 %4191 }
 0x390   : > { %4199 = vst.msk [vmem:[%s6204_s24] sm:$0xff] %vm4186_vm3, %v4192_v58 }
 0x391   : > { %v4183_v56 = vpop.xlane.xlu0 %4182 }
 0x392   : > { %4189 = vst.msk [vmem:[%s6199_s20 + $0x10] sm:$0xff] %vm4186_vm3, %v4183_v56 }
 0x396   : > { %v4185_v14 = vpop.xlane.xlu0 %4184  ;;  %v4196_v9 = vpop.xlane.xlu1 %4195 }
 0x397   : > { %4190 = vst.msk [vmem:[%s6199_s20 + $0x18] sm:$0xff] %vm4186_vm3, %v4185_v14  ;;  %4201 = vst.msk [vmem:[%s6204_s24 + $0x10] sm:$0xff] %vm4186_vm3, %v4196_v9 }
 0x39a   : > { %v4194_v44 = vpop.xlane.xlu0 %4193 }
 0x39b   : > { %4200 = vst.msk [vmem:[%s6204_s24 + $0x8] sm:$0xff] %vm4186_vm3, %v4194_v44 }
 0x39e   : > { %v4198_v26 = vpop.xlane.xlu0 %4197 }
 0x39f   : > { %4202 = vst.msk [vmem:[%s6204_s24 + $0x18] sm:$0xff] %vm4186_vm3, %v4198_v26 }
 0x3a0 PF: > { %s23_s29 = sadd.s32 1, %s6112_s29   ;;  %s6909_s8 = sld [smem:[#allocation6_spill]] }
 0x3a1   : > { %p20_p0 = scmp.ge.s32.totalorder %s23_s29, 10   ;;  %s6910_s26 = smov %s6104_s28 }
 0x3a2   : > { %s6911_s27 = smov %s6108_s0  ;;  %s6912_s28 = smov %s6915_s30 }
 0x3a3   :  { %22 = sbr.rel (!%p20_p0) target bundleno = 18 (0x12), region = 95 }
 0x3a6   : > { %s6913_s0 = smov %s6909_s8 }

</bundles_post_ra>
